<compile_context>
chip_gen: v5e
topology: v5e:2x2
jax: 0.10.0
libtpu: 0.0.40
codegen_flags: <defaults>
</compile_context>

<pallas_src>
import functools

import jax
import jax.numpy as jnp
import numpy as np
from jax.experimental import pallas as pl
from jax.experimental.pallas import tpu as pltpu


# ----------------------------------------------------------------------------
# fused kernel: nconv chain (all bases, all orders) + channel concat + 1x1 conv
# ----------------------------------------------------------------------------
def _gcn_fused_kernel(x_ref, *rest, order, n_bases):
    # x_ref:            (1, TM, C, N)       activations, one batch elem, TM m-slices
    # rest[:n_bases]:   S refs, (1, TM, N, N) graph bases for the same slices
    # w_ref:            (Cout, Cin_total)   1x1-conv weight, Cin_total=(order*S+1)*C
    # b_ref:            (Cout, 1)           1x1-conv bias
    # o_ref:            (1, 1, TM, Cout, N) output tile
    # h_ref:            (TM, Cin_total, N)  VMEM scratch holding the channel concat
    a_refs = rest[:n_bases]
    w_ref, b_ref, o_ref, h_ref = rest[n_bases:]
    S = n_bases
    TM, C = x_ref.shape[1], x_ref.shape[2]

    x0 = x_ref[0]                               # (TM, C, N), input dtype
    h_ref[:, 0:C, :] = x0                       # identity term of the concat

    j = 1
    for s in range(S):                          # static unroll over bases
        a_s = a_refs[s][0]                      # (TM, N, N)
        cur = x0
        for _ in range(order):                  # static unroll over powers
            # nconv power (batched over m):  cur[m] <- cur[m] @ A_s[m]
            cur = jnp.einsum('mcn,mnv->mcv', cur, a_s,
                             preferred_element_type=jnp.float32).astype(x0.dtype)
            h_ref[:, j * C:(j + 1) * C, :] = cur
            j += 1

    # 1x1 conv: one K = Cin_total matmul per m-slice; each output written once.
    w = w_ref[...]                              # (Cout, Cin_total)
    bias = b_ref[...].astype(jnp.float32)       # (Cout, 1)
    for m in range(TM):                         # static unroll over m-slices
        om = jnp.dot(w, h_ref[m], preferred_element_type=jnp.float32) + bias
        o_ref[0, 0, m] = om.astype(o_ref.dtype)


# ----------------------------------------------------------------------------
# tile-size derivation: biggest m-tile that fits a (v7x-safe) VMEM budget
# ----------------------------------------------------------------------------
def _pick_tm(B, M, C, N, S, Cout, Cin_total, itemsize, budget_bytes):
    def est(tm):
        a = S * tm * N * N * itemsize
        x = tm * C * N * itemsize
        o = tm * Cout * N * itemsize
        w = (Cout * Cin_total + Cout) * itemsize
        h = tm * Cin_total * N * 4              # scratch (single-buffered)
        return 2 * (a + x + o + w) + h          # inputs/outputs double-buffered

    divisors = [d for d in range(1, M + 1) if M % d == 0]
    fitting = [d for d in divisors if est(d) <= budget_bytes] or [1]
    tm = max(fitting)
    if B * (M // tm) < 2:                       # expose >= 2 steps (v7x 2 TCs)
        multi = [d for d in fitting if M // d >= 2]
        if multi:
            tm = max(multi)
    return tm


# ----------------------------------------------------------------------------
# wrapper: layout once in, layout once out, one pallas_call for everything
# ----------------------------------------------------------------------------
@functools.partial(jax.jit, static_argnames=("order", "tm"))
def gcn_forward(x, bases, weight, bias, order=2, tm=None):
    """x: (B, C, N, M); bases: tuple of S arrays (B, M, N, N);
    weight: (Cout, (order*S+1)*C); bias: (Cout,) -> (B, Cout, N, M)."""
    B, C, N, M = x.shape
    S = len(bases)
    Cout, Cin_total = weight.shape
    assert Cin_total == (order * S + 1) * C, "weight/order/support mismatch"
    itemsize = jnp.dtype(x.dtype).itemsize

    if tm is None:
        tm = _pick_tm(B, M, C, N, S, Cout, Cin_total, itemsize,
                      budget_bytes=28 * 1024 * 1024)   # safe on v7x 64 MiB VMEM
    assert M % tm == 0, "tm must divide M"
    MB = M // tm

    x_t = jnp.transpose(x, (0, 3, 1, 2))        # (B, M, C, N)  -- once
    b2 = bias.reshape(Cout, 1)

    flops = 2 * B * M * (S * order * C * N * N + Cout * Cin_total * N)
    bytes_accessed = ((x.size + sum(a.size for a in bases) + B * M * Cout * N)
                      * itemsize
                      + (weight.size + bias.size)
                      * jnp.dtype(weight.dtype).itemsize)

    vmem_est = (2 * (S * tm * N * N + tm * C * N + tm * Cout * N
                     + Cout * Cin_total + Cout) * itemsize
                + tm * Cin_total * N * 4)
    vmem_limit = int(min(48 * 1024 * 1024,
                         max(32 * 1024 * 1024, 2 * vmem_est)))

    kernel = functools.partial(_gcn_fused_kernel, order=order, n_bases=S)
    a_spec = pl.BlockSpec((1, tm, N, N), lambda b, mi: (b, mi, 0, 0))
    out_t = pl.pallas_call(
        kernel,
        out_shape=jax.ShapeDtypeStruct((B, MB, tm, Cout, N), x.dtype),
        grid=(B, MB),
        in_specs=[pl.BlockSpec((1, tm, C, N), lambda b, mi: (b, mi, 0, 0))]
                 + [a_spec] * S
                 + [pl.BlockSpec((Cout, Cin_total), lambda b, mi: (0, 0)),
                    pl.BlockSpec((Cout, 1), lambda b, mi: (0, 0))],
        out_specs=pl.BlockSpec((1, 1, tm, Cout, N),
                               lambda b, mi: (b, mi, 0, 0, 0)),
        scratch_shapes=[pltpu.VMEM((tm, Cin_total, N), x.dtype)],
        compiler_params=pltpu.CompilerParams(
            dimension_semantics=("parallel", "parallel"),
            vmem_limit_bytes=vmem_limit,
        ),
        cost_estimate=pl.CostEstimate(flops=flops, transcendentals=0,
                                      bytes_accessed=bytes_accessed),
    )(x_t, *bases, weight, b2)

    # (B, MB, tm, Cout, N) -> (B, Cout, N, M)   -- one layout transform out
    return jnp.transpose(out_t, (0, 3, 4, 1, 2)).reshape(B, Cout, N, M)
    # TODO(synk): module stores `dropout` but never applies it in forward; omitted.


# ----------------------------------------------------------------------------
# reference (pure JAX) for a sanity check
# ----------------------------------------------------------------------------
def gcn_reference(x, bases, weight, bias, order=2):
    out = [x]
    for A in bases:
        x1 = jnp.einsum('bfnm,bmnv->bfvm', x, A)
        out.append(x1)
        for _ in range(2, order + 1):
            x2 = jnp.einsum('bfnm,bmnv->bfvm', x1, A)
            out.append(x2)
            x1 = x2
    h = jnp.concatenate(out, axis=1)
    return jnp.einsum('bcnm,oc->bonm', h, weight) + bias[None, :, None, None]


if __name__ == "__main__":
    B, c_in, c_out = 2, 4, 8
    N, M = 128, 8                # N graph nodes (lane-aligned), M "width" axis
    support_len, order = 3, 2
    c_in_total = (order * support_len + 1) * c_in

    key = jax.random.PRNGKey(0)
    kx, kb, kw, kbi = jax.random.split(key, 4)

    x = jax.random.normal(kx, (B, c_in, N, M), dtype=jnp.float32)
    basis_keys = jax.random.split(kb, support_len)
    bases = tuple(
        jax.random.normal(basis_keys[i], (B, M, N, N), dtype=jnp.float32) * 0.05
        for i in range(support_len)
    )
    # Conv2d(c_in_total, c_out, kernel_size=(1,1), bias=True) parameters
    weight = jax.random.normal(kw, (c_out, c_in_total), dtype=jnp.float32) * 0.05
    bias = jax.random.normal(kbi, (c_out,), dtype=jnp.float32) * 0.05

    out = gcn_forward(x, bases, weight, bias, order=order)
    out = jax.block_until_ready(out)

    ref = gcn_reference(x, bases, weight, bias, order=order)
    assert out.shape == (B, c_out, N, M), out.shape
    np.testing.assert_allclose(np.asarray(out), np.asarray(ref),
                               rtol=1e-4, atol=1e-5)
    print("KERNEL_OK")
</pallas_src>

<mosaic_0001>
module attributes {stable_mosaic.version = 11 : i64} {
  func.func @_gcn_fused_kernel(%arg0: i32, %arg1: i32, %arg2: memref<1x8x4x128xf32, #tpu.memory_space<vmem>>, %arg3: memref<1x8x128x128xf32, #tpu.memory_space<vmem>>, %arg4: memref<1x8x128x128xf32, #tpu.memory_space<vmem>>, %arg5: memref<1x8x128x128xf32, #tpu.memory_space<vmem>>, %arg6: memref<8x28xf32, #tpu.memory_space<vmem>>, %arg7: memref<8x1xf32, #tpu.memory_space<vmem>>, %arg8: memref<1x1x8x8x128xf32, #tpu.memory_space<vmem>>, %arg9: memref<8x28x128xf32, #tpu.memory_space<vmem>>) attributes {dimension_semantics = [#tpu.dimension_semantics<parallel>, #tpu.dimension_semantics<parallel>], iteration_bounds = array<i64: 2, 1>, scalar_prefetch = 0 : i64, scratch_operands = 1 : i64, tpu.core_type = #tpu.core_type<tc>, window_params = [{transform_indices = @transform_0, window_bounds = array<i64: 1, 8, 4, 128>}, {transform_indices = @transform_1, window_bounds = array<i64: 1, 8, 128, 128>}, {transform_indices = @transform_2, window_bounds = array<i64: 1, 8, 128, 128>}, {transform_indices = @transform_3, window_bounds = array<i64: 1, 8, 128, 128>}, {pipeline_mode = #tpu.pipeline_mode<synchronous>, transform_indices = @transform_4, window_bounds = array<i64: 8, 28>}, {pipeline_mode = #tpu.pipeline_mode<synchronous>, transform_indices = @transform_5, window_bounds = array<i64: 8, 1>}, {transform_indices = @transform_6, window_bounds = array<i64: 1, 1, 8, 8, 128>}]} {
    %c0 = arith.constant 0 : index
    %c0_0 = arith.constant 0 : index
    %c0_1 = arith.constant 0 : index
    %c0_2 = arith.constant 0 : index
    %0 = vector.load %arg2[%c0, %c0_0, %c0_1, %c0_2] : memref<1x8x4x128xf32, #tpu.memory_space<vmem>>, vector<1x8x4x128xf32>
    %1 = vector.shape_cast %0 : vector<1x8x4x128xf32> to vector<8x4x128xf32>
    %c0_3 = arith.constant 0 : index
    %c0_4 = arith.constant 0 : index
    %c0_5 = arith.constant 0 : index
    %2 = vector.load %arg9[%c0_3, %c0_4, %c0_5] : memref<8x28x128xf32, #tpu.memory_space<vmem>>, vector<8x4x128xf32>
    tpu.vector_store %arg9[%c0_3, %c0_4, %c0_5], %1 {strides = array<i32>} : memref<8x28x128xf32, #tpu.memory_space<vmem>>, vector<8x4x128xf32>,
    %c0_6 = arith.constant 0 : index
    %c0_7 = arith.constant 0 : index
    %c0_8 = arith.constant 0 : index
    %c0_9 = arith.constant 0 : index
    %3 = vector.load %arg3[%c0_6, %c0_7, %c0_8, %c0_9] : memref<1x8x128x128xf32, #tpu.memory_space<vmem>>, vector<1x8x128x128xf32>
    %4 = vector.shape_cast %3 : vector<1x8x128x128xf32> to vector<8x128x128xf32>
    "tpu.trace_start"() <{level = 10 : i32, message = "mcn,mnv->mcv"}> : () -> ()
    %cst = arith.constant dense<0.000000e+00> : vector<8x4x128xf32>
    %5 = tpu.matmul %1, %4, %cst {dimension_numbers = #tpu.dot_dimension_numbers<[2], [1], [1], [2], [0, 0, 0, 1, 1, 2], [0], [0]>} : vector<8x4x128xf32>, vector<8x128x128xf32>, vector<8x4x128xf32> -> vector<8x4x128xf32>
    "tpu.trace_stop"() : () -> ()
    %c0_10 = arith.constant 0 : index
    %c4 = arith.constant 4 : index
    %c0_11 = arith.constant 0 : index
    %6 = vector.load %arg9[%c0_10, %c4, %c0_11] : memref<8x28x128xf32, #tpu.memory_space<vmem>>, vector<8x4x128xf32>
    tpu.vector_store %arg9[%c0_10, %c4, %c0_11], %5 {strides = array<i32>} : memref<8x28x128xf32, #tpu.memory_space<vmem>>, vector<8x4x128xf32>,
    "tpu.trace_start"() <{level = 10 : i32, message = "mcn,mnv->mcv"}> : () -> ()
    %cst_12 = arith.constant dense<0.000000e+00> : vector<8x4x128xf32>
    %7 = tpu.matmul %5, %4, %cst_12 {dimension_numbers = #tpu.dot_dimension_numbers<[2], [1], [1], [2], [0, 0, 0, 1, 1, 2], [0], [0]>} : vector<8x4x128xf32>, vector<8x128x128xf32>, vector<8x4x128xf32> -> vector<8x4x128xf32>
    "tpu.trace_stop"() : () -> ()
    %c0_13 = arith.constant 0 : index
    %c8 = arith.constant 8 : index
    %c0_14 = arith.constant 0 : index
    %8 = vector.load %arg9[%c0_13, %c8, %c0_14] : memref<8x28x128xf32, #tpu.memory_space<vmem>>, vector<8x4x128xf32>
    tpu.vector_store %arg9[%c0_13, %c8, %c0_14], %7 {strides = array<i32>} : memref<8x28x128xf32, #tpu.memory_space<vmem>>, vector<8x4x128xf32>,
    %c0_15 = arith.constant 0 : index
    %c0_16 = arith.constant 0 : index
    %c0_17 = arith.constant 0 : index
    %c0_18 = arith.constant 0 : index
    %9 = vector.load %arg4[%c0_15, %c0_16, %c0_17, %c0_18] : memref<1x8x128x128xf32, #tpu.memory_space<vmem>>, vector<1x8x128x128xf32>
    %10 = vector.shape_cast %9 : vector<1x8x128x128xf32> to vector<8x128x128xf32>
    "tpu.trace_start"() <{level = 10 : i32, message = "mcn,mnv->mcv"}> : () -> ()
    %cst_19 = arith.constant dense<0.000000e+00> : vector<8x4x128xf32>
    %11 = tpu.matmul %1, %10, %cst_19 {dimension_numbers = #tpu.dot_dimension_numbers<[2], [1], [1], [2], [0, 0, 0, 1, 1, 2], [0], [0]>} : vector<8x4x128xf32>, vector<8x128x128xf32>, vector<8x4x128xf32> -> vector<8x4x128xf32>
    "tpu.trace_stop"() : () -> ()
    %c0_20 = arith.constant 0 : index
    %c12 = arith.constant 12 : index
    %c0_21 = arith.constant 0 : index
    %12 = vector.load %arg9[%c0_20, %c12, %c0_21] : memref<8x28x128xf32, #tpu.memory_space<vmem>>, vector<8x4x128xf32>
    tpu.vector_store %arg9[%c0_20, %c12, %c0_21], %11 {strides = array<i32>} : memref<8x28x128xf32, #tpu.memory_space<vmem>>, vector<8x4x128xf32>,
    "tpu.trace_start"() <{level = 10 : i32, message = "mcn,mnv->mcv"}> : () -> ()
    %cst_22 = arith.constant dense<0.000000e+00> : vector<8x4x128xf32>
    %13 = tpu.matmul %11, %10, %cst_22 {dimension_numbers = #tpu.dot_dimension_numbers<[2], [1], [1], [2], [0, 0, 0, 1, 1, 2], [0], [0]>} : vector<8x4x128xf32>, vector<8x128x128xf32>, vector<8x4x128xf32> -> vector<8x4x128xf32>
    "tpu.trace_stop"() : () -> ()
    %c0_23 = arith.constant 0 : index
    %c16 = arith.constant 16 : index
    %c0_24 = arith.constant 0 : index
    %14 = vector.load %arg9[%c0_23, %c16, %c0_24] : memref<8x28x128xf32, #tpu.memory_space<vmem>>, vector<8x4x128xf32>
    tpu.vector_store %arg9[%c0_23, %c16, %c0_24], %13 {strides = array<i32>} : memref<8x28x128xf32, #tpu.memory_space<vmem>>, vector<8x4x128xf32>,
    %c0_25 = arith.constant 0 : index
    %c0_26 = arith.constant 0 : index
    %c0_27 = arith.constant 0 : index
    %c0_28 = arith.constant 0 : index
    %15 = vector.load %arg5[%c0_25, %c0_26, %c0_27, %c0_28] : memref<1x8x128x128xf32, #tpu.memory_space<vmem>>, vector<1x8x128x128xf32>
    %16 = vector.shape_cast %15 : vector<1x8x128x128xf32> to vector<8x128x128xf32>
    "tpu.trace_start"() <{level = 10 : i32, message = "mcn,mnv->mcv"}> : () -> ()
    %cst_29 = arith.constant dense<0.000000e+00> : vector<8x4x128xf32>
    %17 = tpu.matmul %1, %16, %cst_29 {dimension_numbers = #tpu.dot_dimension_numbers<[2], [1], [1], [2], [0, 0, 0, 1, 1, 2], [0], [0]>} : vector<8x4x128xf32>, vector<8x128x128xf32>, vector<8x4x128xf32> -> vector<8x4x128xf32>
    "tpu.trace_stop"() : () -> ()
    %c0_30 = arith.constant 0 : index
    %c20 = arith.constant 20 : index
    %c0_31 = arith.constant 0 : index
    %18 = vector.load %arg9[%c0_30, %c20, %c0_31] : memref<8x28x128xf32, #tpu.memory_space<vmem>>, vector<8x4x128xf32>
    tpu.vector_store %arg9[%c0_30, %c20, %c0_31], %17 {strides = array<i32>} : memref<8x28x128xf32, #tpu.memory_space<vmem>>, vector<8x4x128xf32>,
    "tpu.trace_start"() <{level = 10 : i32, message = "mcn,mnv->mcv"}> : () -> ()
    %cst_32 = arith.constant dense<0.000000e+00> : vector<8x4x128xf32>
    %19 = tpu.matmul %17, %16, %cst_32 {dimension_numbers = #tpu.dot_dimension_numbers<[2], [1], [1], [2], [0, 0, 0, 1, 1, 2], [0], [0]>} : vector<8x4x128xf32>, vector<8x128x128xf32>, vector<8x4x128xf32> -> vector<8x4x128xf32>
    "tpu.trace_stop"() : () -> ()
    %c0_33 = arith.constant 0 : index
    %c24 = arith.constant 24 : index
    %c0_34 = arith.constant 0 : index
    %20 = vector.load %arg9[%c0_33, %c24, %c0_34] : memref<8x28x128xf32, #tpu.memory_space<vmem>>, vector<8x4x128xf32>
    tpu.vector_store %arg9[%c0_33, %c24, %c0_34], %19 {strides = array<i32>} : memref<8x28x128xf32, #tpu.memory_space<vmem>>, vector<8x4x128xf32>,
    %c0_35 = arith.constant 0 : index
    %c0_36 = arith.constant 0 : index
    %21 = vector.load %arg6[%c0_35, %c0_36] : memref<8x28xf32, #tpu.memory_space<vmem>>, vector<8x28xf32>
    %c0_37 = arith.constant 0 : index
    %c0_38 = arith.constant 0 : index
    %22 = vector.load %arg7[%c0_37, %c0_38] : memref<8x1xf32, #tpu.memory_space<vmem>>, vector<8x1xf32>
    %c0_39 = arith.constant 0 : index
    %c0_40 = arith.constant 0 : index
    %c0_41 = arith.constant 0 : index
    %23 = vector.load %arg9[%c0_39, %c0_40, %c0_41] : memref<8x28x128xf32, #tpu.memory_space<vmem>>, vector<1x28x128xf32>
    %24 = vector.shape_cast %23 : vector<1x28x128xf32> to vector<28x128xf32>
    %cst_42 = arith.constant dense<0.000000e+00> : vector<8x128xf32>
    %25 = tpu.matmul %21, %24, %cst_42 {dimension_numbers = #tpu.dot_dimension_numbers<[1], [0], [0], [1], [0, 0, 1, 1], [], []>} : vector<8x28xf32>, vector<28x128xf32>, vector<8x128xf32> -> vector<8x128xf32>
    %26 = vector.broadcast %22 : vector<8x1xf32> to vector<8x128xf32>
    %27 = arith.addf %25, %26 : vector<8x128xf32>
    %c0_43 = arith.constant 0 : index
    %c0_44 = arith.constant 0 : index
    %c0_45 = arith.constant 0 : index
    %c0_46 = arith.constant 0 : index
    %c0_47 = arith.constant 0 : index
    %28 = vector.load %arg8[%c0_43, %c0_44, %c0_45, %c0_46, %c0_47] : memref<1x1x8x8x128xf32, #tpu.memory_space<vmem>>, vector<1x1x1x8x128xf32>
    %29 = vector.shape_cast %28 : vector<1x1x1x8x128xf32> to vector<8x128xf32>
    %30 = vector.shape_cast %27 : vector<8x128xf32> to vector<1x1x1x8x128xf32>
    tpu.vector_store %arg8[%c0_43, %c0_44, %c0_45, %c0_46, %c0_47], %30 {strides = array<i32>} : memref<1x1x8x8x128xf32, #tpu.memory_space<vmem>>, vector<1x1x1x8x128xf32>,
    %c1 = arith.constant 1 : index
    %c0_48 = arith.constant 0 : index
    %c0_49 = arith.constant 0 : index
    %31 = vector.load %arg9[%c1, %c0_48, %c0_49] : memref<8x28x128xf32, #tpu.memory_space<vmem>>, vector<1x28x128xf32>
    %32 = vector.shape_cast %31 : vector<1x28x128xf32> to vector<28x128xf32>
    %cst_50 = arith.constant dense<0.000000e+00> : vector<8x128xf32>
    %33 = tpu.matmul %21, %32, %cst_50 {dimension_numbers = #tpu.dot_dimension_numbers<[1], [0], [0], [1], [0, 0, 1, 1], [], []>} : vector<8x28xf32>, vector<28x128xf32>, vector<8x128xf32> -> vector<8x128xf32>
    %34 = vector.broadcast %22 : vector<8x1xf32> to vector<8x128xf32>
    %35 = arith.addf %33, %34 : vector<8x128xf32>
    %c0_51 = arith.constant 0 : index
    %c0_52 = arith.constant 0 : index
    %c1_53 = arith.constant 1 : index
    %c0_54 = arith.constant 0 : index
    %c0_55 = arith.constant 0 : index
    %36 = vector.load %arg8[%c0_51, %c0_52, %c1_53, %c0_54, %c0_55] : memref<1x1x8x8x128xf32, #tpu.memory_space<vmem>>, vector<1x1x1x8x128xf32>
    %37 = vector.shape_cast %36 : vector<1x1x1x8x128xf32> to vector<8x128xf32>
    %38 = vector.shape_cast %35 : vector<8x128xf32> to vector<1x1x1x8x128xf32>
    tpu.vector_store %arg8[%c0_51, %c0_52, %c1_53, %c0_54, %c0_55], %38 {strides = array<i32>} : memref<1x1x8x8x128xf32, #tpu.memory_space<vmem>>, vector<1x1x1x8x128xf32>,
    %c2 = arith.constant 2 : index
    %c0_56 = arith.constant 0 : index
    %c0_57 = arith.constant 0 : index
    %39 = vector.load %arg9[%c2, %c0_56, %c0_57] : memref<8x28x128xf32, #tpu.memory_space<vmem>>, vector<1x28x128xf32>
    %40 = vector.shape_cast %39 : vector<1x28x128xf32> to vector<28x128xf32>
    %cst_58 = arith.constant dense<0.000000e+00> : vector<8x128xf32>
    %41 = tpu.matmul %21, %40, %cst_58 {dimension_numbers = #tpu.dot_dimension_numbers<[1], [0], [0], [1], [0, 0, 1, 1], [], []>} : vector<8x28xf32>, vector<28x128xf32>, vector<8x128xf32> -> vector<8x128xf32>
    %42 = vector.broadcast %22 : vector<8x1xf32> to vector<8x128xf32>
    %43 = arith.addf %41, %42 : vector<8x128xf32>
    %c0_59 = arith.constant 0 : index
    %c0_60 = arith.constant 0 : index
    %c2_61 = arith.constant 2 : index
    %c0_62 = arith.constant 0 : index
    %c0_63 = arith.constant 0 : index
    %44 = vector.load %arg8[%c0_59, %c0_60, %c2_61, %c0_62, %c0_63] : memref<1x1x8x8x128xf32, #tpu.memory_space<vmem>>, vector<1x1x1x8x128xf32>
    %45 = vector.shape_cast %44 : vector<1x1x1x8x128xf32> to vector<8x128xf32>
    %46 = vector.shape_cast %43 : vector<8x128xf32> to vector<1x1x1x8x128xf32>
    tpu.vector_store %arg8[%c0_59, %c0_60, %c2_61, %c0_62, %c0_63], %46 {strides = array<i32>} : memref<1x1x8x8x128xf32, #tpu.memory_space<vmem>>, vector<1x1x1x8x128xf32>,
    %c3 = arith.constant 3 : index
    %c0_64 = arith.constant 0 : index
    %c0_65 = arith.constant 0 : index
    %47 = vector.load %arg9[%c3, %c0_64, %c0_65] : memref<8x28x128xf32, #tpu.memory_space<vmem>>, vector<1x28x128xf32>
    %48 = vector.shape_cast %47 : vector<1x28x128xf32> to vector<28x128xf32>
    %cst_66 = arith.constant dense<0.000000e+00> : vector<8x128xf32>
    %49 = tpu.matmul %21, %48, %cst_66 {dimension_numbers = #tpu.dot_dimension_numbers<[1], [0], [0], [1], [0, 0, 1, 1], [], []>} : vector<8x28xf32>, vector<28x128xf32>, vector<8x128xf32> -> vector<8x128xf32>
    %50 = vector.broadcast %22 : vector<8x1xf32> to vector<8x128xf32>
    %51 = arith.addf %49, %50 : vector<8x128xf32>
    %c0_67 = arith.constant 0 : index
    %c0_68 = arith.constant 0 : index
    %c3_69 = arith.constant 3 : index
    %c0_70 = arith.constant 0 : index
    %c0_71 = arith.constant 0 : index
    %52 = vector.load %arg8[%c0_67, %c0_68, %c3_69, %c0_70, %c0_71] : memref<1x1x8x8x128xf32, #tpu.memory_space<vmem>>, vector<1x1x1x8x128xf32>
    %53 = vector.shape_cast %52 : vector<1x1x1x8x128xf32> to vector<8x128xf32>
    %54 = vector.shape_cast %51 : vector<8x128xf32> to vector<1x1x1x8x128xf32>
    tpu.vector_store %arg8[%c0_67, %c0_68, %c3_69, %c0_70, %c0_71], %54 {strides = array<i32>} : memref<1x1x8x8x128xf32, #tpu.memory_space<vmem>>, vector<1x1x1x8x128xf32>,
    %c4_72 = arith.constant 4 : index
    %c0_73 = arith.constant 0 : index
    %c0_74 = arith.constant 0 : index
    %55 = vector.load %arg9[%c4_72, %c0_73, %c0_74] : memref<8x28x128xf32, #tpu.memory_space<vmem>>, vector<1x28x128xf32>
    %56 = vector.shape_cast %55 : vector<1x28x128xf32> to vector<28x128xf32>
    %cst_75 = arith.constant dense<0.000000e+00> : vector<8x128xf32>
    %57 = tpu.matmul %21, %56, %cst_75 {dimension_numbers = #tpu.dot_dimension_numbers<[1], [0], [0], [1], [0, 0, 1, 1], [], []>} : vector<8x28xf32>, vector<28x128xf32>, vector<8x128xf32> -> vector<8x128xf32>
    %58 = vector.broadcast %22 : vector<8x1xf32> to vector<8x128xf32>
    %59 = arith.addf %57, %58 : vector<8x128xf32>
    %c0_76 = arith.constant 0 : index
    %c0_77 = arith.constant 0 : index
    %c4_78 = arith.constant 4 : index
    %c0_79 = arith.constant 0 : index
    %c0_80 = arith.constant 0 : index
    %60 = vector.load %arg8[%c0_76, %c0_77, %c4_78, %c0_79, %c0_80] : memref<1x1x8x8x128xf32, #tpu.memory_space<vmem>>, vector<1x1x1x8x128xf32>
    %61 = vector.shape_cast %60 : vector<1x1x1x8x128xf32> to vector<8x128xf32>
    %62 = vector.shape_cast %59 : vector<8x128xf32> to vector<1x1x1x8x128xf32>
    tpu.vector_store %arg8[%c0_76, %c0_77, %c4_78, %c0_79, %c0_80], %62 {strides = array<i32>} : memref<1x1x8x8x128xf32, #tpu.memory_space<vmem>>, vector<1x1x1x8x128xf32>,
    %c5 = arith.constant 5 : index
    %c0_81 = arith.constant 0 : index
    %c0_82 = arith.constant 0 : index
    %63 = vector.load %arg9[%c5, %c0_81, %c0_82] : memref<8x28x128xf32, #tpu.memory_space<vmem>>, vector<1x28x128xf32>
    %64 = vector.shape_cast %63 : vector<1x28x128xf32> to vector<28x128xf32>
    %cst_83 = arith.constant dense<0.000000e+00> : vector<8x128xf32>
    %65 = tpu.matmul %21, %64, %cst_83 {dimension_numbers = #tpu.dot_dimension_numbers<[1], [0], [0], [1], [0, 0, 1, 1], [], []>} : vector<8x28xf32>, vector<28x128xf32>, vector<8x128xf32> -> vector<8x128xf32>
    %66 = vector.broadcast %22 : vector<8x1xf32> to vector<8x128xf32>
    %67 = arith.addf %65, %66 : vector<8x128xf32>
    %c0_84 = arith.constant 0 : index
    %c0_85 = arith.constant 0 : index
    %c5_86 = arith.constant 5 : index
    %c0_87 = arith.constant 0 : index
    %c0_88 = arith.constant 0 : index
    %68 = vector.load %arg8[%c0_84, %c0_85, %c5_86, %c0_87, %c0_88] : memref<1x1x8x8x128xf32, #tpu.memory_space<vmem>>, vector<1x1x1x8x128xf32>
    %69 = vector.shape_cast %68 : vector<1x1x1x8x128xf32> to vector<8x128xf32>
    %70 = vector.shape_cast %67 : vector<8x128xf32> to vector<1x1x1x8x128xf32>
    tpu.vector_store %arg8[%c0_84, %c0_85, %c5_86, %c0_87, %c0_88], %70 {strides = array<i32>} : memref<1x1x8x8x128xf32, #tpu.memory_space<vmem>>, vector<1x1x1x8x128xf32>,
    %c6 = arith.constant 6 : index
    %c0_89 = arith.constant 0 : index
    %c0_90 = arith.constant 0 : index
    %71 = vector.load %arg9[%c6, %c0_89, %c0_90] : memref<8x28x128xf32, #tpu.memory_space<vmem>>, vector<1x28x128xf32>
    %72 = vector.shape_cast %71 : vector<1x28x128xf32> to vector<28x128xf32>
    %cst_91 = arith.constant dense<0.000000e+00> : vector<8x128xf32>
    %73 = tpu.matmul %21, %72, %cst_91 {dimension_numbers = #tpu.dot_dimension_numbers<[1], [0], [0], [1], [0, 0, 1, 1], [], []>} : vector<8x28xf32>, vector<28x128xf32>, vector<8x128xf32> -> vector<8x128xf32>
    %74 = vector.broadcast %22 : vector<8x1xf32> to vector<8x128xf32>
    %75 = arith.addf %73, %74 : vector<8x128xf32>
    %c0_92 = arith.constant 0 : index
    %c0_93 = arith.constant 0 : index
    %c6_94 = arith.constant 6 : index
    %c0_95 = arith.constant 0 : index
    %c0_96 = arith.constant 0 : index
    %76 = vector.load %arg8[%c0_92, %c0_93, %c6_94, %c0_95, %c0_96] : memref<1x1x8x8x128xf32, #tpu.memory_space<vmem>>, vector<1x1x1x8x128xf32>
    %77 = vector.shape_cast %76 : vector<1x1x1x8x128xf32> to vector<8x128xf32>
    %78 = vector.shape_cast %75 : vector<8x128xf32> to vector<1x1x1x8x128xf32>
    tpu.vector_store %arg8[%c0_92, %c0_93, %c6_94, %c0_95, %c0_96], %78 {strides = array<i32>} : memref<1x1x8x8x128xf32, #tpu.memory_space<vmem>>, vector<1x1x1x8x128xf32>,
    %c7 = arith.constant 7 : index
    %c0_97 = arith.constant 0 : index
    %c0_98 = arith.constant 0 : index
    %79 = vector.load %arg9[%c7, %c0_97, %c0_98] : memref<8x28x128xf32, #tpu.memory_space<vmem>>, vector<1x28x128xf32>
    %80 = vector.shape_cast %79 : vector<1x28x128xf32> to vector<28x128xf32>
    %cst_99 = arith.constant dense<0.000000e+00> : vector<8x128xf32>
    %81 = tpu.matmul %21, %80, %cst_99 {dimension_numbers = #tpu.dot_dimension_numbers<[1], [0], [0], [1], [0, 0, 1, 1], [], []>} : vector<8x28xf32>, vector<28x128xf32>, vector<8x128xf32> -> vector<8x128xf32>
    %82 = vector.broadcast %22 : vector<8x1xf32> to vector<8x128xf32>
    %83 = arith.addf %81, %82 : vector<8x128xf32>
    %c0_100 = arith.constant 0 : index
    %c0_101 = arith.constant 0 : index
    %c7_102 = arith.constant 7 : index
    %c0_103 = arith.constant 0 : index
    %c0_104 = arith.constant 0 : index
    %84 = vector.load %arg8[%c0_100, %c0_101, %c7_102, %c0_103, %c0_104] : memref<1x1x8x8x128xf32, #tpu.memory_space<vmem>>, vector<1x1x1x8x128xf32>
    %85 = vector.shape_cast %84 : vector<1x1x1x8x128xf32> to vector<8x128xf32>
    %86 = vector.shape_cast %83 : vector<8x128xf32> to vector<1x1x1x8x128xf32>
    tpu.vector_store %arg8[%c0_100, %c0_101, %c7_102, %c0_103, %c0_104], %86 {strides = array<i32>} : memref<1x1x8x8x128xf32, #tpu.memory_space<vmem>>, vector<1x1x1x8x128xf32>,
    return
  }
  func.func @transform_0(%arg0: i32, %arg1: i32) -> (i32, i32, i32, i32) {
    %c0_i32 = arith.constant 0 : i32
    %c0_i32_0 = arith.constant 0 : i32
    %c0_i32_1 = arith.constant 0 : i32
    return %arg0, %arg1, %c0_i32, %c0_i32_0 : i32, i32, i32, i32
  }
  func.func @transform_1(%arg0: i32, %arg1: i32) -> (i32, i32, i32, i32) {
    %c0_i32 = arith.constant 0 : i32
    %c0_i32_0 = arith.constant 0 : i32
    %c0_i32_1 = arith.constant 0 : i32
    return %arg0, %arg1, %c0_i32, %c0_i32_0 : i32, i32, i32, i32
  }
  func.func @transform_2(%arg0: i32, %arg1: i32) -> (i32, i32, i32, i32) {
    %c0_i32 = arith.constant 0 : i32
    %c0_i32_0 = arith.constant 0 : i32
    %c0_i32_1 = arith.constant 0 : i32
    return %arg0, %arg1, %c0_i32, %c0_i32_0 : i32, i32, i32, i32
  }
  func.func @transform_3(%arg0: i32, %arg1: i32) -> (i32, i32, i32, i32) {
    %c0_i32 = arith.constant 0 : i32
    %c0_i32_0 = arith.constant 0 : i32
    %c0_i32_1 = arith.constant 0 : i32
    return %arg0, %arg1, %c0_i32, %c0_i32_0 : i32, i32, i32, i32
  }
  func.func @transform_4(%arg0: i32, %arg1: i32) -> (i32, i32) {
    %c0_i32 = arith.constant 0 : i32
    %c0_i32_0 = arith.constant 0 : i32
    %c0_i32_1 = arith.constant 0 : i32
    return %c0_i32, %c0_i32_0 : i32, i32
  }
  func.func @transform_5(%arg0: i32, %arg1: i32) -> (i32, i32) {
    %c0_i32 = arith.constant 0 : i32
    %c0_i32_0 = arith.constant 0 : i32
    %c0_i32_1 = arith.constant 0 : i32
    return %c0_i32, %c0_i32_0 : i32, i32
  }
  func.func @transform_6(%arg0: i32, %arg1: i32) -> (i32, i32, i32, i32, i32) {
    %c0_i32 = arith.constant 0 : i32
    %c0_i32_0 = arith.constant 0 : i32
    %c0_i32_1 = arith.constant 0 : i32
    %c0_i32_2 = arith.constant 0 : i32
    return %arg0, %arg1, %c0_i32, %c0_i32_0, %c0_i32_1 : i32, i32, i32, i32, i32
  }
}

</mosaic_0001>

<bundles_post_ra>
// kernel: gcn_forward.1
= control target key start
LH: loop header
LB: loop body
LE: loop exit
PB: predicated region body
PF: predicated region fallthrough
CT: control target
= control target key end

     0   :  { %s4706_s0 = inlined_call_operand.vmem [shape: f32[2,8,4,128], index: 0, kind: input, shape index: {}]   ;;  %s4707_s1 = inlined_call_operand.hbm [shape: f32[2,8,128,128], index: 1, kind: input, shape index: {}]   ;;  %s4708_s2 = inlined_call_operand.hbm [shape: f32[2,8,128,128], index: 2, kind: input, shape index: {}]   ;;  %s4709_s3 = inlined_call_operand.hbm [shape: f32[2,8,128,128], index: 3, kind: input, shape index: {}]   ;;  %s4710_s4 = inlined_call_operand.vmem [shape: f32[8,28], index: 4, kind: input, shape index: {}]   ;;  %s4711_s5 = inlined_call_operand.vmem [shape: f32[8,1], index: 5, kind: input, shape index: {}]   ;;  %s4712_s6 = inlined_call_operand.vmem [shape: f32[2,1,8,8,128], index: 6, kind: output, shape index: {}]  }
   0x1   :  { %4924 = sst [smem:[#allocation86_spill]] %s4708_s2 }
   0x2   :  { %11 = vsyncpa [#allocation4], 0 }
   0x3   :  { %13 = vsyncpa [#allocation4 + $0x1], 0 }
   0x4   :  { %14 = vsyncpa [#allocation6], 0 }
   0x5   :  { %16 = vsyncpa [#allocation6 + $0x1], 0  ;;  %s2558_s21 = smov 0   ;;  %s2560_s22 = smov 0  }
   0x6   :  { %s2562_s23 = smov 0   ;;  %s2564_s24 = smov 0  }
   0x7   :  { %s2566_s25 = smov 0   ;;  %s2568_s26 = smov 0  }
   0x8 LB: > { %4925 = sst [smem:[#allocation10_spill]] %s2506_s23  ;;  %s4713_s27 = sadd.s32 4294967295, %s2518_s26   ;;  %s2518_s26 = sphi %s2568_s26, %s22_s26   ;;  %s2514_s25 = sphi %s2566_s25, %s5347_s25   ;;  %s2510_s24 = sphi %s2564_s24, %s5350_s24   ;;  %s2506_s23 = sphi %s2562_s23, %s5345_s23   ;;  %s2502_s22 = sphi %s2560_s22, %s5349_s22   ;;  %s2498_s21 = sphi %s2558_s21, %s5348_s21  }
   0x9   : > { %4926 = sst [smem:[#allocation11_spill]] %s2514_s25  ;;  %s34_s28 = sadd.s32 1, %s2514_s25 }
   0xa   : > { %p36_p0 = scmp.ge.s32.totalorder %s34_s28, 2  ;;  %s71_s29 = sadd.s32 1, %s2506_s23 }
   0xb   : > { %p78_p1 = scmp.ne.s32.totalorder %s2506_s23, %s2502_s22  ;;  %p79_p2 = scmp.eq.s32.totalorder %s2518_s26, 0 }
   0xc   : > { %s5352_s28 = smov (%p36_p0, %s34_s28), 0  ;;  %p84_p4 = scmp.ne.s32.totalorder %s2502_s22, %s2498_s21 }
   0xd   : > { %4927 = sst [smem:[#allocation12_spill]] %s5352_s28  ;;  %p80_p3 = por %p79_p2, %p78_p1 }
   0xe   : > { %s66_s30 = ssub.s32 %s2514_s25, %s5352_s28  ;;  %p85_p5 = scmp.eq.s32.totalorder %s4713_s27, 0 }
   0xf   : > { %p69_p6 = scmp.eq.s32.totalorder %s66_s30, 0  ;;  %p2321_p8 = scmp.lt.s32.totalorder %s2518_s26, 2 }
  0x10   : > { %p2599_p7 = por %p85_p5, %p84_p4  ;;  %s253_s9 = sand.u32 1, %s2506_s23  }
  0x11   : > { %s2605_s8 = scalar_select %p69_p6, %s2506_s23, %s71_s29  }
  0x12   : > { %s2609_s10 = sshll.u32 %s2514_s25, 10  ;;  %s2258_s11 = sshll.u32 %s253_s9, 10 }
  0x13   : > { %4929 = sst [smem:[#allocation13_spill]] %s2605_s8  ;;  %p2611_p9 = pnand %p2321_p8, %p80_p3 }
  0x14   : > { %s278_s13 = sand.u32 1, %s2518_s26   ;;  %s4931_s2 = sld [smem:[#allocation86_spill]] }
  0x15   : > { %s282_s17 = scalar_lea.vmem [#allocation5], %s2258_s11  ;;  %p2267_p10 = scmp.ge.s32.totalorder %s2518_s26, 1 }
  0x16   : > { %s293_s18 = sshll.u32 %s282_s17, 4  ;;  %s279_s20 = scalar_lea.sflag [#allocation6], %s278_s13  ;;  %s294_s18 = int_to_ptr.vmem [resolvable:$true] %s293_s18 }
  0x17   : > { %s2520_s21 = smov 128   ;;  %s2521_s29 = smov 8  }
  0x18   : > { %p326_p11 = scmp.lt.s32.totalorder %s2518_s26, 3  ;;  %s257_s17 = scalar_lea.vmem [#allocation3], %s2258_s11 }
  0x19   : > { %s268_s27 = sshll.u32 %s257_s17, 4  ;;  %s254_s13 = scalar_lea.sflag [#allocation4], %s253_s9  ;;  %s269_s27 = int_to_ptr.vmem [resolvable:$true] %s268_s27 }
  0x1a   : > { %s290_s16 = scalar_lea.hbm %s4931_s2, %s2609_s10  ;;  %p2624_p12 = pnand %p2267_p10, %p326_p11 }
  0x1b   : > { %s291_s19 = sshll.u32 %s290_s16, 4  ;;  %s265_s16 = scalar_lea.hbm %s4707_s1, %s2609_s10  ;;  %s292_s19 = int_to_ptr.hbm [resolvable:$true] %s291_s19 }
  0x1c   : > { %2317 = dma.hbm_to_vmem [thread:$0]  (!%p2611_p9), %s292_s19, 16384, %s294_s18, %s279_s20, %s2520_s21, %s2520_s21, %s2521_s29  }
  0x1d   : > { %s266_s2 = sshll.u32 %s265_s16, 4  ;;  %s315_s19 = scalar_lea.hbm %s4709_s3, %s2609_s10  ;;  %s267_s2 = int_to_ptr.hbm [resolvable:$true] %s266_s2 }
  0x1e   : > { %2314 = dma.hbm_to_vmem [thread:$0]  (!%p2611_p9), %s267_s2, 16384, %s269_s27, %s254_s13, %s2520_s21, %s2520_s21, %s2521_s29  }
  0x1f   : > { %s307_s25 = scalar_lea.vmem [#allocation7], %s2258_s11  ;;  %s316_s23 = sshll.u32 %s315_s19, 4  ;;  %s317_s23 = int_to_ptr.hbm [resolvable:$true] %s316_s23 }
  0x20   : > { %s318_s8 = sshll.u32 %s307_s25, 4  ;;  %330 = sbr.rel (%p2624_p12) target bundleno = 917 (0x395), region = 44  ;;  %s319_s8 = int_to_ptr.vmem [resolvable:$true] %s318_s8 }
  0x21   : > { %2320 = dma.hbm_to_vmem [thread:$0]  (!%p2611_p9), %s317_s23, 16384, %s319_s8, %s279_s20, %s2520_s21, %s2520_s21, %s2521_s29  }
  0x25   : > { %s332_s14 = sand.u32 1, %s2502_s22  }
  0x26   : > { %s2643_s9 = sshll.u32 %s332_s14, 10  ;;  %s333_s2 = scalar_lea.sflag [#allocation4], %s332_s14 }
  0x27   : > { %s2646_s27 = scalar_lea.vmem [#allocation3], %s2643_s9 }
  0x28   : > { %2489 = dma.done.wait (%p2599_p7), %s333_s2, 16384  }
  0x29   : > { %2491 = vsyncadd (%p2599_p7), %s333_s2, 4294950912  ;;  %s4933_s25 = sadd.s32 4294967295, %s2518_s26   ;;  %s2655_s8 = scalar_lea.vmem [#allocation5], %s2643_s9 }
  0x2a   : > { %s342_s23 = sand.u32 1, %s4933_s25  }
  0x2b   : > { %s343_s28 = scalar_lea.sflag [#allocation6], %s342_s23 }
  0x2c   : > { %2493 = dma.done.wait (%p2599_p7), %s343_s28, 32768  }
  0x2d   : > { %2495 = vsyncadd (%p2599_p7), %s343_s28, 4294934528  ;;  %v2662_v0 = vld [vmem:[%s2646_s27 + $0x78] sm:$0xff]  ;;  %v2676_v4 = vld [vmem:[%s2646_s27 + $0x70] sm:$0xff]  ;;  %p410_p13 = scmp.lt.s32.totalorder %s2510_s24, 1  ;;  %s4002_s20 = scalar_lea.vmem [#allocation7], %s2643_s9  ;;  %vm1854_vm0 = vcmask 1043456  }
  0x2e   : > { %v2665_v1 = vld [vmem:[%s2646_s27 + $0xf8] sm:$0xff]  ;;  %575 = vmatpush.msra.mxu0 %v2662_v0  ;;  %v2679_v5 = vld [vmem:[%s2646_s27 + $0xf0] sm:$0xff]  ;;  %v2690_v8 = vld [vmem:[%s2646_s27 + $0x68] sm:$0xff]  ;;  %vm1850_vm1 = vcmask 228352  }
  0x2f   : > { %v2668_v2 = vld [vmem:[%s2646_s27 + $0x178] sm:$0xff]  ;;  %595 = vmatpush.msra.mxu1 %v2665_v1  ;;  %v2684_v6 = vld [vmem:[%s2646_s27 + $0x170] sm:$0xff]  ;;  %v2695_v9 = vld [vmem:[%s2646_s27 + $0xe8] sm:$0xff]  ;;  %s5354_s24 = smov (!%p410_p13, %s2510_s24), 1 }
  0x30   : > { %v2673_v3 = vld [vmem:[%s2646_s27 + $0x1f8] sm:$0xff]  ;;  %615 = vmatpush.msra.mxu2 %v2668_v2  ;;  %v2687_v7 = vld [vmem:[%s2646_s27 + $0x1f0] sm:$0xff]  ;;  %576 = vmatpush.msra.mxu0 %v2676_v4  ;;  %v2698_v10 = vld [vmem:[%s2646_s27 + $0x168] sm:$0xff]  ;;  %s2303_s7 = sshll.u32 %s5354_s24, 5  ;;  %s2304_s16 = sshll.u32 %s5354_s24, 6 }
  0x31   : > { %635 = vmatpush.msra.mxu3 %v2673_v3  ;;  %596 = vmatpush.msra.mxu1 %v2679_v5  ;;  %v2701_v11 = vld [vmem:[%s2646_s27 + $0x1e8] sm:$0xff]  ;;  %v2706_v12 = vld [vmem:[%s2646_s27 + $0x60] sm:$0xff]  ;;  %v2722_v16 = vld [vmem:[%s2646_s27 + $0x58] sm:$0xff]  ;;  %s2833_s12 = scalar_lea.vmem %s4706_s0, %s2303_s7  ;;  %s430_s18 = scalar_lea.vmem %s4712_s6, %s2304_s16 }
  0x32   : > { %616 = vmatpush.msra.mxu2 %v2684_v6  ;;  %v2709_v13 = vld [vmem:[%s2646_s27 + $0xe0] sm:$0xff]  ;;  %577 = vmatpush.msra.mxu0 %v2690_v8  ;;  %v2725_v17 = vld [vmem:[%s2646_s27 + $0xd8] sm:$0xff]  ;;  %v2739_v20 = vld [vmem:[%s2646_s27 + $0x50] sm:$0xff] }
  0x33   : > { %636 = vmatpush.msra.mxu3 %v2687_v7  ;;  %597 = vmatpush.msra.mxu1 %v2695_v9  ;;  %v2714_v14 = vld [vmem:[%s2646_s27 + $0x160] sm:$0xff]  ;;  %v2730_v18 = vld [vmem:[%s2646_s27 + $0x158] sm:$0xff]  ;;  %v2742_v21 = vld [vmem:[%s2646_s27 + $0xd0] sm:$0xff] }
  0x34   : > { %v2717_v15 = vld [vmem:[%s2646_s27 + $0x1e0] sm:$0xff]  ;;  %617 = vmatpush.msra.mxu2 %v2698_v10  ;;  %578 = vmatpush.msra.mxu0 %v2706_v12  ;;  %v2733_v19 = vld [vmem:[%s2646_s27 + $0x1d8] sm:$0xff]  ;;  %v2747_v22 = vld [vmem:[%s2646_s27 + $0x150] sm:$0xff] }
  0x35   : > { %637 = vmatpush.msra.mxu3 %v2701_v11  ;;  %598 = vmatpush.msra.mxu1 %v2709_v13  ;;  %v2750_v23 = vld [vmem:[%s2646_s27 + $0x1d0] sm:$0xff]  ;;  %v2755_v24 = vld [vmem:[%s2646_s27 + $0x48] sm:$0xff]  ;;  %v2776_v28 = vld [vmem:[%s2646_s27 + $0x40] sm:$0xff] }
  0x36   : > { %618 = vmatpush.msra.mxu2 %v2714_v14  ;;  %579 = vmatpush.msra.mxu0 %v2722_v16  ;;  %v2758_v25 = vld [vmem:[%s2646_s27 + $0xc8] sm:$0xff]  ;;  %v2779_v29 = vld [vmem:[%s2646_s27 + $0xc0] sm:$0xff]  ;;  %v2792_v32 = vld [vmem:[%s2646_s27 + $0x38] sm:$0xff] }
  0x37   : > { %638 = vmatpush.msra.mxu3 %v2717_v15  ;;  %599 = vmatpush.msra.mxu1 %v2725_v17  ;;  %v2763_v26 = vld [vmem:[%s2646_s27 + $0x148] sm:$0xff]  ;;  %v2784_v30 = vld [vmem:[%s2646_s27 + $0x140] sm:$0xff]  ;;  %v2795_v33 = vld [vmem:[%s2646_s27 + $0xb8] sm:$0xff] }
  0x38   : > { %619 = vmatpush.msra.mxu2 %v2730_v18  ;;  %580 = vmatpush.msra.mxu0 %v2739_v20  ;;  %v2766_v27 = vld [vmem:[%s2646_s27 + $0x1c8] sm:$0xff]  ;;  %v2787_v31 = vld [vmem:[%s2646_s27 + $0x1c0] sm:$0xff]  ;;  %v2800_v34 = vld [vmem:[%s2646_s27 + $0x138] sm:$0xff] }
  0x39   : > { %639 = vmatpush.msra.mxu3 %v2733_v19  ;;  %600 = vmatpush.msra.mxu1 %v2742_v21  ;;  %v2803_v35 = vld [vmem:[%s2646_s27 + $0x1b8] sm:$0xff]  ;;  %v2809_v36 = vld [vmem:[%s2646_s27 + $0x30] sm:$0xff]  ;;  %v2825_v40 = vld [vmem:[%s2646_s27 + $0x28] sm:$0xff] }
  0x3a   : > { %620 = vmatpush.msra.mxu2 %v2747_v22  ;;  %581 = vmatpush.msra.mxu0 %v2755_v24  ;;  %v2812_v37 = vld [vmem:[%s2646_s27 + $0xb0] sm:$0xff]  ;;  %v2828_v41 = vld [vmem:[%s2646_s27 + $0xa8] sm:$0xff]  ;;  %v2846_v44 = vld [vmem:[%s2646_s27 + $0x20] sm:$0xff] }
  0x3b   : > { %640 = vmatpush.msra.mxu3 %v2750_v23  ;;  %601 = vmatpush.msra.mxu1 %v2758_v25  ;;  %v2817_v38 = vld [vmem:[%s2646_s27 + $0x130] sm:$0xff]  ;;  %v2838_v42 = vld [vmem:[%s2646_s27 + $0x128] sm:$0xff]  ;;  %v2849_v45 = vld [vmem:[%s2646_s27 + $0xa0] sm:$0xff] }
  0x3c   : > { %621 = vmatpush.msra.mxu2 %v2763_v26  ;;  %582 = vmatpush.msra.mxu0 %v2776_v28  ;;  %v2820_v39 = vld [vmem:[%s2646_s27 + $0x1b0] sm:$0xff]  ;;  %v2841_v43 = vld [vmem:[%s2646_s27 + $0x1a8] sm:$0xff]  ;;  %v2854_v46 = vld [vmem:[%s2646_s27 + $0x120] sm:$0xff] }
  0x3d   : > { %641 = vmatpush.msra.mxu3 %v2766_v27  ;;  %602 = vmatpush.msra.mxu1 %v2779_v29  ;;  %v2857_v47 = vld [vmem:[%s2646_s27 + $0x1a0] sm:$0xff]  ;;  %v2865_v49 = vld [vmem:[%s2646_s27 + $0x18] sm:$0xff]  ;;  %v2884_v54 = vld [vmem:[%s2833_s12 + $0x8] sm:$0xf] }
  0x3e   : > { %622 = vmatpush.msra.mxu2 %v2784_v30  ;;  %583 = vmatpush.msra.mxu0 %v2792_v32  ;;  %v2860_v48 = vld [vmem:[%s2833_s12] sm:$0xf]  ;;  %v2868_v50 = vld [vmem:[%s2646_s27 + $0x98] sm:$0xff]  ;;  %v2872_v51 = vld [vmem:[%s2833_s12 + $0x4] sm:$0xf]  ;;  %4939 = vst [vmem:[#allocation19_spill] sm:$0xff] %v2884_v54 }
  0x3f   : > { %642 = vmatpush.msra.mxu3 %v2787_v31  ;;  %603 = vmatpush.msra.mxu1 %v2795_v33  ;;  %4934 = vst [vmem:[#allocation14_spill] sm:$0xff] %v2860_v48  ;;  %v2877_v52 = vld [vmem:[%s2646_s27 + $0x118] sm:$0xff]  ;;  %v2889_v55 = vld [vmem:[%s2646_s27 + $0x10] sm:$0xff]  ;;  %v2896_v57 = vld [vmem:[%s2833_s12 + $0xc] sm:$0xf] }
  0x40   : > { %623 = vmatpush.msra.mxu2 %v2800_v34  ;;  %584 = vmatpush.msra.mxu0 %v2809_v36  ;;  %4935 = vst [vmem:[#allocation15_spill] sm:$0xff] %v2868_v50  ;;  %v2880_v53 = vld [vmem:[%s2646_s27 + $0x198] sm:$0xff]  ;;  %v2892_v56 = vld [vmem:[%s2646_s27 + $0x90] sm:$0xff]  ;;  %v2910_v60 = vld [vmem:[%s2646_s27 + $0x8] sm:$0xff] }
  0x41   : > { %643 = vmatpush.msra.mxu3 %v2803_v35  ;;  %604 = vmatpush.msra.mxu1 %v2812_v37  ;;  %439 = vst [vmem:[#allocation2] sm:$0xf] %v2860_v48  ;;  %v2901_v58 = vld [vmem:[%s2646_s27 + $0x110] sm:$0xff]  ;;  %v2913_v61 = vld [vmem:[%s2646_s27 + $0x88] sm:$0xff] }
  0x42   : > { %624 = vmatpush.msra.mxu2 %v2817_v38  ;;  %585 = vmatpush.msra.mxu0 %v2825_v40  ;;  %4936 = vst [vmem:[#allocation16_spill] sm:$0xff] %v2872_v51  ;;  %v2904_v59 = vld [vmem:[%s2646_s27 + $0x190] sm:$0xff]  ;;  %v2918_v62 = vld [vmem:[%s2646_s27 + $0x108] sm:$0xff] }
  0x43   : > { %644 = vmatpush.msra.mxu3 %v2820_v39  ;;  %605 = vmatpush.msra.mxu1 %v2828_v41  ;;  %4937 = vst [vmem:[#allocation17_spill] sm:$0xff] %v2877_v52  ;;  %v2921_v63 = vld [vmem:[%s2646_s27 + $0x188] sm:$0xff] }
  0x44   : > { %625 = vmatpush.msra.mxu2 %v2838_v42  ;;  %586 = vmatpush.msra.mxu0 %v2846_v44  ;;  %4938 = vst [vmem:[#allocation18_spill] sm:$0xff] %v2880_v53 }
  0x45   : > { %645 = vmatpush.msra.mxu3 %v2841_v43  ;;  %606 = vmatpush.msra.mxu1 %v2849_v45  ;;  %440 = vst [vmem:[#allocation2 + $0x20] sm:$0xf] %v2872_v51 }
  0x46   : > { %626 = vmatpush.msra.mxu2 %v2854_v46  ;;  %4940 = vst [vmem:[#allocation20_spill] sm:$0xff] %v2889_v55  ;;  %587 = vmatpush.msra.mxu0 %v2865_v49 }
  0x47   : > { %646 = vmatpush.msra.mxu3 %v2857_v47  ;;  %4941 = vst [vmem:[#allocation21_spill] sm:$0xff] %v2892_v56  ;;  %607 = vmatpush.msra.mxu1 %v2868_v50  ;;  %v3202_v50 = vld [vmem:[%s2646_s27 + $0x200] sm:$0xff] }
  0x48   : > { %441 = vst [vmem:[#allocation2 + $0x40] sm:$0xf] %v2884_v54  ;;  %627 = vmatpush.msra.mxu2 %v2877_v52  ;;  %588 = vmatpush.msra.mxu0 %v2889_v55  ;;  %v2926_v52 = vld [vmem:[%s2646_s27] sm:$0xff] }
  0x49   : > { %4942 = vst [vmem:[#allocation22_spill] sm:$0xff] %v2896_v57  ;;  %647 = vmatpush.msra.mxu3 %v2880_v53  ;;  %608 = vmatpush.msra.mxu1 %v2892_v56  ;;  %v2929_v53 = vld [vmem:[%s2646_s27 + $0x80] sm:$0xff] }
  0x4a   : > { %4943 = vst [vmem:[#allocation23_spill] sm:$0xff] %v2901_v58  ;;  %628 = vmatpush.msra.mxu2 %v2901_v58  ;;  %589 = vmatpush.msra.mxu0 %v2910_v60  ;;  %v2934_v56 = vld [vmem:[%s2646_s27 + $0x100] sm:$0xff]  ;;  %v3101_v58 = vld [vmem:[%s2646_s27 + $0x3b8] sm:$0xff] }
  0x4b   : > { %4944 = vst [vmem:[#allocation24_spill] sm:$0xff] %v2904_v59  ;;  %648 = vmatpush.msra.mxu3 %v2904_v59  ;;  %609 = vmatpush.msra.mxu1 %v2913_v61  ;;  %v2937_v55 = vld [vmem:[%s2646_s27 + $0x180] sm:$0xff]  ;;  %v3089_v59 = vld [vmem:[%s2646_s27 + $0x238] sm:$0xff] }
  0x4c   : > { %442 = vst [vmem:[#allocation2 + $0x60] sm:$0xf] %v2896_v57  ;;  %629 = vmatpush.msra.mxu2 %v2918_v62  ;;  %590 = vmatpush.msra.mxu0 %v2926_v52 }
  0x4d   : > { %4945 = vst [vmem:[#allocation25_spill] sm:$0xff] %v2910_v60  ;;  %649 = vmatpush.msra.mxu3 %v2921_v63  ;;  %610 = vmatpush.msra.mxu1 %v2929_v53  ;;  %v2949_v60 = vld [vmem:[%s2646_s27 + $0x2f8] sm:$0xff] }
  0x4e   : > { %4946 = vst [vmem:[#allocation26_spill] sm:$0xff] %v2913_v61  ;;  %630 = vmatpush.msra.mxu2 %v2934_v56  ;;  %v2946_v61 = vld [vmem:[%s2646_s27 + $0x278] sm:$0xff]  ;;  %591 = vmatmul.f32.vlgmr.msra.gmra.mxu0 %v2860_v48  ;;  %v2973_v48 = vld [vmem:[%s2646_s27 + $0x3f0] sm:$0xff] }
  0x4f   : > { %4947 = vst [vmem:[#allocation27_spill] sm:$0xff] %v2918_v62  ;;  %650 = vmatpush.msra.mxu3 %v2937_v55  ;;  %611 = vmatmul.f32.vlgmr.msra.gmra.mxu1 %v2872_v51  ;;  %v2970_v51 = vld [vmem:[%s2646_s27 + $0x370] sm:$0xff]  ;;  %v3077_v62 = vld [vmem:[%s2646_s27 + $0x340] sm:$0xff] }
  0x50   : > { %4948 = vst [vmem:[#allocation28_spill] sm:$0xff] %v2921_v63  ;;  %v2954_v63 = vld [vmem:[%s2646_s27 + $0x378] sm:$0xff]  ;;  %631 = vmatmul.f32.vlgmr.msra.gmra.mxu2 %v2884_v54  ;;  %651 = vmatmul.f32.vlgmr.msra.gmra.mxu3 %v2896_v57  ;;  %v2978_v57 = vld [vmem:[%s2646_s27 + $0x268] sm:$0xff] }
  0x51   : > { %4949 = vst [vmem:[#allocation29_spill] sm:$0xff] %v2926_v52  ;;  %v2957_v52 = vld [vmem:[%s2646_s27 + $0x3f8] sm:$0xff]  ;;  %655 = vmatpush.msrb.mxu0 %v2946_v61  ;;  %675 = vmatpush.msrb.mxu1 %v2949_v60  ;;  %v2981_v54 = vld [vmem:[%s2646_s27 + $0x2e8] sm:$0xff] }
  0x52   : > { %4950 = vst [vmem:[#allocation30_spill] sm:$0xff] %v2929_v53  ;;  %695 = vmatpush.msrb.mxu2 %v2954_v63  ;;  %715 = vmatpush.msrb.mxu3 %v2957_v52  ;;  %v3048_v53 = vld [vmem:[%s2833_s12 + $0x10] sm:$0xf] }
  0x53   : > { %4951 = vst [vmem:[#allocation31_spill] sm:$0xff] %v2934_v56  ;;  %v2965_v56 = vld [vmem:[%s2646_s27 + $0x2f0] sm:$0xff] }
  0x54   : > { %4952 = vst [vmem:[#allocation32_spill] sm:$0xff] %v2937_v55  ;;  %v2962_v55 = vld [vmem:[%s2646_s27 + $0x270] sm:$0xff]  ;;  %676 = vmatpush.msrb.mxu1 %v2965_v56  ;;  %696 = vmatpush.msrb.mxu2 %v2970_v51 }
  0x55   : > { %4953 = vst [vmem:[#allocation33_spill] sm:$0xff] %v2946_v61  ;;  %656 = vmatpush.msrb.mxu0 %v2962_v55  ;;  %v2989_v61 = vld [vmem:[%s2646_s27 + $0x3e8] sm:$0xff]  ;;  %716 = vmatpush.msrb.mxu3 %v2973_v48 }
  0x56   : > { %4954 = vst [vmem:[#allocation34_spill] sm:$0xff] %v2949_v60  ;;  %v2986_v60 = vld [vmem:[%s2646_s27 + $0x368] sm:$0xff]  ;;  %677 = vmatpush.msrb.mxu1 %v2981_v54 }
  0x57   : > { %4955 = vst [vmem:[#allocation35_spill] sm:$0xff] %v2954_v63  ;;  %v2997_v63 = vld [vmem:[%s2646_s27 + $0x2e0] sm:$0xff]  ;;  %657 = vmatpush.msrb.mxu0 %v2978_v57  ;;  %697 = vmatpush.msrb.mxu2 %v2986_v60 }
  0x58   : > { %4956 = vst [vmem:[#allocation36_spill] sm:$0xff] %v2957_v52  ;;  %v2994_v52 = vld [vmem:[%s2646_s27 + $0x260] sm:$0xff]  ;;  %717 = vmatpush.msrb.mxu3 %v2989_v61  ;;  %678 = vmatpush.msrb.mxu1 %v2997_v63 }
  0x59   : > { %4957 = vst [vmem:[#allocation37_spill] sm:$0xff] %v2962_v55  ;;  %v3005_v55 = vld [vmem:[%s2646_s27 + $0x3e0] sm:$0xff]  ;;  %658 = vmatpush.msrb.mxu0 %v2994_v52 }
  0x5a   : > { %4958 = vst [vmem:[#allocation38_spill] sm:$0xff] %v2965_v56  ;;  %v3002_v56 = vld [vmem:[%s2646_s27 + $0x360] sm:$0xff]  ;;  %718 = vmatpush.msrb.mxu3 %v3005_v55 }
  0x5b   : > { %4959 = vst [vmem:[#allocation39_spill] sm:$0xff] %v2970_v51  ;;  %v3013_v51 = vld [vmem:[%s2646_s27 + $0x2d8] sm:$0xff]  ;;  %698 = vmatpush.msrb.mxu2 %v3002_v56 }
  0x5c   : > { %4960 = vst [vmem:[#allocation40_spill] sm:$0xff] %v2973_v48  ;;  %v3010_v48 = vld [vmem:[%s2646_s27 + $0x258] sm:$0xff]  ;;  %679 = vmatpush.msrb.mxu1 %v3013_v51 }
  0x5d   : > { %4961 = vst [vmem:[#allocation41_spill] sm:$0xff] %v2978_v57  ;;  %v3021_v57 = vld [vmem:[%s2646_s27 + $0x3d8] sm:$0xff]  ;;  %659 = vmatpush.msrb.mxu0 %v3010_v48 }
  0x5e   : > { %4962 = vst [vmem:[#allocation42_spill] sm:$0xff] %v2981_v54  ;;  %v3018_v54 = vld [vmem:[%s2646_s27 + $0x358] sm:$0xff]  ;;  %719 = vmatpush.msrb.mxu3 %v3021_v57 }
  0x5f   : > { %4963 = vst [vmem:[#allocation43_spill] sm:$0xff] %v2986_v60  ;;  %v3029_v60 = vld [vmem:[%s2646_s27 + $0x2d0] sm:$0xff]  ;;  %699 = vmatpush.msrb.mxu2 %v3018_v54 }
  0x60   : > { %4964 = vst [vmem:[#allocation44_spill] sm:$0xff] %v2989_v61  ;;  %v3026_v61 = vld [vmem:[%s2646_s27 + $0x250] sm:$0xff]  ;;  %680 = vmatpush.msrb.mxu1 %v3029_v60 }
  0x61   : > { %4965 = vst [vmem:[#allocation45_spill] sm:$0xff] %v2994_v52  ;;  %v3037_v52 = vld [vmem:[%s2646_s27 + $0x3d0] sm:$0xff]  ;;  %660 = vmatpush.msrb.mxu0 %v3026_v61 }
  0x62   : > { %4966 = vst [vmem:[#allocation46_spill] sm:$0xff] %v2997_v63  ;;  %v3034_v63 = vld [vmem:[%s2646_s27 + $0x350] sm:$0xff]  ;;  %720 = vmatpush.msrb.mxu3 %v3037_v52 }
  0x63   : > { %4967 = vst [vmem:[#allocation47_spill] sm:$0xff] %v3002_v56  ;;  %v3045_v56 = vld [vmem:[%s2646_s27 + $0x2c8] sm:$0xff]  ;;  %700 = vmatpush.msrb.mxu2 %v3034_v63 }
  0x64   : > { %4968 = vst [vmem:[#allocation48_spill] sm:$0xff] %v3005_v55  ;;  %v3042_v55 = vld [vmem:[%s2646_s27 + $0x248] sm:$0xff]  ;;  %681 = vmatpush.msrb.mxu1 %v3045_v56 }
  0x65   : > { %4969 = vst [vmem:[#allocation49_spill] sm:$0xff] %v3010_v48  ;;  %v3056_v48 = vld [vmem:[%s2646_s27 + $0x3c8] sm:$0xff]  ;;  %661 = vmatpush.msrb.mxu0 %v3042_v55 }
  0x66   : > { %4970 = vst [vmem:[#allocation50_spill] sm:$0xff] %v3013_v51  ;;  %v3053_v51 = vld [vmem:[%s2646_s27 + $0x348] sm:$0xff]  ;;  %721 = vmatpush.msrb.mxu3 %v3056_v48 }
  0x67   : > { %4971 = vst [vmem:[#allocation51_spill] sm:$0xff] %v3018_v54  ;;  %v3065_v54 = vld [vmem:[%s2646_s27 + $0x240] sm:$0xff]  ;;  %701 = vmatpush.msrb.mxu2 %v3053_v51 }
  0x68   : > { %4972 = vst [vmem:[#allocation52_spill] sm:$0xff] %v3021_v57  ;;  %v3060_v57 = vld [vmem:[%s2833_s12 + $0x14] sm:$0xf]  ;;  %662 = vmatpush.msrb.mxu0 %v3065_v54 }
  0x69   : > { %4973 = vst [vmem:[#allocation53_spill] sm:$0xff] %v3026_v61  ;;  %v3068_v61 = vld [vmem:[%s2646_s27 + $0x2c0] sm:$0xff]  ;;  %702 = vmatpush.msrb.mxu2 %v3077_v62 }
  0x6a   : > { %4974 = vst [vmem:[#allocation54_spill] sm:$0xff] %v3029_v60  ;;  %v3072_v60 = vld [vmem:[%s2833_s12 + $0x18] sm:$0xf]  ;;  %682 = vmatpush.msrb.mxu1 %v3068_v61  ;;  %663 = vmatpush.msrb.mxu0 %v3089_v59 }
  0x6b   : > { %4975 = vst [vmem:[#allocation55_spill] sm:$0xff] %v3034_v63  ;;  %v3080_v63 = vld [vmem:[%s2646_s27 + $0x3c0] sm:$0xff] }
  0x6c   : > { %4976 = vst [vmem:[#allocation56_spill] sm:$0xff] %v3037_v52  ;;  %v3084_v52 = vld [vmem:[%s2833_s12 + $0x1c] sm:$0xf]  ;;  %722 = vmatpush.msrb.mxu3 %v3080_v63 }
  0x6d   : > { %4977 = vst [vmem:[#allocation57_spill] sm:$0xff] %v3042_v55  ;;  %v3092_v55 = vld [vmem:[%s2646_s27 + $0x2b8] sm:$0xff] }
  0x6e   : > { %4978 = vst [vmem:[#allocation58_spill] sm:$0xff] %v3045_v56  ;;  %v3098_v56 = vld [vmem:[%s2646_s27 + $0x338] sm:$0xff]  ;;  %683 = vmatpush.msrb.mxu1 %v3092_v55  ;;  %723 = vmatpush.msrb.mxu3 %v3101_v58 }
  0x6f   : > { %4979 = vst [vmem:[#allocation59_spill] sm:$0xff] %v3053_v51  ;;  %v3109_v51 = vld [vmem:[%s2646_s27 + $0x2b0] sm:$0xff]  ;;  %703 = vmatpush.msrb.mxu2 %v3098_v56 }
  0x70   : > { %4980 = vst [vmem:[#allocation60_spill] sm:$0xff] %v3056_v48  ;;  %v3106_v48 = vld [vmem:[%s2646_s27 + $0x230] sm:$0xff]  ;;  %684 = vmatpush.msrb.mxu1 %v3109_v51 }
  0x71   : > { %443 = vst [vmem:[#allocation2 + $0x80] sm:$0xf] %v3048_v53  ;;  %664 = vmatpush.msrb.mxu0 %v3106_v48 }
  0x72   : > { %4981 = vst [vmem:[#allocation61_spill] sm:$0xff] %v3065_v54  ;;  %v3117_v54 = vld [vmem:[%s2646_s27 + $0x3b0] sm:$0xff] }
  0x73   : > { %4982 = vst [vmem:[#allocation62_spill] sm:$0xff] %v3068_v61  ;;  %v3114_v61 = vld [vmem:[%s2646_s27 + $0x330] sm:$0xff]  ;;  %724 = vmatpush.msrb.mxu3 %v3117_v54 }
  0x74   : > { %444 = vst [vmem:[#allocation2 + $0xa0] sm:$0xf] %v3060_v57  ;;  %704 = vmatpush.msrb.mxu2 %v3114_v61 }
  0x75   : > { %4983 = vst [vmem:[#allocation63_spill] sm:$0xff] %v3077_v62  ;;  %v3125_v62 = vld [vmem:[%s2646_s27 + $0x2a8] sm:$0xff] }
  0x76   : > { %4984 = vst [vmem:[#allocation64_spill] sm:$0xff] %v3080_v63  ;;  %v3122_v63 = vld [vmem:[%s2646_s27 + $0x228] sm:$0xff]  ;;  %685 = vmatpush.msrb.mxu1 %v3125_v62 }
  0x77   : > { %445 = vst [vmem:[#allocation2 + $0xc0] sm:$0xf] %v3072_v60  ;;  %665 = vmatpush.msrb.mxu0 %v3122_v63 }
  0x78   : > { %4985 = vst [vmem:[#allocation65_spill] sm:$0xff] %v3089_v59  ;;  %v3133_v59 = vld [vmem:[%s2646_s27 + $0x3a8] sm:$0xff] }
  0x79   : > { %4986 = vst [vmem:[#allocation66_spill] sm:$0xff] %v3092_v55  ;;  %v3130_v55 = vld [vmem:[%s2646_s27 + $0x328] sm:$0xff]  ;;  %725 = vmatpush.msrb.mxu3 %v3133_v59 }
  0x7a   : > { %446 = vst [vmem:[#allocation2 + $0xe0] sm:$0xf] %v3084_v52  ;;  %705 = vmatpush.msrb.mxu2 %v3130_v55 }
  0x7b   : > { %4987 = vst [vmem:[#allocation67_spill] sm:$0xff] %v3098_v56  ;;  %v3141_v56 = vld [vmem:[%s2646_s27 + $0x2a0] sm:$0xff] }
  0x7c   : > { %4988 = vst [vmem:[#allocation68_spill] sm:$0xff] %v3101_v58  ;;  %v3138_v58 = vld [vmem:[%s2646_s27 + $0x220] sm:$0xff]  ;;  %686 = vmatpush.msrb.mxu1 %v3141_v56 }
  0x7d   : > { %4989 = vst [vmem:[#allocation69_spill] sm:$0xff] %v3106_v48  ;;  %v3149_v48 = vld [vmem:[%s2646_s27 + $0x3a0] sm:$0xff]  ;;  %666 = vmatpush.msrb.mxu0 %v3138_v58 }
  0x7e   : > { %4990 = vst [vmem:[#allocation70_spill] sm:$0xff] %v3109_v51  ;;  %v3146_v51 = vld [vmem:[%s2646_s27 + $0x320] sm:$0xff]  ;;  %726 = vmatpush.msrb.mxu3 %v3149_v48 }
  0x7f   : > { %4991 = vst [vmem:[#allocation71_spill] sm:$0xff] %v3114_v61  ;;  %v3157_v61 = vld [vmem:[%s2646_s27 + $0x298] sm:$0xff]  ;;  %706 = vmatpush.msrb.mxu2 %v3146_v51 }
  0x80   : > { %4992 = vst [vmem:[#allocation72_spill] sm:$0xff] %v3117_v54  ;;  %v3154_v54 = vld [vmem:[%s2646_s27 + $0x218] sm:$0xff]  ;;  %687 = vmatpush.msrb.mxu1 %v3157_v61 }
  0x81   : > { %4993 = vst [vmem:[#allocation73_spill] sm:$0xff] %v3122_v63  ;;  %v3165_v63 = vld [vmem:[%s2646_s27 + $0x398] sm:$0xff]  ;;  %667 = vmatpush.msrb.mxu0 %v3154_v54 }
  0x82   : > { %4994 = vst [vmem:[#allocation74_spill] sm:$0xff] %v3125_v62  ;;  %v3162_v62 = vld [vmem:[%s2646_s27 + $0x318] sm:$0xff]  ;;  %727 = vmatpush.msrb.mxu3 %v3165_v63 }
  0x83   : > { %4995 = vst [vmem:[#allocation75_spill] sm:$0xff] %v3130_v55  ;;  %v3173_v55 = vld [vmem:[%s2646_s27 + $0x290] sm:$0xff]  ;;  %707 = vmatpush.msrb.mxu2 %v3162_v62 }
  0x84   : > { %4996 = vst [vmem:[#allocation76_spill] sm:$0xff] %v3133_v59  ;;  %v3170_v59 = vld [vmem:[%s2646_s27 + $0x210] sm:$0xff]  ;;  %688 = vmatpush.msrb.mxu1 %v3173_v55 }
  0x85   : > { %4997 = vst [vmem:[#allocation77_spill] sm:$0xff] %v3138_v58  ;;  %v3181_v58 = vld [vmem:[%s2646_s27 + $0x390] sm:$0xff]  ;;  %668 = vmatpush.msrb.mxu0 %v3170_v59 }
  0x86   : > { %4998 = vst [vmem:[#allocation78_spill] sm:$0xff] %v3141_v56  ;;  %v3178_v56 = vld [vmem:[%s2646_s27 + $0x310] sm:$0xff]  ;;  %728 = vmatpush.msrb.mxu3 %v3181_v58 }
  0x87   : > { %4999 = vst [vmem:[#allocation79_spill] sm:$0xff] %v3146_v51  ;;  %v3189_v51 = vld [vmem:[%s2646_s27 + $0x288] sm:$0xff]  ;;  %708 = vmatpush.msrb.mxu2 %v3178_v56 }
  0x88   : > { %5000 = vst [vmem:[#allocation80_spill] sm:$0xff] %v3149_v48  ;;  %v3186_v48 = vld [vmem:[%s2646_s27 + $0x208] sm:$0xff]  ;;  %689 = vmatpush.msrb.mxu1 %v3189_v51 }
  0x89   : > { %5001 = vst [vmem:[#allocation81_spill] sm:$0xff] %v3154_v54  ;;  %v3194_v54 = vld [vmem:[%s2646_s27 + $0x308] sm:$0xff]  ;;  %669 = vmatpush.msrb.mxu0 %v3186_v48 }
  0x8a   : > { %5002 = vst [vmem:[#allocation82_spill] sm:$0xff] %v3157_v61  ;;  %v3197_v61 = vld [vmem:[%s2646_s27 + $0x388] sm:$0xff]  ;;  %709 = vmatpush.msrb.mxu2 %v3194_v54 }
  0x8b   : > { %5003 = vst [vmem:[#allocation83_spill] sm:$0xff] %v3162_v62  ;;  %v3205_v62 = vld [vmem:[%s2646_s27 + $0x280] sm:$0xff]  ;;  %729 = vmatpush.msrb.mxu3 %v3197_v61  ;;  %670 = vmatpush.msrb.mxu0 %v3202_v50 }
  0x8c   : > { %5004 = vst [vmem:[#allocation84_spill] sm:$0xff] %v3165_v63  ;;  %v3210_v63 = vld [vmem:[%s2646_s27 + $0x300] sm:$0xff]  ;;  %690 = vmatpush.msrb.mxu1 %v3205_v62  ;;  %671 = vmatmul.f32.vlgmr.msrb.gmra.mxu0 %v3048_v53 }
  0x8d   : > { %5005 = vst [vmem:[#allocation85_spill] sm:$0xff] %v3170_v59  ;;  %v3213_v59 = vld [vmem:[%s2646_s27 + $0x380] sm:$0xff]  ;;  %710 = vmatpush.msrb.mxu2 %v3210_v63  ;;  %691 = vmatmul.f32.vlgmr.msrb.gmra.mxu1 %v3060_v57 }
  0x8e   : > { %730 = vmatpush.msrb.mxu3 %v3213_v59  ;;  %711 = vmatmul.f32.vlgmr.msrb.gmra.mxu2 %v3072_v60 }
  0x8f   : > { %731 = vmatmul.f32.vlgmr.msrb.gmra.mxu3 %v3084_v52  ;;  %743 = vmatpush.msra.mxu0 %v2662_v0  ;;  %v5006_v0 = vld [vmem:[#allocation15_spill] sm:$0xff] }
  0x90   : > { %763 = vmatpush.msra.mxu1 %v2665_v1  ;;  %783 = vmatpush.msra.mxu2 %v2668_v2  ;;  %v5007_v1 = vld [vmem:[#allocation17_spill] sm:$0xff]  ;;  %v5008_v2 = vld [vmem:[#allocation18_spill] sm:$0xff] }
  0x91   : > { %803 = vmatpush.msra.mxu3 %v2673_v3  ;;  %744 = vmatpush.msra.mxu0 %v2676_v4  ;;  %v5009_v3 = vld [vmem:[#allocation20_spill] sm:$0xff]  ;;  %v5010_v4 = vld [vmem:[#allocation21_spill] sm:$0xff] }
  0x92   : > { %764 = vmatpush.msra.mxu1 %v2679_v5  ;;  %784 = vmatpush.msra.mxu2 %v2684_v6  ;;  %v5011_v5 = vld [vmem:[#allocation23_spill] sm:$0xff]  ;;  %v5012_v6 = vld [vmem:[#allocation24_spill] sm:$0xff] }
  0x93   : > { %804 = vmatpush.msra.mxu3 %v2687_v7  ;;  %745 = vmatpush.msra.mxu0 %v2690_v8  ;;  %v5013_v7 = vld [vmem:[#allocation25_spill] sm:$0xff]  ;;  %v5014_v8 = vld [vmem:[#allocation26_spill] sm:$0xff] }
  0x94   : > { %765 = vmatpush.msra.mxu1 %v2695_v9  ;;  %785 = vmatpush.msra.mxu2 %v2698_v10  ;;  %v5015_v9 = vld [vmem:[#allocation27_spill] sm:$0xff]  ;;  %v5016_v10 = vld [vmem:[#allocation28_spill] sm:$0xff] }
  0x95   : > { %805 = vmatpush.msra.mxu3 %v2701_v11  ;;  %746 = vmatpush.msra.mxu0 %v2706_v12  ;;  %v5017_v11 = vld [vmem:[#allocation29_spill] sm:$0xff]  ;;  %v5018_v12 = vld [vmem:[#allocation30_spill] sm:$0xff] }
  0x96   : > { %766 = vmatpush.msra.mxu1 %v2709_v13  ;;  %786 = vmatpush.msra.mxu2 %v2714_v14  ;;  %v5019_v13 = vld [vmem:[#allocation33_spill] sm:$0xff]  ;;  %v5020_v14 = vld [vmem:[#allocation34_spill] sm:$0xff] }
  0x97   : > { %806 = vmatpush.msra.mxu3 %v2717_v15  ;;  %747 = vmatpush.msra.mxu0 %v2722_v16  ;;  %v5021_v15 = vld [vmem:[#allocation31_spill] sm:$0xff]  ;;  %v5022_v16 = vld [vmem:[#allocation32_spill] sm:$0xff] }
  0x98   : > { %767 = vmatpush.msra.mxu1 %v2725_v17  ;;  %787 = vmatpush.msra.mxu2 %v2730_v18  ;;  %v5023_v17 = vld [vmem:[#allocation37_spill] sm:$0xff]  ;;  %v5024_v18 = vld [vmem:[#allocation38_spill] sm:$0xff] }
  0x99   : > { %807 = vmatpush.msra.mxu3 %v2733_v19  ;;  %748 = vmatpush.msra.mxu0 %v2739_v20  ;;  %v5025_v19 = vld [vmem:[#allocation35_spill] sm:$0xff]  ;;  %v5026_v20 = vld [vmem:[#allocation36_spill] sm:$0xff] }
  0x9a   : > { %768 = vmatpush.msra.mxu1 %v2742_v21  ;;  %788 = vmatpush.msra.mxu2 %v2747_v22  ;;  %v5027_v21 = vld [vmem:[#allocation41_spill] sm:$0xff]  ;;  %v5028_v22 = vld [vmem:[#allocation42_spill] sm:$0xff] }
  0x9b   : > { %808 = vmatpush.msra.mxu3 %v2750_v23  ;;  %749 = vmatpush.msra.mxu0 %v2755_v24  ;;  %v5029_v23 = vld [vmem:[#allocation39_spill] sm:$0xff]  ;;  %v5030_v24 = vld [vmem:[#allocation40_spill] sm:$0xff] }
  0x9c   : > { %769 = vmatpush.msra.mxu1 %v2758_v25  ;;  %789 = vmatpush.msra.mxu2 %v2763_v26  ;;  %v5031_v25 = vld [vmem:[#allocation45_spill] sm:$0xff]  ;;  %v5032_v26 = vld [vmem:[#allocation46_spill] sm:$0xff] }
  0x9d   : > { %809 = vmatpush.msra.mxu3 %v2766_v27  ;;  %750 = vmatpush.msra.mxu0 %v2776_v28  ;;  %v5033_v27 = vld [vmem:[#allocation43_spill] sm:$0xff]  ;;  %v5034_v28 = vld [vmem:[#allocation44_spill] sm:$0xff] }
  0x9e   : > { %770 = vmatpush.msra.mxu1 %v2779_v29  ;;  %790 = vmatpush.msra.mxu2 %v2784_v30  ;;  %v5035_v29 = vld [vmem:[#allocation49_spill] sm:$0xff]  ;;  %v5036_v30 = vld [vmem:[#allocation50_spill] sm:$0xff] }
  0x9f   : > { %810 = vmatpush.msra.mxu3 %v2787_v31  ;;  %751 = vmatpush.msra.mxu0 %v2792_v32  ;;  %v5037_v31 = vld [vmem:[#allocation47_spill] sm:$0xff]  ;;  %v5038_v32 = vld [vmem:[#allocation48_spill] sm:$0xff] }
  0xa0   : > { %771 = vmatpush.msra.mxu1 %v2795_v33  ;;  %791 = vmatpush.msra.mxu2 %v2800_v34  ;;  %v5039_v33 = vld [vmem:[#allocation53_spill] sm:$0xff]  ;;  %v5040_v34 = vld [vmem:[#allocation54_spill] sm:$0xff] }
  0xa1   : > { %811 = vmatpush.msra.mxu3 %v2803_v35  ;;  %752 = vmatpush.msra.mxu0 %v2809_v36  ;;  %v5041_v35 = vld [vmem:[#allocation51_spill] sm:$0xff]  ;;  %v5042_v36 = vld [vmem:[#allocation52_spill] sm:$0xff] }
  0xa2   : > { %772 = vmatpush.msra.mxu1 %v2812_v37  ;;  %792 = vmatpush.msra.mxu2 %v2817_v38  ;;  %v5043_v37 = vld [vmem:[#allocation57_spill] sm:$0xff]  ;;  %v5044_v38 = vld [vmem:[#allocation58_spill] sm:$0xff] }
  0xa3   : > { %812 = vmatpush.msra.mxu3 %v2820_v39  ;;  %753 = vmatpush.msra.mxu0 %v2825_v40  ;;  %v5045_v39 = vld [vmem:[#allocation55_spill] sm:$0xff]  ;;  %v5046_v40 = vld [vmem:[#allocation56_spill] sm:$0xff] }
  0xa4   : > { %773 = vmatpush.msra.mxu1 %v2828_v41  ;;  %793 = vmatpush.msra.mxu2 %v2838_v42  ;;  %v5047_v41 = vld [vmem:[#allocation61_spill] sm:$0xff]  ;;  %v5048_v42 = vld [vmem:[#allocation62_spill] sm:$0xff] }
  0xa5   : > { %813 = vmatpush.msra.mxu3 %v2841_v43  ;;  %754 = vmatpush.msra.mxu0 %v2846_v44  ;;  %v5049_v43 = vld [vmem:[#allocation59_spill] sm:$0xff]  ;;  %v5050_v44 = vld [vmem:[#allocation60_spill] sm:$0xff] }
  0xa6   : > { %774 = vmatpush.msra.mxu1 %v2849_v45  ;;  %794 = vmatpush.msra.mxu2 %v2854_v46  ;;  %v5051_v45 = vld [vmem:[#allocation65_spill] sm:$0xff]  ;;  %v5052_v46 = vld [vmem:[#allocation66_spill] sm:$0xff] }
  0xa7   : > { %814 = vmatpush.msra.mxu3 %v2857_v47  ;;  %755 = vmatpush.msra.mxu0 %v2865_v49  ;;  %v5053_v47 = vld [vmem:[#allocation63_spill] sm:$0xff]  ;;  %v5054_v49 = vld [vmem:[#allocation64_spill] sm:$0xff] }
  0xa8   : > { %775 = vmatpush.msra.mxu1 %v5006_v0  ;;  %795 = vmatpush.msra.mxu2 %v5007_v1  ;;  %v5055_v0 = vld [vmem:[#allocation69_spill] sm:$0xff]  ;;  %v5056_v1 = vld [vmem:[#allocation70_spill] sm:$0xff] }
  0xa9   : > { %815 = vmatpush.msra.mxu3 %v5008_v2  ;;  %756 = vmatpush.msra.mxu0 %v5009_v3  ;;  %v5057_v2 = vld [vmem:[#allocation67_spill] sm:$0xff]  ;;  %v5058_v3 = vld [vmem:[#allocation68_spill] sm:$0xff] }
  0xaa   : > { %776 = vmatpush.msra.mxu1 %v5010_v4  ;;  %796 = vmatpush.msra.mxu2 %v5011_v5  ;;  %v5059_v4 = vld [vmem:[#allocation73_spill] sm:$0xff]  ;;  %v5060_v5 = vld [vmem:[#allocation74_spill] sm:$0xff] }
  0xab   : > { %816 = vmatpush.msra.mxu3 %v5012_v6  ;;  %757 = vmatpush.msra.mxu0 %v5013_v7  ;;  %v5061_v6 = vld [vmem:[#allocation71_spill] sm:$0xff]  ;;  %v5062_v7 = vld [vmem:[#allocation72_spill] sm:$0xff] }
  0xac   : > { %777 = vmatpush.msra.mxu1 %v5014_v8  ;;  %797 = vmatpush.msra.mxu2 %v5015_v9  ;;  %v5063_v8 = vld [vmem:[#allocation77_spill] sm:$0xff]  ;;  %v5064_v9 = vld [vmem:[#allocation78_spill] sm:$0xff] }
  0xad   : > { %817 = vmatpush.msra.mxu3 %v5016_v10  ;;  %758 = vmatpush.msra.mxu0 %v5017_v11  ;;  %v5065_v10 = vld [vmem:[#allocation75_spill] sm:$0xff]  ;;  %v5066_v11 = vld [vmem:[#allocation76_spill] sm:$0xff] }
  0xae   : > { %778 = vmatpush.msra.mxu1 %v5018_v12  ;;  %798 = vmatpush.msra.mxu2 %v5021_v15  ;;  %v5067_v12 = vld [vmem:[#allocation81_spill] sm:$0xff]  ;;  %v5070_v15 = vld [vmem:[#allocation80_spill] sm:$0xff] }
  0xaf   : > { %823 = vmatpush.msrb.mxu0 %v5019_v13  ;;  %818 = vmatpush.msra.mxu3 %v5022_v16  ;;  %v5068_v13 = vld [vmem:[#allocation82_spill] sm:$0xff]  ;;  %v5071_v16 = vld [vmem:[#allocation85_spill] sm:$0xff] }
  0xb0   : > { %843 = vmatpush.msrb.mxu1 %v5020_v14  ;;  %863 = vmatpush.msrb.mxu2 %v5025_v19  ;;  %v5069_v14 = vld [vmem:[#allocation79_spill] sm:$0xff] }
  0xb1   : > { %824 = vmatpush.msrb.mxu0 %v5023_v17  ;;  %883 = vmatpush.msrb.mxu3 %v5026_v20  ;;  %v5072_v17 = vld [vmem:[#allocation83_spill] sm:$0xff]  ;;  %v3384_v20 = vld [vmem:[%s2655_s8 + $0x178] sm:$0xff] }
  0xb2   : > { %844 = vmatpush.msrb.mxu1 %v5024_v18  ;;  %864 = vmatpush.msrb.mxu2 %v5029_v23  ;;  %v5073_v18 = vld [vmem:[#allocation84_spill] sm:$0xff]  ;;  %v3393_v23 = vld [vmem:[%s2655_s8 + $0xd8] sm:$0xff] }
  0xb3   : > { %825 = vmatpush.msrb.mxu0 %v5027_v21  ;;  %884 = vmatpush.msrb.mxu3 %v5030_v24  ;;  %v3387_v21 = vld [vmem:[%s2655_s8 + $0x1f8] sm:$0xff]  ;;  %v3398_v24 = vld [vmem:[%s2655_s8 + $0x170] sm:$0xff] }
  0xb4   : > { %845 = vmatpush.msrb.mxu1 %v5028_v22  ;;  %865 = vmatpush.msrb.mxu2 %v5033_v27  ;;  %v3390_v22 = vld [vmem:[%s2655_s8 + $0x58] sm:$0xff]  ;;  %v3409_v27 = vld [vmem:[%s2655_s8 + $0xd0] sm:$0xff] }
  0xb5   : > { %826 = vmatpush.msrb.mxu0 %v5031_v25  ;;  %885 = vmatpush.msrb.mxu3 %v5034_v28  ;;  %v3401_v25 = vld [vmem:[%s2655_s8 + $0x1f0] sm:$0xff]  ;;  %v3414_v28 = vld [vmem:[%s2655_s8 + $0x168] sm:$0xff] }
  0xb6   : > { %846 = vmatpush.msrb.mxu1 %v5032_v26  ;;  %866 = vmatpush.msrb.mxu2 %v5037_v31  ;;  %v3406_v26 = vld [vmem:[%s2655_s8 + $0x50] sm:$0xff]  ;;  %v3425_v31 = vld [vmem:[%s2655_s8 + $0xc8] sm:$0xff] }
  0xb7   : > { %827 = vmatpush.msrb.mxu0 %v5035_v29  ;;  %886 = vmatpush.msrb.mxu3 %v5038_v32  ;;  %v3417_v29 = vld [vmem:[%s2655_s8 + $0x1e8] sm:$0xff]  ;;  %v3430_v32 = vld [vmem:[%s2655_s8 + $0x160] sm:$0xff] }
  0xb8   : > { %847 = vmatpush.msrb.mxu1 %v5036_v30  ;;  %867 = vmatpush.msrb.mxu2 %v5041_v35  ;;  %v3422_v30 = vld [vmem:[%s2655_s8 + $0x48] sm:$0xff]  ;;  %v3441_v35 = vld [vmem:[%s2655_s8 + $0xc0] sm:$0xff] }
  0xb9   : > { %828 = vmatpush.msrb.mxu0 %v5039_v33  ;;  %887 = vmatpush.msrb.mxu3 %v5042_v36  ;;  %v3433_v33 = vld [vmem:[%s2655_s8 + $0x1e0] sm:$0xff]  ;;  %v3446_v36 = vld [vmem:[%s2655_s8 + $0x158] sm:$0xff] }
  0xba   : > { %848 = vmatpush.msrb.mxu1 %v5040_v34  ;;  %868 = vmatpush.msrb.mxu2 %v5045_v39  ;;  %v3438_v34 = vld [vmem:[%s2655_s8 + $0x40] sm:$0xff]  ;;  %v3457_v39 = vld [vmem:[%s2655_s8 + $0xb8] sm:$0xff] }
  0xbb   : > { %829 = vmatpush.msrb.mxu0 %v5043_v37  ;;  %888 = vmatpush.msrb.mxu3 %v5046_v40  ;;  %v3449_v37 = vld [vmem:[%s2655_s8 + $0x1d8] sm:$0xff]  ;;  %v3462_v40 = vld [vmem:[%s2655_s8 + $0x150] sm:$0xff] }
  0xbc   : > { %849 = vmatpush.msrb.mxu1 %v5044_v38  ;;  %869 = vmatpush.msrb.mxu2 %v5049_v43  ;;  %v3454_v38 = vld [vmem:[%s2655_s8 + $0x38] sm:$0xff]  ;;  %v3473_v43 = vld [vmem:[%s2655_s8 + $0xb0] sm:$0xff] }
  0xbd   : > { %830 = vmatpush.msrb.mxu0 %v5047_v41  ;;  %889 = vmatpush.msrb.mxu3 %v5050_v44  ;;  %v3465_v41 = vld [vmem:[%s2655_s8 + $0x1d0] sm:$0xff]  ;;  %v3478_v44 = vld [vmem:[%s2655_s8 + $0x148] sm:$0xff] }
  0xbe   : > { %850 = vmatpush.msrb.mxu1 %v5048_v42  ;;  %870 = vmatpush.msrb.mxu2 %v5053_v47  ;;  %v3470_v42 = vld [vmem:[%s2655_s8 + $0x30] sm:$0xff]  ;;  %v3489_v47 = vld [vmem:[%s2655_s8 + $0xa8] sm:$0xff] }
  0xbf   : > { %831 = vmatpush.msrb.mxu0 %v5051_v45  ;;  %890 = vmatpush.msrb.mxu3 %v5054_v49  ;;  %v3481_v45 = vld [vmem:[%s2655_s8 + $0x1c8] sm:$0xff]  ;;  %v3494_v49 = vld [vmem:[%s2655_s8 + $0x140] sm:$0xff] }
  0xc0   : > { %851 = vmatpush.msrb.mxu1 %v5052_v46  ;;  %871 = vmatpush.msrb.mxu2 %v5057_v2  ;;  %v3486_v46 = vld [vmem:[%s2655_s8 + $0x28] sm:$0xff]  ;;  %v3505_v2 = vld [vmem:[%s2655_s8 + $0xa0] sm:$0xff] }
  0xc1   : > { %832 = vmatpush.msrb.mxu0 %v5055_v0  ;;  %891 = vmatpush.msrb.mxu3 %v5058_v3  ;;  %v3497_v0 = vld [vmem:[%s2655_s8 + $0x1c0] sm:$0xff]  ;;  %v3510_v3 = vld [vmem:[%s2655_s8 + $0x138] sm:$0xff] }
  0xc2   : > { %852 = vmatpush.msrb.mxu1 %v5056_v1  ;;  %872 = vmatpush.msrb.mxu2 %v5061_v6  ;;  %v3502_v1 = vld [vmem:[%s2655_s8 + $0x20] sm:$0xff]  ;;  %v3521_v6 = vld [vmem:[%s2655_s8 + $0x98] sm:$0xff] }
  0xc3   : > { %833 = vmatpush.msrb.mxu0 %v5059_v4  ;;  %892 = vmatpush.msrb.mxu3 %v5062_v7  ;;  %v3513_v4 = vld [vmem:[%s2655_s8 + $0x1b8] sm:$0xff]  ;;  %v3526_v7 = vld [vmem:[%s2655_s8 + $0x130] sm:$0xff] }
  0xc4   : > { %853 = vmatpush.msrb.mxu1 %v5060_v5  ;;  %873 = vmatpush.msrb.mxu2 %v5065_v10  ;;  %v3518_v5 = vld [vmem:[%s2655_s8 + $0x18] sm:$0xff]  ;;  %v3537_v10 = vld [vmem:[%s2655_s8 + $0x90] sm:$0xff] }
  0xc5   : > { %834 = vmatpush.msrb.mxu0 %v5063_v8  ;;  %893 = vmatpush.msrb.mxu3 %v5066_v11  ;;  %v3529_v8 = vld [vmem:[%s2655_s8 + $0x1b0] sm:$0xff]  ;;  %5074 = vst [vmem:[#allocation15_spill] sm:$0xff] %v3537_v10  ;;  %v3542_v11 = vld [vmem:[%s2655_s8 + $0x128] sm:$0xff] }
  0xc6   : > { %854 = vmatpush.msrb.mxu1 %v5064_v9  ;;  %874 = vmatpush.msrb.mxu2 %v5069_v14  ;;  %v3534_v9 = vld [vmem:[%s2655_s8 + $0x10] sm:$0xff]  ;;  %v3553_v14 = vld [vmem:[%s2655_s8 + $0x88] sm:$0xff] }
  0xc7   : > { %835 = vmatpush.msrb.mxu0 %v5067_v12  ;;  %894 = vmatpush.msrb.mxu3 %v5070_v15  ;;  %v3545_v12 = vld [vmem:[%s2655_s8 + $0x1a8] sm:$0xff]  ;;  %5076 = vst [vmem:[#allocation18_spill] sm:$0xff] %v3553_v14  ;;  %v3558_v15 = vld [vmem:[%s2655_s8 + $0x120] sm:$0xff] }
  0xc8   : > { %855 = vmatpush.msrb.mxu1 %v5068_v13  ;;  %875 = vmatpush.msrb.mxu2 %v5072_v17  ;;  %v3550_v13 = vld [vmem:[%s2655_s8 + $0x8] sm:$0xff]  ;;  %5077 = vst [vmem:[#allocation20_spill] sm:$0xff] %v3558_v15  ;;  %v3566_v17 = vld [vmem:[%s2655_s8] sm:$0xff] }
  0xc9   : > { %836 = vmatpush.msrb.mxu0 %v5071_v16  ;;  %895 = vmatpush.msrb.mxu3 %v5073_v18  ;;  %5075 = vst [vmem:[#allocation17_spill] sm:$0xff] %v3550_v13  ;;  %v3561_v16 = vld [vmem:[%s2655_s8 + $0x1a0] sm:$0xff] }
  0xca   : > { %856 = vmatpush.msrb.mxu1 %v3173_v55  ;;  %876 = vmatpush.msrb.mxu2 %v3178_v56  ;;  %5078 = vst [vmem:[#allocation21_spill] sm:$0xff] %v3561_v16  ;;  %v3569_v18 = vld [vmem:[%s2655_s8 + $0x80] sm:$0xff] }
  0xcb   : > { %837 = vmatpush.msrb.mxu0 %v3186_v48  ;;  %896 = vmatpush.msrb.mxu3 %v3181_v58  ;;  %v3354_v48 = vld [vmem:[%s2655_s8 + $0x78] sm:$0xff]  ;;  %v592_v55 = vpop.f32.mrf.mxu0  ;;  %v3368_v58 = vld [vmem:[%s2655_s8 + $0x68] sm:$0xff]  ;;  %5079 = vst [vmem:[#allocation23_spill] sm:$0xff] %v3566_v17 }
  0xcc   : > { %857 = vmatpush.msrb.mxu1 %v3189_v51  ;;  %877 = vmatpush.msrb.mxu2 %v3194_v54  ;;  %v3357_v51 = vld [vmem:[%s2655_s8 + $0xf8] sm:$0xff]  ;;  %v612_v56 = vpop.f32.mrf.mxu1  ;;  %735 = vst [vmem:[#allocation2 + $0x4] sm:$0xf] %v592_v55  ;;  %v3363_v54 = vld [vmem:[%s2655_s8 + $0xf0] sm:$0xff] }
  0xcd   : > { %838 = vmatpush.msrb.mxu0 %v3202_v50  ;;  %897 = vmatpush.msrb.mxu3 %v3197_v61  ;;  %v3360_v50 = vld [vmem:[%s2655_s8 + $0x70] sm:$0xff]  ;;  %736 = vst [vmem:[#allocation2 + $0x24] sm:$0xf] %v612_v56  ;;  %v3378_v61 = vld [vmem:[%s2655_s8 + $0x60] sm:$0xff] }
  0xce   : > { %858 = vmatpush.msrb.mxu1 %v3205_v62  ;;  %878 = vmatpush.msrb.mxu2 %v3210_v63  ;;  %v3381_v62 = vld [vmem:[%s2655_s8 + $0xe0] sm:$0xff]  ;;  %5080 = vst [vmem:[#allocation24_spill] sm:$0xff] %v3569_v18 }
  0xcf   : > { %898 = vmatpush.msrb.mxu3 %v3213_v59  ;;  %759 = vmatmul.f32.vlgmr.msra.gmra.mxu0 %v592_v55  ;;  %v3371_v59 = vld [vmem:[%s2655_s8 + $0xe8] sm:$0xff]  ;;  %v3574_v55 = vld [vmem:[%s2655_s8 + $0x118] sm:$0xff] }
  0xd0   : > { %779 = vmatmul.f32.vlgmr.msra.gmra.mxu1 %v612_v56  ;;  %1039 = vmatpush.msra.mxu0 %v3354_v48  ;;  %5081 = vst [vmem:[#allocation25_spill] sm:$0xff] %v3574_v55  ;;  %v3577_v56 = vld [vmem:[%s2655_s8 + $0x198] sm:$0xff] }
  0xd1   : > { %1059 = vmatpush.msra.mxu1 %v3357_v51  ;;  %5082 = vst [vmem:[#allocation26_spill] sm:$0xff] %v3577_v56 }
  0xd2   : > { %1040 = vmatpush.msra.mxu0 %v3360_v50 }
  0xd3   : > { %1060 = vmatpush.msra.mxu1 %v3363_v54  ;;  %v632_v63 = vpop.f32.mrf.mxu2  ;;  %v652_v19 = vpop.f32.mrf.mxu3 }
  0xd4   : > { %1041 = vmatpush.msra.mxu0 %v3368_v58  ;;  %737 = vst [vmem:[#allocation2 + $0x44] sm:$0xf] %v632_v63  ;;  %799 = vmatmul.f32.vlgmr.msra.gmra.mxu2 %v632_v63  ;;  %v3584_v63 = vld [vmem:[%s2655_s8 + $0x278] sm:$0xff] }
  0xd5   : > { %1061 = vmatpush.msra.mxu1 %v3371_v59  ;;  %819 = vmatmul.f32.vlgmr.msra.gmra.mxu3 %v652_v19  ;;  %738 = vst [vmem:[#allocation2 + $0x64] sm:$0xf] %v652_v19  ;;  %v3587_v19 = vld [vmem:[%s2655_s8 + $0x2f8] sm:$0xff] }
  0xd6   : > { %1042 = vmatpush.msra.mxu0 %v3378_v61  ;;  %1079 = vmatpush.msra.mxu2 %v3384_v20  ;;  %5083 = vst [vmem:[#allocation27_spill] sm:$0xff] %v3587_v19 }
  0xd7   : > { %1062 = vmatpush.msra.mxu1 %v3381_v62  ;;  %1099 = vmatpush.msra.mxu3 %v3387_v21 }
  0xd8   : > { %1043 = vmatpush.msra.mxu0 %v3390_v22  ;;  %1080 = vmatpush.msra.mxu2 %v3398_v24 }
  0xd9   : > { %1063 = vmatpush.msra.mxu1 %v3393_v23  ;;  %1100 = vmatpush.msra.mxu3 %v3401_v25 }
  0xda   : > { %1044 = vmatpush.msra.mxu0 %v3406_v26  ;;  %1081 = vmatpush.msra.mxu2 %v3414_v28 }
  0xdb   : > { %1064 = vmatpush.msra.mxu1 %v3409_v27  ;;  %1101 = vmatpush.msra.mxu3 %v3417_v29 }
  0xdc   : > { %1045 = vmatpush.msra.mxu0 %v3422_v30  ;;  %1082 = vmatpush.msra.mxu2 %v3430_v32 }
  0xdd   : > { %1065 = vmatpush.msra.mxu1 %v3425_v31  ;;  %1102 = vmatpush.msra.mxu3 %v3433_v33 }
  0xde   : > { %1046 = vmatpush.msra.mxu0 %v3438_v34  ;;  %1083 = vmatpush.msra.mxu2 %v3446_v36 }
  0xdf   : > { %1066 = vmatpush.msra.mxu1 %v3441_v35  ;;  %1103 = vmatpush.msra.mxu3 %v3449_v37 }
  0xe0   : > { %1047 = vmatpush.msra.mxu0 %v3454_v38  ;;  %1084 = vmatpush.msra.mxu2 %v3462_v40 }
  0xe1   : > { %1067 = vmatpush.msra.mxu1 %v3457_v39  ;;  %1104 = vmatpush.msra.mxu3 %v3465_v41 }
  0xe2   : > { %1048 = vmatpush.msra.mxu0 %v3470_v42  ;;  %1085 = vmatpush.msra.mxu2 %v3478_v44 }
  0xe3   : > { %1068 = vmatpush.msra.mxu1 %v3473_v43  ;;  %1105 = vmatpush.msra.mxu3 %v3481_v45 }
  0xe4   : > { %1049 = vmatpush.msra.mxu0 %v3486_v46  ;;  %1086 = vmatpush.msra.mxu2 %v3494_v49 }
  0xe5   : > { %1069 = vmatpush.msra.mxu1 %v3489_v47  ;;  %1106 = vmatpush.msra.mxu3 %v3497_v0 }
  0xe6   : > { %1050 = vmatpush.msra.mxu0 %v3502_v1  ;;  %1087 = vmatpush.msra.mxu2 %v3510_v3 }
  0xe7   : > { %1070 = vmatpush.msra.mxu1 %v3505_v2  ;;  %1107 = vmatpush.msra.mxu3 %v3513_v4 }
  0xe8   : > { %1051 = vmatpush.msra.mxu0 %v3518_v5  ;;  %1088 = vmatpush.msra.mxu2 %v3526_v7 }
  0xe9   : > { %1071 = vmatpush.msra.mxu1 %v3521_v6  ;;  %1108 = vmatpush.msra.mxu3 %v3529_v8 }
  0xea   : > { %1052 = vmatpush.msra.mxu0 %v3534_v9  ;;  %1089 = vmatpush.msra.mxu2 %v3542_v11 }
  0xeb   : > { %1072 = vmatpush.msra.mxu1 %v3537_v10  ;;  %1109 = vmatpush.msra.mxu3 %v3545_v12  ;;  %v3617_v10 = vld [vmem:[%s2655_s8 + $0x2e8] sm:$0xff] }
  0xec   : > { %1053 = vmatpush.msra.mxu0 %v3550_v13  ;;  %1090 = vmatpush.msra.mxu2 %v3558_v15  ;;  %v3592_v15 = vld [vmem:[%s2655_s8 + $0x110] sm:$0xff]  ;;  %5091 = vst [vmem:[#allocation37_spill] sm:$0xff] %v3617_v10 }
  0xed   : > { %1073 = vmatpush.msra.mxu1 %v3553_v14  ;;  %1110 = vmatpush.msra.mxu3 %v3561_v16  ;;  %5084 = vst [vmem:[#allocation28_spill] sm:$0xff] %v3592_v15  ;;  %v3595_v16 = vld [vmem:[%s2655_s8 + $0x190] sm:$0xff] }
  0xee   : > { %1054 = vmatpush.msra.mxu0 %v3566_v17  ;;  %1091 = vmatpush.msra.mxu2 %v3574_v55  ;;  %5085 = vst [vmem:[#allocation29_spill] sm:$0xff] %v3595_v16  ;;  %v3601_v17 = vld [vmem:[%s2655_s8 + $0x2f0] sm:$0xff]  ;;  %v3609_v55 = vld [vmem:[%s2655_s8 + $0x188] sm:$0xff] }
  0xef   : > { %1074 = vmatpush.msra.mxu1 %v3569_v18  ;;  %1111 = vmatpush.msra.mxu3 %v3577_v56  ;;  %v3598_v18 = vld [vmem:[%s2655_s8 + $0x270] sm:$0xff]  ;;  %5087 = vst [vmem:[#allocation33_spill] sm:$0xff] %v3601_v17  ;;  %v3606_v56 = vld [vmem:[%s2655_s8 + $0x108] sm:$0xff] }
  0xf0   : > { %5086 = vst [vmem:[#allocation30_spill] sm:$0xff] %v3598_v18  ;;  %1092 = vmatpush.msra.mxu2 %v3592_v15  ;;  %v3635_v15 = vld [vmem:[%s2655_s8 + $0x2e0] sm:$0xff] }
  0xf1   : > { %5088 = vst [vmem:[#allocation34_spill] sm:$0xff] %v3606_v56  ;;  %1112 = vmatpush.msra.mxu3 %v3595_v16  ;;  %v3632_v16 = vld [vmem:[%s2655_s8 + $0x260] sm:$0xff] }
  0xf2   : > { %5089 = vst [vmem:[#allocation31_spill] sm:$0xff] %v3609_v55  ;;  %1093 = vmatpush.msra.mxu2 %v3606_v56  ;;  %v3640_v56 = vld [vmem:[%s2655_s8 + $0x378] sm:$0xff] }
  0xf3   : > { %1113 = vmatpush.msra.mxu3 %v3609_v55  ;;  %5094 = vst [vmem:[#allocation36_spill] sm:$0xff] %v3632_v16  ;;  %v3667_v55 = vld [vmem:[%s2655_s8 + $0x2d0] sm:$0xff] }
  0xf4   : > { %5095 = vst [vmem:[#allocation41_spill] sm:$0xff] %v3635_v15 }
  0xf5   : > { %5096 = vst [vmem:[#allocation42_spill] sm:$0xff] %v3640_v56 }
  0xf6   : > { %5105 = vst [vmem:[#allocation49_spill] sm:$0xff] %v3667_v55 }
 0x109   : > { %v672_v14 = vpop.f32.mrf.mxu0 }
 0x10a   : > { %v692_v13 = vpop.f32.mrf.mxu1  ;;  %739 = vst [vmem:[#allocation2 + $0x84] sm:$0xf] %v672_v14  ;;  %839 = vmatmul.f32.vlgmr.msrb.gmra.mxu0 %v672_v14  ;;  %v3614_v14 = vld [vmem:[%s2655_s8 + $0x268] sm:$0xff] }
 0x10b   : > { %859 = vmatmul.f32.vlgmr.msrb.gmra.mxu1 %v692_v13  ;;  %740 = vst [vmem:[#allocation2 + $0xa4] sm:$0xf] %v692_v13  ;;  %1119 = vmatpush.msrb.mxu0 %v3584_v63  ;;  %v3622_v13 = vld [vmem:[%s2655_s8 + $0x100] sm:$0xff] }
 0x10c   : > { %1139 = vmatpush.msrb.mxu1 %v3587_v19  ;;  %5090 = vst [vmem:[#allocation32_spill] sm:$0xff] %v3614_v14  ;;  %v3625_v19 = vld [vmem:[%s2655_s8 + $0x180] sm:$0xff]  ;;  %1094 = vmatpush.msra.mxu2 %v3622_v13 }
 0x10d   : > { %1120 = vmatpush.msrb.mxu0 %v3598_v18  ;;  %5092 = vst [vmem:[#allocation38_spill] sm:$0xff] %v3622_v13  ;;  %1114 = vmatpush.msra.mxu3 %v3625_v19  ;;  %v3656_v13 = vld [vmem:[%s2655_s8 + $0x370] sm:$0xff] }
 0x10e   : > { %1140 = vmatpush.msrb.mxu1 %v3601_v17  ;;  %5093 = vst [vmem:[#allocation35_spill] sm:$0xff] %v3625_v19  ;;  %v3651_v19 = vld [vmem:[%s2655_s8 + $0x2d8] sm:$0xff] }
 0x10f   : > { %1121 = vmatpush.msrb.mxu0 %v3614_v14  ;;  %v3643_v14 = vld [vmem:[%s2655_s8 + $0x3f8] sm:$0xff]  ;;  %5099 = vst [vmem:[#allocation45_spill] sm:$0xff] %v3651_v19 }
 0x110   : > { %1141 = vmatpush.msrb.mxu1 %v3617_v10  ;;  %5097 = vst [vmem:[#allocation39_spill] sm:$0xff] %v3643_v14  ;;  %v3648_v10 = vld [vmem:[%s2655_s8 + $0x258] sm:$0xff] }
 0x111   : > { %v712_v18 = vpop.f32.mrf.mxu2  ;;  %1122 = vmatpush.msrb.mxu0 %v3632_v16  ;;  %5098 = vst [vmem:[#allocation40_spill] sm:$0xff] %v3648_v10  ;;  %v5103_v16 = vld [vmem:[#allocation16_spill] sm:$0xff] }
 0x112   : > { %v732_v17 = vpop.f32.mrf.mxu3  ;;  %741 = vst [vmem:[#allocation2 + $0xc4] sm:$0xf] %v712_v18  ;;  %879 = vmatmul.f32.vlgmr.msrb.gmra.mxu2 %v712_v18  ;;  %1142 = vmatpush.msrb.mxu1 %v3635_v15  ;;  %v3659_v18 = vld [vmem:[%s2655_s8 + $0x3f0] sm:$0xff] }
 0x113   : > { %899 = vmatmul.f32.vlgmr.msrb.gmra.mxu3 %v732_v17  ;;  %742 = vst [vmem:[#allocation2 + $0xe4] sm:$0xf] %v732_v17  ;;  %1159 = vmatpush.msrb.mxu2 %v3640_v56  ;;  %v5102_v17 = vld [vmem:[#allocation14_spill] sm:$0xff]  ;;  %v3664_v15 = vld [vmem:[%s2655_s8 + $0x250] sm:$0xff]  ;;  %v3675_v56 = vld [vmem:[%s2655_s8 + $0x3e8] sm:$0xff] }
 0x114   : > { %1179 = vmatpush.msrb.mxu3 %v3643_v14  ;;  %5100 = vst [vmem:[#allocation46_spill] sm:$0xff] %v3656_v13  ;;  %1055 = vmatmul.f32.vlgmr.msra.gmra.mxu0 %v5102_v17  ;;  %v3672_v14 = vld [vmem:[%s2655_s8 + $0x368] sm:$0xff] }
 0x115   : > { %5101 = vst [vmem:[#allocation43_spill] sm:$0xff] %v3659_v18  ;;  %1075 = vmatmul.f32.vlgmr.msra.gmra.mxu1 %v5103_v16  ;;  %1123 = vmatpush.msrb.mxu0 %v3648_v10  ;;  %v3680_v16 = vld [vmem:[%s2655_s8 + $0x248] sm:$0xff]  ;;  %v3691_v10 = vld [vmem:[%s2655_s8 + $0x3e0] sm:$0xff] }
 0x116   : > { %5104 = vst [vmem:[#allocation44_spill] sm:$0xff] %v3664_v15  ;;  %1143 = vmatpush.msrb.mxu1 %v3651_v19  ;;  %1160 = vmatpush.msrb.mxu2 %v3656_v13  ;;  %v3683_v17 = vld [vmem:[%s2655_s8 + $0x2c8] sm:$0xff]  ;;  %v3688_v19 = vld [vmem:[%s2655_s8 + $0x360] sm:$0xff]  ;;  %v3717_v13 = vld [vmem:[%s2655_s8 + $0x2b8] sm:$0xff] }
 0x117   : > { %5106 = vst [vmem:[#allocation50_spill] sm:$0xff] %v3672_v14  ;;  %1180 = vmatpush.msrb.mxu3 %v3659_v18  ;;  %1124 = vmatpush.msrb.mxu0 %v3664_v15  ;;  %v3698_v18 = vld [vmem:[%s2655_s8 + $0x240] sm:$0xff] }
 0x118   : > { %5107 = vst [vmem:[#allocation47_spill] sm:$0xff] %v3675_v56  ;;  %1144 = vmatpush.msrb.mxu1 %v3667_v55  ;;  %1161 = vmatpush.msrb.mxu2 %v3672_v14  ;;  %v3701_v15 = vld [vmem:[%s2655_s8 + $0x2c0] sm:$0xff]  ;;  %v3706_v55 = vld [vmem:[%s2655_s8 + $0x358] sm:$0xff] }
 0x119   : > { %5108 = vst [vmem:[#allocation48_spill] sm:$0xff] %v3680_v16  ;;  %1181 = vmatpush.msrb.mxu3 %v3675_v56  ;;  %1125 = vmatpush.msrb.mxu0 %v3680_v16  ;;  %v3709_v14 = vld [vmem:[%s2655_s8 + $0x3d8] sm:$0xff]  ;;  %v5116_v56 = vld [vmem:[#allocation19_spill] sm:$0xff]  ;;  %v5117_v16 = vld [vmem:[#allocation22_spill] sm:$0xff] }
 0x11a   : > { %5109 = vst [vmem:[#allocation53_spill] sm:$0xff] %v3683_v17  ;;  %1145 = vmatpush.msrb.mxu1 %v3683_v17  ;;  %1162 = vmatpush.msrb.mxu2 %v3688_v19  ;;  %v3714_v17 = vld [vmem:[%s2655_s8 + $0x238] sm:$0xff] }
 0x11b   : > { %5110 = vst [vmem:[#allocation54_spill] sm:$0xff] %v3688_v19  ;;  %1182 = vmatpush.msrb.mxu3 %v3691_v10  ;;  %1095 = vmatmul.f32.vlgmr.msra.gmra.mxu2 %v5116_v56  ;;  %v3725_v19 = vld [vmem:[%s2655_s8 + $0x3d0] sm:$0xff] }
 0x11c   : > { %5111 = vst [vmem:[#allocation51_spill] sm:$0xff] %v3691_v10  ;;  %1115 = vmatmul.f32.vlgmr.msra.gmra.mxu3 %v5117_v16  ;;  %1126 = vmatpush.msrb.mxu0 %v3698_v18  ;;  %v3722_v10 = vld [vmem:[%s2655_s8 + $0x350] sm:$0xff] }
 0x11d   : > { %5112 = vst [vmem:[#allocation52_spill] sm:$0xff] %v3698_v18  ;;  %1146 = vmatpush.msrb.mxu1 %v3701_v15  ;;  %1163 = vmatpush.msrb.mxu2 %v3706_v55  ;;  %v3730_v16 = vld [vmem:[%s2655_s8 + $0x230] sm:$0xff]  ;;  %v3741_v18 = vld [vmem:[%s2655_s8 + $0x3c8] sm:$0xff] }
 0x11e   : > { %5113 = vst [vmem:[#allocation57_spill] sm:$0xff] %v3701_v15  ;;  %1183 = vmatpush.msrb.mxu3 %v3709_v14  ;;  %v3733_v56 = vld [vmem:[%s2655_s8 + $0x2b0] sm:$0xff]  ;;  %1127 = vmatpush.msrb.mxu0 %v3714_v17  ;;  %v3738_v15 = vld [vmem:[%s2655_s8 + $0x348] sm:$0xff] }
 0x11f   : > { %5114 = vst [vmem:[#allocation58_spill] sm:$0xff] %v3706_v55  ;;  %1147 = vmatpush.msrb.mxu1 %v3717_v13  ;;  %1164 = vmatpush.msrb.mxu2 %v3722_v10  ;;  %v3749_v55 = vld [vmem:[%s2655_s8 + $0x2a8] sm:$0xff] }
 0x120   : > { %5115 = vst [vmem:[#allocation55_spill] sm:$0xff] %v3709_v14  ;;  %1184 = vmatpush.msrb.mxu3 %v3725_v19  ;;  %v3746_v14 = vld [vmem:[%s2655_s8 + $0x228] sm:$0xff]  ;;  %1128 = vmatpush.msrb.mxu0 %v3730_v16 }
 0x121   : > { %5118 = vst [vmem:[#allocation56_spill] sm:$0xff] %v3714_v17  ;;  %1148 = vmatpush.msrb.mxu1 %v3733_v56  ;;  %v3757_v17 = vld [vmem:[%s2655_s8 + $0x3c0] sm:$0xff]  ;;  %1165 = vmatpush.msrb.mxu2 %v3738_v15 }
 0x122   : > { %5119 = vst [vmem:[#allocation61_spill] sm:$0xff] %v3717_v13  ;;  %v3754_v13 = vld [vmem:[%s2655_s8 + $0x340] sm:$0xff]  ;;  %1185 = vmatpush.msrb.mxu3 %v3741_v18  ;;  %1129 = vmatpush.msrb.mxu0 %v3746_v14 }
 0x123   : > { %5120 = vst [vmem:[#allocation62_spill] sm:$0xff] %v3722_v10  ;;  %v3765_v10 = vld [vmem:[%s2655_s8 + $0x2a0] sm:$0xff]  ;;  %1149 = vmatpush.msrb.mxu1 %v3749_v55  ;;  %1166 = vmatpush.msrb.mxu2 %v3754_v13 }
 0x124   : > { %5121 = vst [vmem:[#allocation59_spill] sm:$0xff] %v3725_v19  ;;  %v3762_v19 = vld [vmem:[%s2655_s8 + $0x220] sm:$0xff]  ;;  %1186 = vmatpush.msrb.mxu3 %v3757_v17 }
 0x125   : > { %5122 = vst [vmem:[#allocation60_spill] sm:$0xff] %v3730_v16  ;;  %v3773_v16 = vld [vmem:[%s2655_s8 + $0x3b8] sm:$0xff]  ;;  %1130 = vmatpush.msrb.mxu0 %v3762_v19  ;;  %1150 = vmatpush.msrb.mxu1 %v3765_v10 }
 0x126   : > { %5123 = vst [vmem:[#allocation65_spill] sm:$0xff] %v3733_v56  ;;  %v3770_v56 = vld [vmem:[%s2655_s8 + $0x338] sm:$0xff]  ;;  %1187 = vmatpush.msrb.mxu3 %v3773_v16 }
 0x127   : > { %5124 = vst [vmem:[#allocation66_spill] sm:$0xff] %v3738_v15  ;;  %v3781_v15 = vld [vmem:[%s2655_s8 + $0x298] sm:$0xff]  ;;  %1167 = vmatpush.msrb.mxu2 %v3770_v56 }
 0x128   : > { %5125 = vst [vmem:[#allocation63_spill] sm:$0xff] %v3741_v18  ;;  %v3778_v18 = vld [vmem:[%s2655_s8 + $0x218] sm:$0xff]  ;;  %1151 = vmatpush.msrb.mxu1 %v3781_v15 }
 0x129   : > { %5126 = vst [vmem:[#allocation64_spill] sm:$0xff] %v3746_v14  ;;  %v3789_v14 = vld [vmem:[%s2655_s8 + $0x3b0] sm:$0xff]  ;;  %1131 = vmatpush.msrb.mxu0 %v3778_v18 }
 0x12a   : > { %5127 = vst [vmem:[#allocation69_spill] sm:$0xff] %v3749_v55  ;;  %v3786_v55 = vld [vmem:[%s2655_s8 + $0x330] sm:$0xff]  ;;  %1188 = vmatpush.msrb.mxu3 %v3789_v14 }
 0x12b   : > { %5128 = vst [vmem:[#allocation70_spill] sm:$0xff] %v3754_v13  ;;  %v3797_v13 = vld [vmem:[%s2655_s8 + $0x290] sm:$0xff]  ;;  %1168 = vmatpush.msrb.mxu2 %v3786_v55 }
 0x12c   : > { %5129 = vst [vmem:[#allocation67_spill] sm:$0xff] %v3757_v17  ;;  %v3794_v17 = vld [vmem:[%s2655_s8 + $0x210] sm:$0xff]  ;;  %1152 = vmatpush.msrb.mxu1 %v3797_v13 }
 0x12d   : > { %5130 = vst [vmem:[#allocation68_spill] sm:$0xff] %v3762_v19  ;;  %v3805_v19 = vld [vmem:[%s2655_s8 + $0x3a8] sm:$0xff]  ;;  %1132 = vmatpush.msrb.mxu0 %v3794_v17 }
 0x12e   : > { %5131 = vst [vmem:[#allocation73_spill] sm:$0xff] %v3765_v10  ;;  %v3802_v10 = vld [vmem:[%s2655_s8 + $0x328] sm:$0xff]  ;;  %1189 = vmatpush.msrb.mxu3 %v3805_v19 }
 0x12f   : > { %5132 = vst [vmem:[#allocation74_spill] sm:$0xff] %v3770_v56  ;;  %v3813_v56 = vld [vmem:[%s2655_s8 + $0x288] sm:$0xff]  ;;  %1169 = vmatpush.msrb.mxu2 %v3802_v10 }
 0x130   : > { %5133 = vst [vmem:[#allocation71_spill] sm:$0xff] %v3773_v16  ;;  %v3810_v16 = vld [vmem:[%s2655_s8 + $0x208] sm:$0xff]  ;;  %1153 = vmatpush.msrb.mxu1 %v3813_v56 }
 0x131   : > { %5134 = vst [vmem:[#allocation72_spill] sm:$0xff] %v3778_v18  ;;  %v3821_v18 = vld [vmem:[%s2655_s8 + $0x3a0] sm:$0xff]  ;;  %1133 = vmatpush.msrb.mxu0 %v3810_v16 }
 0x132   : > { %5135 = vst [vmem:[#allocation77_spill] sm:$0xff] %v3781_v15  ;;  %v3818_v15 = vld [vmem:[%s2655_s8 + $0x320] sm:$0xff]  ;;  %1190 = vmatpush.msrb.mxu3 %v3821_v18 }
 0x133   : > { %5136 = vst [vmem:[#allocation78_spill] sm:$0xff] %v3786_v55  ;;  %v3826_v55 = vld [vmem:[%s2655_s8 + $0x200] sm:$0xff]  ;;  %1170 = vmatpush.msrb.mxu2 %v3818_v15 }
 0x134   : > { %5137 = vst [vmem:[#allocation75_spill] sm:$0xff] %v3789_v14  ;;  %v3829_v14 = vld [vmem:[%s2655_s8 + $0x280] sm:$0xff]  ;;  %1134 = vmatpush.msrb.mxu0 %v3826_v55 }
 0x135   : > { %5138 = vst [vmem:[#allocation76_spill] sm:$0xff] %v3794_v17  ;;  %v3837_v17 = vld [vmem:[%s2655_s8 + $0x398] sm:$0xff]  ;;  %1154 = vmatpush.msrb.mxu1 %v3829_v14  ;;  %1135 = vmatmul.f32.vlgmr.msrb.gmra.mxu0 %v3048_v53 }
 0x136   : > { %5139 = vst [vmem:[#allocation81_spill] sm:$0xff] %v3797_v13  ;;  %v3834_v13 = vld [vmem:[%s2655_s8 + $0x318] sm:$0xff]  ;;  %1191 = vmatpush.msrb.mxu3 %v3837_v17  ;;  %1155 = vmatmul.f32.vlgmr.msrb.gmra.mxu1 %v3060_v57 }
 0x137   : > { %5140 = vst [vmem:[#allocation82_spill] sm:$0xff] %v3802_v10  ;;  %v3847_v10 = vld [vmem:[%s2655_s8 + $0x390] sm:$0xff]  ;;  %1171 = vmatpush.msrb.mxu2 %v3834_v13  ;;  %1207 = vmatpush.msra.mxu0 %v3354_v48  ;;  %v5146_v48 = vld [vmem:[#allocation15_spill] sm:$0xff] }
 0x138   : > { %5141 = vst [vmem:[#allocation79_spill] sm:$0xff] %v3805_v19  ;;  %v3844_v19 = vld [vmem:[%s2655_s8 + $0x310] sm:$0xff]  ;;  %1192 = vmatpush.msrb.mxu3 %v3847_v10  ;;  %1227 = vmatpush.msra.mxu1 %v3357_v51 }
 0x139   : > { %5142 = vst [vmem:[#allocation80_spill] sm:$0xff] %v3813_v56  ;;  %v3854_v56 = vld [vmem:[%s2655_s8 + $0x308] sm:$0xff]  ;;  %1172 = vmatpush.msrb.mxu2 %v3844_v19  ;;  %1208 = vmatpush.msra.mxu0 %v3360_v50  ;;  %v5147_v51 = vld [vmem:[#allocation20_spill] sm:$0xff]  ;;  %v5148_v50 = vld [vmem:[#allocation21_spill] sm:$0xff] }
 0x13a   : > { %5143 = vst [vmem:[#allocation85_spill] sm:$0xff] %v3818_v15  ;;  %v3857_v15 = vld [vmem:[%s2655_s8 + $0x388] sm:$0xff]  ;;  %1228 = vmatpush.msra.mxu1 %v3363_v54  ;;  %v5149_v54 = vld [vmem:[#allocation17_spill] sm:$0xff] }
 0x13b   : > { %5144 = vst [vmem:[#allocation83_spill] sm:$0xff] %v3826_v55  ;;  %v3865_v55 = vld [vmem:[%s2655_s8 + $0x380] sm:$0xff]  ;;  %1173 = vmatpush.msrb.mxu2 %v3854_v56  ;;  %1193 = vmatpush.msrb.mxu3 %v3857_v15 }
 0x13c   : > { %5145 = vst [vmem:[#allocation84_spill] sm:$0xff] %v3829_v14  ;;  %v3862_v14 = vld [vmem:[%s2655_s8 + $0x300] sm:$0xff]  ;;  %1209 = vmatpush.msra.mxu0 %v3368_v58  ;;  %1229 = vmatpush.msra.mxu1 %v3371_v59  ;;  %v5151_v59 = vld [vmem:[#allocation25_spill] sm:$0xff] }
 0x13d   : > { %1174 = vmatpush.msrb.mxu2 %v3862_v14  ;;  %1194 = vmatpush.msrb.mxu3 %v3865_v55  ;;  %v5150_v58 = vld [vmem:[#allocation18_spill] sm:$0xff] }
 0x13e   : > { %1175 = vmatmul.f32.vlgmr.msrb.gmra.mxu2 %v3072_v60  ;;  %1195 = vmatmul.f32.vlgmr.msrb.gmra.mxu3 %v3084_v52 }
 0x13f   : > { %1247 = vmatpush.msra.mxu2 %v3384_v20  ;;  %1267 = vmatpush.msra.mxu3 %v3387_v21  ;;  %v5154_v20 = vld [vmem:[#allocation24_spill] sm:$0xff]  ;;  %v5155_v21 = vld [vmem:[#allocation27_spill] sm:$0xff] }
 0x140   : > { %1210 = vmatpush.msra.mxu0 %v3378_v61  ;;  %1230 = vmatpush.msra.mxu1 %v3381_v62  ;;  %v5152_v61 = vld [vmem:[#allocation26_spill] sm:$0xff]  ;;  %v5153_v62 = vld [vmem:[#allocation23_spill] sm:$0xff] }
 0x141   : > { %1248 = vmatpush.msra.mxu2 %v3398_v24  ;;  %1268 = vmatpush.msra.mxu3 %v3401_v25  ;;  %v5158_v24 = vld [vmem:[#allocation30_spill] sm:$0xff]  ;;  %v5159_v25 = vld [vmem:[#allocation33_spill] sm:$0xff] }
 0x142   : > { %1211 = vmatpush.msra.mxu0 %v3390_v22  ;;  %1231 = vmatpush.msra.mxu1 %v3393_v23  ;;  %v5156_v22 = vld [vmem:[#allocation28_spill] sm:$0xff]  ;;  %v5157_v23 = vld [vmem:[#allocation29_spill] sm:$0xff] }
 0x143   : > { %1249 = vmatpush.msra.mxu2 %v3414_v28  ;;  %1269 = vmatpush.msra.mxu3 %v3417_v29  ;;  %v5162_v28 = vld [vmem:[#allocation32_spill] sm:$0xff]  ;;  %v5163_v29 = vld [vmem:[#allocation37_spill] sm:$0xff] }
 0x144   : > { %1212 = vmatpush.msra.mxu0 %v3406_v26  ;;  %1232 = vmatpush.msra.mxu1 %v3409_v27  ;;  %v5160_v26 = vld [vmem:[#allocation34_spill] sm:$0xff]  ;;  %v5161_v27 = vld [vmem:[#allocation31_spill] sm:$0xff] }
 0x145   : > { %1250 = vmatpush.msra.mxu2 %v3430_v32  ;;  %1270 = vmatpush.msra.mxu3 %v3433_v33  ;;  %v5166_v32 = vld [vmem:[#allocation36_spill] sm:$0xff]  ;;  %v5167_v33 = vld [vmem:[#allocation41_spill] sm:$0xff] }
 0x146   : > { %1213 = vmatpush.msra.mxu0 %v3422_v30  ;;  %1233 = vmatpush.msra.mxu1 %v3425_v31  ;;  %v5164_v30 = vld [vmem:[#allocation38_spill] sm:$0xff]  ;;  %v5165_v31 = vld [vmem:[#allocation35_spill] sm:$0xff] }
 0x147   : > { %1251 = vmatpush.msra.mxu2 %v3446_v36  ;;  %1271 = vmatpush.msra.mxu3 %v3449_v37  ;;  %v5170_v36 = vld [vmem:[#allocation40_spill] sm:$0xff]  ;;  %v5171_v37 = vld [vmem:[#allocation45_spill] sm:$0xff] }
 0x148   : > { %1214 = vmatpush.msra.mxu0 %v3438_v34  ;;  %1234 = vmatpush.msra.mxu1 %v3441_v35  ;;  %v5168_v34 = vld [vmem:[#allocation42_spill] sm:$0xff]  ;;  %v5169_v35 = vld [vmem:[#allocation39_spill] sm:$0xff] }
 0x149   : > { %1252 = vmatpush.msra.mxu2 %v3462_v40  ;;  %1272 = vmatpush.msra.mxu3 %v3465_v41  ;;  %v5174_v40 = vld [vmem:[#allocation44_spill] sm:$0xff]  ;;  %v5175_v41 = vld [vmem:[#allocation49_spill] sm:$0xff] }
 0x14a   : > { %1215 = vmatpush.msra.mxu0 %v3454_v38  ;;  %1235 = vmatpush.msra.mxu1 %v3457_v39  ;;  %v5172_v38 = vld [vmem:[#allocation46_spill] sm:$0xff]  ;;  %v5173_v39 = vld [vmem:[#allocation43_spill] sm:$0xff] }
 0x14b   : > { %1253 = vmatpush.msra.mxu2 %v3478_v44  ;;  %1273 = vmatpush.msra.mxu3 %v3481_v45  ;;  %v5178_v44 = vld [vmem:[#allocation48_spill] sm:$0xff]  ;;  %v5179_v45 = vld [vmem:[#allocation53_spill] sm:$0xff] }
 0x14c   : > { %1216 = vmatpush.msra.mxu0 %v3470_v42  ;;  %1236 = vmatpush.msra.mxu1 %v3473_v43  ;;  %v5176_v42 = vld [vmem:[#allocation50_spill] sm:$0xff]  ;;  %v5177_v43 = vld [vmem:[#allocation47_spill] sm:$0xff] }
 0x14d   : > { %1254 = vmatpush.msra.mxu2 %v3494_v49  ;;  %1274 = vmatpush.msra.mxu3 %v3497_v0  ;;  %v5182_v49 = vld [vmem:[#allocation52_spill] sm:$0xff]  ;;  %v5183_v0 = vld [vmem:[#allocation57_spill] sm:$0xff] }
 0x14e   : > { %1217 = vmatpush.msra.mxu0 %v3486_v46  ;;  %1237 = vmatpush.msra.mxu1 %v3489_v47  ;;  %v5180_v46 = vld [vmem:[#allocation54_spill] sm:$0xff]  ;;  %v5181_v47 = vld [vmem:[#allocation51_spill] sm:$0xff] }
 0x14f   : > { %1255 = vmatpush.msra.mxu2 %v3510_v3  ;;  %1275 = vmatpush.msra.mxu3 %v3513_v4  ;;  %v5186_v3 = vld [vmem:[#allocation56_spill] sm:$0xff]  ;;  %v5187_v4 = vld [vmem:[#allocation61_spill] sm:$0xff] }
 0x150   : > { %1218 = vmatpush.msra.mxu0 %v3502_v1  ;;  %1238 = vmatpush.msra.mxu1 %v3505_v2  ;;  %v5184_v1 = vld [vmem:[#allocation58_spill] sm:$0xff]  ;;  %v5185_v2 = vld [vmem:[#allocation55_spill] sm:$0xff] }
 0x151   : > { %1256 = vmatpush.msra.mxu2 %v3526_v7  ;;  %1276 = vmatpush.msra.mxu3 %v3529_v8  ;;  %v5190_v7 = vld [vmem:[#allocation60_spill] sm:$0xff]  ;;  %v5191_v8 = vld [vmem:[#allocation65_spill] sm:$0xff] }
 0x152   : > { %1219 = vmatpush.msra.mxu0 %v3518_v5  ;;  %1239 = vmatpush.msra.mxu1 %v3521_v6  ;;  %v5188_v5 = vld [vmem:[#allocation62_spill] sm:$0xff]  ;;  %v5189_v6 = vld [vmem:[#allocation59_spill] sm:$0xff] }
 0x153   : > { %1257 = vmatpush.msra.mxu2 %v3542_v11  ;;  %1277 = vmatpush.msra.mxu3 %v3545_v12  ;;  %v5193_v11 = vld [vmem:[#allocation63_spill] sm:$0xff]  ;;  %v5194_v12 = vld [vmem:[#allocation64_spill] sm:$0xff] }
 0x154   : > { %1220 = vmatpush.msra.mxu0 %v3534_v9  ;;  %1240 = vmatpush.msra.mxu1 %v5146_v48  ;;  %v5192_v9 = vld [vmem:[#allocation66_spill] sm:$0xff]  ;;  %v760_v48 = vpop.f32.mrf.mxu0 }
 0x155   : > { %1258 = vmatpush.msra.mxu2 %v5147_v51  ;;  %1278 = vmatpush.msra.mxu3 %v5148_v50  ;;  %v5196_v51 = vld [vmem:[#allocation70_spill] sm:$0xff]  ;;  %v5197_v50 = vld [vmem:[#allocation67_spill] sm:$0xff]  ;;  %903 = vst [vmem:[#allocation2 + $0x8] sm:$0xf] %v760_v48  ;;  %v4121_v48 = vld [vmem:[%s4002_s20 + $0x158] sm:$0xff] }
 0x156   : > { %1221 = vmatpush.msra.mxu0 %v5149_v54  ;;  %1241 = vmatpush.msra.mxu1 %v5150_v58  ;;  %v780_v54 = vpop.f32.mrf.mxu1  ;;  %v5198_v58 = vld [vmem:[#allocation68_spill] sm:$0xff] }
 0x157   : > { %1259 = vmatpush.msra.mxu2 %v5151_v59  ;;  %1279 = vmatpush.msra.mxu3 %v5152_v61  ;;  %v5199_v59 = vld [vmem:[#allocation73_spill] sm:$0xff]  ;;  %904 = vst [vmem:[#allocation2 + $0x28] sm:$0xf] %v780_v54  ;;  %v5200_v61 = vld [vmem:[#allocation74_spill] sm:$0xff] }
 0x158   : > { %1222 = vmatpush.msra.mxu0 %v5153_v62  ;;  %1242 = vmatpush.msra.mxu1 %v5154_v20  ;;  %v5201_v62 = vld [vmem:[#allocation71_spill] sm:$0xff]  ;;  %v5202_v20 = vld [vmem:[#allocation72_spill] sm:$0xff]  ;;  %v4132_v54 = vld [vmem:[%s4002_s20 + $0xa0] sm:$0xff] }
 0x159   : > { %1260 = vmatpush.msra.mxu2 %v5156_v22  ;;  %1280 = vmatpush.msra.mxu3 %v5157_v23  ;;  %v5204_v22 = vld [vmem:[#allocation78_spill] sm:$0xff]  ;;  %v5205_v23 = vld [vmem:[#allocation75_spill] sm:$0xff] }
 0x15a   : > { %1287 = vmatpush.msrb.mxu0 %v3584_v63  ;;  %1307 = vmatpush.msrb.mxu1 %v5155_v21  ;;  %v5195_v63 = vld [vmem:[#allocation69_spill] sm:$0xff] }
 0x15b   : > { %1261 = vmatpush.msra.mxu2 %v5160_v26  ;;  %1281 = vmatpush.msra.mxu3 %v5161_v27  ;;  %v5203_v21 = vld [vmem:[#allocation77_spill] sm:$0xff]  ;;  %v5208_v26 = vld [vmem:[#allocation82_spill] sm:$0xff]  ;;  %v5209_v27 = vld [vmem:[#allocation79_spill] sm:$0xff] }
 0x15c   : > { %1288 = vmatpush.msrb.mxu0 %v5158_v24  ;;  %1308 = vmatpush.msrb.mxu1 %v5159_v25  ;;  %v5206_v24 = vld [vmem:[#allocation76_spill] sm:$0xff]  ;;  %v5207_v25 = vld [vmem:[#allocation81_spill] sm:$0xff] }
 0x15d   : > { %1262 = vmatpush.msra.mxu2 %v5164_v30  ;;  %1282 = vmatpush.msra.mxu3 %v5165_v31  ;;  %v5212_v30 = vld [vmem:[#allocation83_spill] sm:$0xff]  ;;  %v5213_v31 = vld [vmem:[#allocation84_spill] sm:$0xff] }
 0x15e   : > { %1289 = vmatpush.msrb.mxu0 %v5162_v28  ;;  %1309 = vmatpush.msrb.mxu1 %v5163_v29  ;;  %v5210_v28 = vld [vmem:[#allocation80_spill] sm:$0xff]  ;;  %v5211_v29 = vld [vmem:[#allocation85_spill] sm:$0xff] }
 0x15f   : > { %1327 = vmatpush.msrb.mxu2 %v5168_v34  ;;  %1347 = vmatpush.msrb.mxu3 %v5169_v35  ;;  %v4019_v34 = vld [vmem:[%s4002_s20 + $0x68] sm:$0xff] }
 0x160   : > { %1290 = vmatpush.msrb.mxu0 %v5166_v32  ;;  %1310 = vmatpush.msrb.mxu1 %v5167_v33  ;;  %v820_v32 = vpop.f32.mrf.mxu3  ;;  %v4022_v35 = vld [vmem:[%s4002_s20 + $0xe8] sm:$0xff] }
 0x161   : > { %1328 = vmatpush.msrb.mxu2 %v5172_v38  ;;  %1348 = vmatpush.msrb.mxu3 %v5173_v39  ;;  %906 = vst [vmem:[#allocation2 + $0x68] sm:$0xf] %v820_v32  ;;  %v4035_v38 = vld [vmem:[%s4002_s20 + $0x58] sm:$0xff]  ;;  %v4196_v32 = vld [vmem:[%s4002_s20 + $0x80] sm:$0xff] }
 0x162   : > { %1291 = vmatpush.msrb.mxu0 %v5170_v36  ;;  %1311 = vmatpush.msrb.mxu1 %v5171_v37  ;;  %v4027_v36 = vld [vmem:[%s4002_s20 + $0x60] sm:$0xff]  ;;  %v4038_v39 = vld [vmem:[%s4002_s20 + $0xd8] sm:$0xff]  ;;  %5215 = vst [vmem:[#allocation20_spill] sm:$0xff] %v4196_v32 }
 0x163   : > { %1329 = vmatpush.msrb.mxu2 %v5176_v42  ;;  %1349 = vmatpush.msrb.mxu3 %v5177_v43  ;;  %v4030_v37 = vld [vmem:[%s4002_s20 + $0xe0] sm:$0xff]  ;;  %v4053_v42 = vld [vmem:[%s4002_s20 + $0x48] sm:$0xff] }
 0x164   : > { %1292 = vmatpush.msrb.mxu0 %v5174_v40  ;;  %1312 = vmatpush.msrb.mxu1 %v5175_v41  ;;  %v4043_v40 = vld [vmem:[%s4002_s20 + $0x50] sm:$0xff]  ;;  %v4056_v43 = vld [vmem:[%s4002_s20 + $0xc8] sm:$0xff] }
 0x165   : > { %1330 = vmatpush.msrb.mxu2 %v5180_v46  ;;  %1350 = vmatpush.msrb.mxu3 %v5181_v47  ;;  %v4046_v41 = vld [vmem:[%s4002_s20 + $0xd0] sm:$0xff]  ;;  %v4059_v46 = vld [vmem:[%s4002_s20 + $0x178] sm:$0xff] }
 0x166   : > { %1293 = vmatpush.msrb.mxu0 %v5178_v44  ;;  %1313 = vmatpush.msrb.mxu1 %v5179_v45  ;;  %v4062_v47 = vld [vmem:[%s4002_s20 + $0x1f8] sm:$0xff] }
 0x167   : > { %1331 = vmatpush.msrb.mxu2 %v5184_v1  ;;  %1351 = vmatpush.msrb.mxu3 %v5185_v2  ;;  %v4073_v1 = vld [vmem:[%s4002_s20 + $0x170] sm:$0xff] }
 0x168   : > { %1294 = vmatpush.msrb.mxu0 %v5182_v49  ;;  %1314 = vmatpush.msrb.mxu1 %v5183_v0  ;;  %v4065_v49 = vld [vmem:[%s4002_s20 + $0x40] sm:$0xff]  ;;  %v4076_v2 = vld [vmem:[%s4002_s20 + $0x1f0] sm:$0xff] }
 0x169   : > { %1332 = vmatpush.msrb.mxu2 %v5188_v5  ;;  %1352 = vmatpush.msrb.mxu3 %v5189_v6  ;;  %v4068_v0 = vld [vmem:[%s4002_s20 + $0xc0] sm:$0xff]  ;;  %v4089_v5 = vld [vmem:[%s4002_s20 + $0x168] sm:$0xff] }
 0x16a   : > { %1295 = vmatpush.msrb.mxu0 %v5186_v3  ;;  %1315 = vmatpush.msrb.mxu1 %v5187_v4  ;;  %v4081_v3 = vld [vmem:[%s4002_s20 + $0x38] sm:$0xff]  ;;  %v4092_v6 = vld [vmem:[%s4002_s20 + $0x1e8] sm:$0xff] }
 0x16b   : > { %1333 = vmatpush.msrb.mxu2 %v5192_v9  ;;  %1353 = vmatpush.msrb.mxu3 %v5193_v11  ;;  %v4084_v4 = vld [vmem:[%s4002_s20 + $0xb8] sm:$0xff]  ;;  %v4105_v9 = vld [vmem:[%s4002_s20 + $0x160] sm:$0xff] }
 0x16c   : > { %1296 = vmatpush.msrb.mxu0 %v5190_v7  ;;  %1316 = vmatpush.msrb.mxu1 %v5191_v8  ;;  %v4097_v7 = vld [vmem:[%s4002_s20 + $0x30] sm:$0xff]  ;;  %v4108_v11 = vld [vmem:[%s4002_s20 + $0x1e0] sm:$0xff] }
 0x16d   : > { %1334 = vmatpush.msrb.mxu2 %v5196_v51  ;;  %1354 = vmatpush.msrb.mxu3 %v5197_v50  ;;  %v4100_v8 = vld [vmem:[%s4002_s20 + $0xb0] sm:$0xff]  ;;  %v4124_v51 = vld [vmem:[%s4002_s20 + $0x1d8] sm:$0xff]  ;;  %v4129_v50 = vld [vmem:[%s4002_s20 + $0x20] sm:$0xff] }
 0x16e   : > { %1297 = vmatpush.msrb.mxu0 %v5194_v12  ;;  %1317 = vmatpush.msrb.mxu1 %v5195_v63  ;;  %v4113_v12 = vld [vmem:[%s4002_s20 + $0x28] sm:$0xff] }
 0x16f   : > { %1335 = vmatpush.msrb.mxu2 %v5200_v61  ;;  %1355 = vmatpush.msrb.mxu3 %v5201_v62  ;;  %v4116_v63 = vld [vmem:[%s4002_s20 + $0xa8] sm:$0xff]  ;;  %v4147_v61 = vld [vmem:[%s4002_s20 + $0x18] sm:$0xff] }
 0x170   : > { %1298 = vmatpush.msrb.mxu0 %v5198_v58  ;;  %1318 = vmatpush.msrb.mxu1 %v5199_v59  ;;  %v4137_v58 = vld [vmem:[%s4002_s20 + $0x150] sm:$0xff]  ;;  %v4150_v62 = vld [vmem:[%s4002_s20 + $0x98] sm:$0xff] }
 0x171   : > { %1336 = vmatpush.msrb.mxu2 %v5204_v22  ;;  %1356 = vmatpush.msrb.mxu3 %v5205_v23  ;;  %v4140_v59 = vld [vmem:[%s4002_s20 + $0x1d0] sm:$0xff]  ;;  %v4155_v22 = vld [vmem:[%s4002_s20 + $0x148] sm:$0xff] }
 0x172   : > { %1299 = vmatpush.msrb.mxu0 %v5202_v20  ;;  %1319 = vmatpush.msrb.mxu1 %v5203_v21  ;;  %v4158_v23 = vld [vmem:[%s4002_s20 + $0x1c8] sm:$0xff] }
 0x173   : > { %1337 = vmatpush.msrb.mxu2 %v5208_v26  ;;  %1357 = vmatpush.msrb.mxu3 %v5209_v27  ;;  %v4169_v26 = vld [vmem:[%s4002_s20 + $0x140] sm:$0xff] }
 0x174   : > { %1300 = vmatpush.msrb.mxu0 %v5206_v24  ;;  %1320 = vmatpush.msrb.mxu1 %v5207_v25  ;;  %v4161_v24 = vld [vmem:[%s4002_s20 + $0x10] sm:$0xff]  ;;  %v4172_v27 = vld [vmem:[%s4002_s20 + $0x1c0] sm:$0xff] }
 0x175   : > { %1338 = vmatpush.msrb.mxu2 %v5211_v29  ;;  %1358 = vmatpush.msrb.mxu3 %v3821_v18  ;;  %v4164_v25 = vld [vmem:[%s4002_s20 + $0x90] sm:$0xff]  ;;  %v4180_v29 = vld [vmem:[%s4002_s20 + $0x88] sm:$0xff] }
 0x176   : > { %1301 = vmatpush.msrb.mxu0 %v3810_v16  ;;  %1321 = vmatpush.msrb.mxu1 %v5210_v28  ;;  %v800_v16 = vpop.f32.mrf.mxu2  ;;  %v4177_v28 = vld [vmem:[%s4002_s20 + $0x8] sm:$0xff] }
 0x177   : > { %1339 = vmatpush.msrb.mxu2 %v3834_v13  ;;  %1359 = vmatpush.msrb.mxu3 %v3837_v17  ;;  %905 = vst [vmem:[#allocation2 + $0x48] sm:$0xf] %v800_v16  ;;  %v4193_v16 = vld [vmem:[%s4002_s20] sm:$0xff] }
 0x178   : > { %1302 = vmatpush.msrb.mxu0 %v5212_v30  ;;  %1322 = vmatpush.msrb.mxu1 %v5213_v31  ;;  %v4185_v30 = vld [vmem:[%s4002_s20 + $0x138] sm:$0xff]  ;;  %5214 = vst [vmem:[#allocation15_spill] sm:$0xff] %v4193_v16 }
 0x179   : > { %1340 = vmatpush.msrb.mxu2 %v3844_v19  ;;  %1360 = vmatpush.msrb.mxu3 %v3847_v10  ;;  %v4005_v10 = vld [vmem:[%s4002_s20 + $0x78] sm:$0xff] }
 0x17a   : > { %v4188_v31 = vld [vmem:[%s4002_s20 + $0x1b8] sm:$0xff] }
 0x17b   : > { %1341 = vmatpush.msrb.mxu2 %v3854_v56  ;;  %1361 = vmatpush.msrb.mxu3 %v3857_v15  ;;  %v4008_v15 = vld [vmem:[%s4002_s20 + $0xf8] sm:$0xff] }
 0x17d   : > { %1342 = vmatpush.msrb.mxu2 %v3862_v14  ;;  %1362 = vmatpush.msrb.mxu3 %v3865_v55  ;;  %v4011_v55 = vld [vmem:[%s4002_s20 + $0x70] sm:$0xff] }
 0x17e   : > { %v4014_v14 = vld [vmem:[%s4002_s20 + $0xf0] sm:$0xff] }
 0x187   : > { %v840_v13 = vpop.f32.mrf.mxu0 }
 0x188   : > { %v860_v18 = vpop.f32.mrf.mxu1  ;;  %907 = vst [vmem:[#allocation2 + $0x88] sm:$0xf] %v840_v13  ;;  %v4201_v13 = vld [vmem:[%s4002_s20 + $0x130] sm:$0xff] }
 0x189   : > { %908 = vst [vmem:[#allocation2 + $0xa8] sm:$0xf] %v860_v18  ;;  %v4204_v18 = vld [vmem:[%s4002_s20 + $0x1b0] sm:$0xff] }
 0x191   : > { %v1056_v56 = vpop.f32.mrf.mxu0 }
 0x192   : > { %v1076_v19 = vpop.f32.mrf.mxu1  ;;  %1199 = vst [vmem:[#allocation2 + $0xc] sm:$0xf] %v1056_v56  ;;  %1223 = vmatmul.f32.vlgmr.msra.gmra.mxu0 %v1056_v56  ;;  %v4211_v56 = vld [vmem:[%s4002_s20 + $0x278] sm:$0xff] }
 0x193   : > { %1243 = vmatmul.f32.vlgmr.msra.gmra.mxu1 %v1076_v19  ;;  %1200 = vst [vmem:[#allocation2 + $0x2c] sm:$0xf] %v1076_v19  ;;  %1503 = vmatpush.msra.mxu0 %v4005_v10  ;;  %v4214_v19 = vld [vmem:[%s4002_s20 + $0x2f8] sm:$0xff] }
 0x194   : > { %1523 = vmatpush.msra.mxu1 %v4008_v15  ;;  %5216 = vst [vmem:[#allocation21_spill] sm:$0xff] %v4211_v56 }
 0x195   : > { %v880_v17 = vpop.f32.mrf.mxu2  ;;  %1504 = vmatpush.msra.mxu0 %v4011_v55  ;;  %5217 = vst [vmem:[#allocation17_spill] sm:$0xff] %v4214_v19 }
 0x196   : > { %v900_v33 = vpop.f32.mrf.mxu3  ;;  %1524 = vmatpush.msra.mxu1 %v4014_v14  ;;  %909 = vst [vmem:[#allocation2 + $0xc8] sm:$0xf] %v880_v17  ;;  %v4219_v17 = vld [vmem:[%s4002_s20 + $0x128] sm:$0xff] }
 0x197   : > { %910 = vst [vmem:[#allocation2 + $0xe8] sm:$0xf] %v900_v33  ;;  %1505 = vmatpush.msra.mxu0 %v4019_v34  ;;  %v4222_v33 = vld [vmem:[%s4002_s20 + $0x1a8] sm:$0xff] }
 0x198   : > { %1525 = vmatpush.msra.mxu1 %v4022_v35  ;;  %5218 = vst [vmem:[#allocation18_spill] sm:$0xff] %v4219_v17 }
 0x199   : > { %1506 = vmatpush.msra.mxu0 %v4027_v36  ;;  %5219 = vst [vmem:[#allocation25_spill] sm:$0xff] %v4222_v33 }
 0x19a   : > { %1526 = vmatpush.msra.mxu1 %v4030_v37 }
 0x19b   : > { %1507 = vmatpush.msra.mxu0 %v4035_v38 }
 0x19c   : > { %1527 = vmatpush.msra.mxu1 %v4038_v39 }
 0x19d   : > { %1508 = vmatpush.msra.mxu0 %v4043_v40 }
 0x19e   : > { %1528 = vmatpush.msra.mxu1 %v4046_v41  ;;  %v1096_v44 = vpop.f32.mrf.mxu2 }
 0x19f   : > { %v1116_v45 = vpop.f32.mrf.mxu3  ;;  %1201 = vst [vmem:[#allocation2 + $0x4c] sm:$0xf] %v1096_v44  ;;  %1263 = vmatmul.f32.vlgmr.msra.gmra.mxu2 %v1096_v44  ;;  %1509 = vmatpush.msra.mxu0 %v4053_v42  ;;  %v5220_v44 = vld [vmem:[#allocation14_spill] sm:$0xff] }
 0x1a0   : > { %1283 = vmatmul.f32.vlgmr.msra.gmra.mxu3 %v1116_v45  ;;  %1202 = vst [vmem:[#allocation2 + $0x6c] sm:$0xf] %v1116_v45  ;;  %1529 = vmatpush.msra.mxu1 %v4056_v43  ;;  %v5221_v45 = vld [vmem:[#allocation16_spill] sm:$0xff] }
 0x1a1   : > { %1543 = vmatpush.msra.mxu2 %v4059_v46  ;;  %1563 = vmatpush.msra.mxu3 %v4062_v47 }
 0x1a2   : > { %1510 = vmatpush.msra.mxu0 %v4065_v49  ;;  %1530 = vmatpush.msra.mxu1 %v4068_v0 }
 0x1a3   : > { %1544 = vmatpush.msra.mxu2 %v4073_v1  ;;  %1564 = vmatpush.msra.mxu3 %v4076_v2 }
 0x1a4   : > { %1511 = vmatpush.msra.mxu0 %v4081_v3  ;;  %1531 = vmatpush.msra.mxu1 %v4084_v4 }
 0x1a5   : > { %1545 = vmatpush.msra.mxu2 %v4089_v5  ;;  %1565 = vmatpush.msra.mxu3 %v4092_v6 }
 0x1a6   : > { %1512 = vmatpush.msra.mxu0 %v4097_v7  ;;  %1532 = vmatpush.msra.mxu1 %v4100_v8 }
 0x1a7   : > { %1546 = vmatpush.msra.mxu2 %v4105_v9  ;;  %1566 = vmatpush.msra.mxu3 %v4108_v11 }
 0x1a8   : > { %1513 = vmatpush.msra.mxu0 %v4113_v12  ;;  %1533 = vmatpush.msra.mxu1 %v4116_v63 }
 0x1a9   : > { %1547 = vmatpush.msra.mxu2 %v4121_v48  ;;  %1567 = vmatpush.msra.mxu3 %v4124_v51 }
 0x1aa   : > { %1514 = vmatpush.msra.mxu0 %v4129_v50  ;;  %1534 = vmatpush.msra.mxu1 %v4132_v54 }
 0x1ab   : > { %1548 = vmatpush.msra.mxu2 %v4137_v58  ;;  %1568 = vmatpush.msra.mxu3 %v4140_v59 }
 0x1ac   : > { %1515 = vmatpush.msra.mxu0 %v4147_v61  ;;  %1535 = vmatpush.msra.mxu1 %v4150_v62 }
 0x1ad   : > { %1549 = vmatpush.msra.mxu2 %v4155_v22  ;;  %1569 = vmatpush.msra.mxu3 %v4158_v23 }
 0x1ae   : > { %1516 = vmatpush.msra.mxu0 %v4161_v24  ;;  %1536 = vmatpush.msra.mxu1 %v4164_v25 }
 0x1af   : > { %1550 = vmatpush.msra.mxu2 %v4169_v26  ;;  %1570 = vmatpush.msra.mxu3 %v4172_v27 }
 0x1b0   : > { %1517 = vmatpush.msra.mxu0 %v4177_v28  ;;  %1537 = vmatpush.msra.mxu1 %v4180_v29 }
 0x1b1   : > { %1551 = vmatpush.msra.mxu2 %v4185_v30  ;;  %1571 = vmatpush.msra.mxu3 %v4188_v31 }
 0x1b2   : > { %v1136_v20 = vpop.f32.mrf.mxu0  ;;  %1518 = vmatpush.msra.mxu0 %v4193_v16  ;;  %1538 = vmatpush.msra.mxu1 %v4196_v32  ;;  %v4235_v32 = vld [vmem:[%s4002_s20 + $0x120] sm:$0xff] }
 0x1b3   : > { %v1156_v21 = vpop.f32.mrf.mxu1  ;;  %1203 = vst [vmem:[#allocation2 + $0x8c] sm:$0xf] %v1136_v20  ;;  %1303 = vmatmul.f32.vlgmr.msrb.gmra.mxu0 %v1136_v20  ;;  %1552 = vmatpush.msra.mxu2 %v4201_v13  ;;  %v4227_v20 = vld [vmem:[%s4002_s20 + $0x270] sm:$0xff]  ;;  %v4238_v16 = vld [vmem:[%s4002_s20 + $0x1a0] sm:$0xff] }
 0x1b4   : > { %1323 = vmatmul.f32.vlgmr.msrb.gmra.mxu1 %v1156_v21  ;;  %1204 = vst [vmem:[#allocation2 + $0xac] sm:$0xf] %v1156_v21  ;;  %1572 = vmatpush.msra.mxu3 %v4204_v18  ;;  %v4230_v21 = vld [vmem:[%s4002_s20 + $0x2f0] sm:$0xff] }
 0x1b5   : > { %5222 = vst [vmem:[#allocation26_spill] sm:$0xff] %v4227_v20  ;;  %1583 = vmatpush.msrb.mxu0 %v4211_v56  ;;  %1603 = vmatpush.msrb.mxu1 %v4214_v19  ;;  %v4245_v19 = vld [vmem:[%s4002_s20 + $0x268] sm:$0xff] }
 0x1b6   : > { %5223 = vst [vmem:[#allocation23_spill] sm:$0xff] %v4230_v21  ;;  %1553 = vmatpush.msra.mxu2 %v4219_v17  ;;  %1573 = vmatpush.msra.mxu3 %v4222_v33  ;;  %v4248_v56 = vld [vmem:[%s4002_s20 + $0x2e8] sm:$0xff]  ;;  %v4253_v33 = vld [vmem:[%s4002_s20 + $0x118] sm:$0xff]  ;;  %v4262_v17 = vld [vmem:[%s4002_s20 + $0x2e0] sm:$0xff] }
 0x1b7   : > { %5224 = vst [vmem:[#allocation24_spill] sm:$0xff] %v4235_v32  ;;  %1584 = vmatpush.msrb.mxu0 %v4227_v20  ;;  %1604 = vmatpush.msrb.mxu1 %v4230_v21  ;;  %v4256_v20 = vld [vmem:[%s4002_s20 + $0x198] sm:$0xff]  ;;  %v4259_v21 = vld [vmem:[%s4002_s20 + $0x260] sm:$0xff] }
 0x1b8   : > { %5225 = vst [vmem:[#allocation27_spill] sm:$0xff] %v4238_v16  ;;  %1554 = vmatpush.msra.mxu2 %v4235_v32  ;;  %1574 = vmatpush.msra.mxu3 %v4238_v16  ;;  %v4267_v32 = vld [vmem:[%s4002_s20 + $0x110] sm:$0xff] }
 0x1b9   : > { %5226 = vst [vmem:[#allocation28_spill] sm:$0xff] %v4245_v19  ;;  %1585 = vmatpush.msrb.mxu0 %v4245_v19  ;;  %1605 = vmatpush.msrb.mxu1 %v4248_v56  ;;  %v4270_v16 = vld [vmem:[%s4002_s20 + $0x190] sm:$0xff]  ;;  %v4286_v19 = vld [vmem:[%s4002_s20 + $0x188] sm:$0xff] }
 0x1ba   : > { %5227 = vst [vmem:[#allocation29_spill] sm:$0xff] %v4248_v56  ;;  %1555 = vmatpush.msra.mxu2 %v4253_v33  ;;  %1575 = vmatpush.msra.mxu3 %v4256_v20  ;;  %v4283_v56 = vld [vmem:[%s4002_s20 + $0x108] sm:$0xff] }
 0x1bb   : > { %1519 = vmatmul.f32.vlgmr.msra.gmra.mxu0 %v5220_v44  ;;  %5228 = vst [vmem:[#allocation30_spill] sm:$0xff] %v4253_v33  ;;  %1606 = vmatpush.msrb.mxu1 %v4262_v17  ;;  %v4294_v33 = vld [vmem:[%s4002_s20 + $0x2d0] sm:$0xff] }
 0x1bc   : > { %1539 = vmatmul.f32.vlgmr.msra.gmra.mxu1 %v5221_v45  ;;  %5229 = vst [vmem:[#allocation33_spill] sm:$0xff] %v4256_v20  ;;  %1586 = vmatpush.msrb.mxu0 %v4259_v21  ;;  %v4291_v20 = vld [vmem:[%s4002_s20 + $0x250] sm:$0xff] }
 0x1bd   : > { %5230 = vst [vmem:[#allocation34_spill] sm:$0xff] %v4259_v21  ;;  %1556 = vmatpush.msra.mxu2 %v4267_v32  ;;  %1576 = vmatpush.msra.mxu3 %v4270_v16  ;;  %v4302_v21 = vld [vmem:[%s4002_s20 + $0x180] sm:$0xff] }
 0x1be   : > { %5231 = vst [vmem:[#allocation31_spill] sm:$0xff] %v4262_v17  ;;  %v4299_v17 = vld [vmem:[%s4002_s20 + $0x100] sm:$0xff] }
 0x1bf   : > { %5232 = vst [vmem:[#allocation32_spill] sm:$0xff] %v4267_v32  ;;  %1557 = vmatpush.msra.mxu2 %v4283_v56  ;;  %1577 = vmatpush.msra.mxu3 %v4286_v19  ;;  %v4328_v32 = vld [vmem:[%s4002_s20 + $0x2c0] sm:$0xff] }
 0x1c0   : > { %5233 = vst [vmem:[#allocation37_spill] sm:$0xff] %v4270_v16  ;;  %v4309_v16 = vld [vmem:[%s4002_s20 + $0x248] sm:$0xff] }
 0x1c1   : > { %v1176_v44 = vpop.f32.mrf.mxu2  ;;  %v1196_v45 = vpop.f32.mrf.mxu3  ;;  %5236 = vst [vmem:[#allocation36_spill] sm:$0xff] %v4283_v56  ;;  %1558 = vmatpush.msra.mxu2 %v4299_v17  ;;  %1578 = vmatpush.msra.mxu3 %v4302_v21  ;;  %v4320_v56 = vld [vmem:[%s4002_s20 + $0x3f8] sm:$0xff] }
 0x1c2   : > { %1205 = vst [vmem:[#allocation2 + $0xcc] sm:$0xf] %v1176_v44  ;;  %1343 = vmatmul.f32.vlgmr.msrb.gmra.mxu2 %v1176_v44  ;;  %1363 = vmatmul.f32.vlgmr.msrb.gmra.mxu3 %v1196_v45  ;;  %v4275_v44 = vld [vmem:[%s4002_s20 + $0x258] sm:$0xff] }
 0x1c3   : > { %1206 = vst [vmem:[#allocation2 + $0xec] sm:$0xf] %v1196_v45  ;;  %v4278_v45 = vld [vmem:[%s4002_s20 + $0x2d8] sm:$0xff]  ;;  %1587 = vmatpush.msrb.mxu0 %v4275_v44  ;;  %1643 = vmatpush.msrb.mxu3 %v4320_v56 }
 0x1c4   : > { %5234 = vst [vmem:[#allocation38_spill] sm:$0xff] %v4275_v44  ;;  %1607 = vmatpush.msrb.mxu1 %v4278_v45  ;;  %v4312_v44 = vld [vmem:[%s4002_s20 + $0x2c8] sm:$0xff] }
 0x1c5   : > { %5235 = vst [vmem:[#allocation35_spill] sm:$0xff] %v4278_v45  ;;  %1588 = vmatpush.msrb.mxu0 %v4291_v20  ;;  %v4317_v45 = vld [vmem:[%s4002_s20 + $0x378] sm:$0xff] }
 0x1c6   : > { %5237 = vst [vmem:[#allocation41_spill] sm:$0xff] %v4286_v19  ;;  %1608 = vmatpush.msrb.mxu1 %v4294_v33  ;;  %v5246_v19 = vld [vmem:[#allocation19_spill] sm:$0xff]  ;;  %1623 = vmatpush.msrb.mxu2 %v4317_v45 }
 0x1c7   : > { %5238 = vst [vmem:[#allocation42_spill] sm:$0xff] %v4291_v20  ;;  %v5247_v20 = vld [vmem:[#allocation22_spill] sm:$0xff]  ;;  %1589 = vmatpush.msrb.mxu0 %v4309_v16 }
 0x1c8   : > { %5239 = vst [vmem:[#allocation39_spill] sm:$0xff] %v4294_v33  ;;  %v4325_v33 = vld [vmem:[%s4002_s20 + $0x240] sm:$0xff]  ;;  %1609 = vmatpush.msrb.mxu1 %v4312_v44 }
 0x1c9   : > { %5240 = vst [vmem:[#allocation40_spill] sm:$0xff] %v4299_v17  ;;  %v4336_v17 = vld [vmem:[%s4002_s20 + $0x3f0] sm:$0xff]  ;;  %1590 = vmatpush.msrb.mxu0 %v4325_v33 }
 0x1ca   : > { %5241 = vst [vmem:[#allocation45_spill] sm:$0xff] %v4302_v21  ;;  %1559 = vmatmul.f32.vlgmr.msra.gmra.mxu2 %v5246_v19  ;;  %1579 = vmatmul.f32.vlgmr.msra.gmra.mxu3 %v5247_v20  ;;  %v4333_v21 = vld [vmem:[%s4002_s20 + $0x370] sm:$0xff]  ;;  %v4341_v19 = vld [vmem:[%s4002_s20 + $0x238] sm:$0xff] }
 0x1cb   : > { %5242 = vst [vmem:[#allocation46_spill] sm:$0xff] %v4309_v16  ;;  %v4344_v20 = vld [vmem:[%s4002_s20 + $0x2b8] sm:$0xff]  ;;  %1610 = vmatpush.msrb.mxu1 %v4328_v32  ;;  %v4352_v16 = vld [vmem:[%s4002_s20 + $0x3e8] sm:$0xff]  ;;  %1624 = vmatpush.msrb.mxu2 %v4333_v21 }
 0x1cc   : > { %5243 = vst [vmem:[#allocation43_spill] sm:$0xff] %v4312_v44  ;;  %v4349_v44 = vld [vmem:[%s4002_s20 + $0x368] sm:$0xff]  ;;  %1644 = vmatpush.msrb.mxu3 %v4336_v17  ;;  %1591 = vmatpush.msrb.mxu0 %v4341_v19 }
 0x1cd   : > { %5244 = vst [vmem:[#allocation44_spill] sm:$0xff] %v4317_v45  ;;  %v4360_v45 = vld [vmem:[%s4002_s20 + $0x2b0] sm:$0xff]  ;;  %1611 = vmatpush.msrb.mxu1 %v4344_v20  ;;  %1625 = vmatpush.msrb.mxu2 %v4349_v44 }
 0x1ce   : > { %5245 = vst [vmem:[#allocation49_spill] sm:$0xff] %v4320_v56  ;;  %v4357_v56 = vld [vmem:[%s4002_s20 + $0x230] sm:$0xff]  ;;  %1645 = vmatpush.msrb.mxu3 %v4352_v16 }
 0x1cf   : > { %5248 = vst [vmem:[#allocation50_spill] sm:$0xff] %v4325_v33  ;;  %v4368_v33 = vld [vmem:[%s4002_s20 + $0x3e0] sm:$0xff]  ;;  %1592 = vmatpush.msrb.mxu0 %v4357_v56  ;;  %1612 = vmatpush.msrb.mxu1 %v4360_v45 }
 0x1d0   : > { %5249 = vst [vmem:[#allocation47_spill] sm:$0xff] %v4328_v32  ;;  %v4365_v32 = vld [vmem:[%s4002_s20 + $0x360] sm:$0xff]  ;;  %1646 = vmatpush.msrb.mxu3 %v4368_v33 }
 0x1d1   : > { %5250 = vst [vmem:[#allocation48_spill] sm:$0xff] %v4333_v21  ;;  %v4376_v21 = vld [vmem:[%s4002_s20 + $0x2a8] sm:$0xff]  ;;  %1626 = vmatpush.msrb.mxu2 %v4365_v32 }
 0x1d2   : > { %5251 = vst [vmem:[#allocation53_spill] sm:$0xff] %v4336_v17  ;;  %v4373_v17 = vld [vmem:[%s4002_s20 + $0x228] sm:$0xff]  ;;  %1613 = vmatpush.msrb.mxu1 %v4376_v21 }
 0x1d3   : > { %5252 = vst [vmem:[#allocation54_spill] sm:$0xff] %v4341_v19  ;;  %v4384_v19 = vld [vmem:[%s4002_s20 + $0x3d8] sm:$0xff]  ;;  %1593 = vmatpush.msrb.mxu0 %v4373_v17 }
 0x1d4   : > { %5253 = vst [vmem:[#allocation51_spill] sm:$0xff] %v4344_v20  ;;  %v4381_v20 = vld [vmem:[%s4002_s20 + $0x358] sm:$0xff]  ;;  %1647 = vmatpush.msrb.mxu3 %v4384_v19 }
 0x1d5   : > { %5254 = vst [vmem:[#allocation52_spill] sm:$0xff] %v4349_v44  ;;  %v4392_v44 = vld [vmem:[%s4002_s20 + $0x2a0] sm:$0xff]  ;;  %1627 = vmatpush.msrb.mxu2 %v4381_v20 }
 0x1d6   : > { %5255 = vst [vmem:[#allocation57_spill] sm:$0xff] %v4352_v16  ;;  %v4389_v16 = vld [vmem:[%s4002_s20 + $0x220] sm:$0xff]  ;;  %1614 = vmatpush.msrb.mxu1 %v4392_v44 }
 0x1d7   : > { %5256 = vst [vmem:[#allocation58_spill] sm:$0xff] %v4357_v56  ;;  %v4400_v56 = vld [vmem:[%s4002_s20 + $0x3d0] sm:$0xff]  ;;  %1594 = vmatpush.msrb.mxu0 %v4389_v16 }
 0x1d8   : > { %5257 = vst [vmem:[#allocation55_spill] sm:$0xff] %v4360_v45  ;;  %v4397_v45 = vld [vmem:[%s4002_s20 + $0x350] sm:$0xff]  ;;  %1648 = vmatpush.msrb.mxu3 %v4400_v56 }
 0x1d9   : > { %5258 = vst [vmem:[#allocation56_spill] sm:$0xff] %v4365_v32  ;;  %v4408_v32 = vld [vmem:[%s4002_s20 + $0x298] sm:$0xff]  ;;  %1628 = vmatpush.msrb.mxu2 %v4397_v45 }
 0x1da   : > { %5259 = vst [vmem:[#allocation61_spill] sm:$0xff] %v4368_v33  ;;  %v4405_v33 = vld [vmem:[%s4002_s20 + $0x218] sm:$0xff]  ;;  %1615 = vmatpush.msrb.mxu1 %v4408_v32 }
 0x1db   : > { %5260 = vst [vmem:[#allocation62_spill] sm:$0xff] %v4373_v17  ;;  %v4416_v17 = vld [vmem:[%s4002_s20 + $0x3c8] sm:$0xff]  ;;  %1595 = vmatpush.msrb.mxu0 %v4405_v33 }
 0x1dc   : > { %5261 = vst [vmem:[#allocation59_spill] sm:$0xff] %v4376_v21  ;;  %v4413_v21 = vld [vmem:[%s4002_s20 + $0x348] sm:$0xff]  ;;  %1649 = vmatpush.msrb.mxu3 %v4416_v17 }
 0x1dd   : > { %5262 = vst [vmem:[#allocation60_spill] sm:$0xff] %v4381_v20  ;;  %v4424_v20 = vld [vmem:[%s4002_s20 + $0x290] sm:$0xff]  ;;  %1629 = vmatpush.msrb.mxu2 %v4413_v21 }
 0x1de   : > { %5263 = vst [vmem:[#allocation65_spill] sm:$0xff] %v4384_v19  ;;  %v4421_v19 = vld [vmem:[%s4002_s20 + $0x210] sm:$0xff]  ;;  %1616 = vmatpush.msrb.mxu1 %v4424_v20 }
 0x1df   : > { %5264 = vst [vmem:[#allocation66_spill] sm:$0xff] %v4389_v16  ;;  %v4432_v16 = vld [vmem:[%s4002_s20 + $0x3c0] sm:$0xff]  ;;  %1596 = vmatpush.msrb.mxu0 %v4421_v19 }
 0x1e0   : > { %5265 = vst [vmem:[#allocation63_spill] sm:$0xff] %v4392_v44  ;;  %v4429_v44 = vld [vmem:[%s4002_s20 + $0x340] sm:$0xff]  ;;  %1650 = vmatpush.msrb.mxu3 %v4432_v16 }
 0x1e1   : > { %5266 = vst [vmem:[#allocation64_spill] sm:$0xff] %v4397_v45  ;;  %v4440_v45 = vld [vmem:[%s4002_s20 + $0x288] sm:$0xff]  ;;  %1630 = vmatpush.msrb.mxu2 %v4429_v44 }
 0x1e2   : > { %5267 = vst [vmem:[#allocation69_spill] sm:$0xff] %v4400_v56  ;;  %v4437_v56 = vld [vmem:[%s4002_s20 + $0x208] sm:$0xff]  ;;  %1617 = vmatpush.msrb.mxu1 %v4440_v45 }
 0x1e3   : > { %5268 = vst [vmem:[#allocation70_spill] sm:$0xff] %v4405_v33  ;;  %v4448_v33 = vld [vmem:[%s4002_s20 + $0x3b8] sm:$0xff]  ;;  %1597 = vmatpush.msrb.mxu0 %v4437_v56 }
 0x1e4   : > { %5269 = vst [vmem:[#allocation67_spill] sm:$0xff] %v4408_v32  ;;  %v4445_v32 = vld [vmem:[%s4002_s20 + $0x338] sm:$0xff]  ;;  %1651 = vmatpush.msrb.mxu3 %v4448_v33 }
 0x1e5   : > { %5270 = vst [vmem:[#allocation68_spill] sm:$0xff] %v4413_v21  ;;  %v4453_v21 = vld [vmem:[%s4002_s20 + $0x200] sm:$0xff]  ;;  %1631 = vmatpush.msrb.mxu2 %v4445_v32 }
 0x1e6   : > { %5271 = vst [vmem:[#allocation73_spill] sm:$0xff] %v4416_v17  ;;  %v4456_v17 = vld [vmem:[%s4002_s20 + $0x280] sm:$0xff]  ;;  %1598 = vmatpush.msrb.mxu0 %v4453_v21 }
 0x1e7   : > { %5272 = vst [vmem:[#allocation74_spill] sm:$0xff] %v4421_v19  ;;  %v4464_v19 = vld [vmem:[%s4002_s20 + $0x3b0] sm:$0xff]  ;;  %1618 = vmatpush.msrb.mxu1 %v4456_v17  ;;  %1599 = vmatmul.f32.vlgmr.msrb.gmra.mxu0 %v3048_v53 }
 0x1e8   : > { %5273 = vst [vmem:[#allocation71_spill] sm:$0xff] %v4424_v20  ;;  %v4461_v20 = vld [vmem:[%s4002_s20 + $0x330] sm:$0xff]  ;;  %1652 = vmatpush.msrb.mxu3 %v4464_v19  ;;  %1619 = vmatmul.f32.vlgmr.msrb.gmra.mxu1 %v3060_v57 }
 0x1e9   : > { %5274 = vst [vmem:[#allocation72_spill] sm:$0xff] %v4432_v16  ;;  %v4471_v16 = vld [vmem:[%s4002_s20 + $0x328] sm:$0xff]  ;;  %1632 = vmatpush.msrb.mxu2 %v4461_v20  ;;  %1671 = vmatpush.msra.mxu0 %v4005_v10  ;;  %v4499_v53 = vld [vmem:[%s4002_s20 + $0x310] sm:$0xff] }
 0x1ea   : > { %5275 = vst [vmem:[#allocation77_spill] sm:$0xff] %v4437_v56  ;;  %v4474_v56 = vld [vmem:[%s4002_s20 + $0x3a8] sm:$0xff]  ;;  %1691 = vmatpush.msra.mxu1 %v4008_v15  ;;  %v4502_v57 = vld [vmem:[%s4002_s20 + $0x390] sm:$0xff] }
 0x1eb   : > { %5276 = vst [vmem:[#allocation78_spill] sm:$0xff] %v4445_v32  ;;  %v4481_v32 = vld [vmem:[%s4002_s20 + $0x320] sm:$0xff]  ;;  %1633 = vmatpush.msrb.mxu2 %v4471_v16  ;;  %1653 = vmatpush.msrb.mxu3 %v4474_v56  ;;  %v4509_v10 = vld [vmem:[%s4002_s20 + $0x308] sm:$0xff] }
 0x1ec   : > { %5277 = vst [vmem:[#allocation75_spill] sm:$0xff] %v4448_v33  ;;  %v4492_v33 = vld [vmem:[%s4002_s20 + $0x398] sm:$0xff]  ;;  %1672 = vmatpush.msra.mxu0 %v4011_v55  ;;  %1692 = vmatpush.msra.mxu1 %v4014_v14  ;;  %v4512_v15 = vld [vmem:[%s4002_s20 + $0x388] sm:$0xff]  ;;  %v4522_v55 = vld [vmem:[%s4002_s20 + $0x380] sm:$0xff] }
 0x1ed   : > { %5278 = vst [vmem:[#allocation76_spill] sm:$0xff] %v4453_v21  ;;  %v4484_v21 = vld [vmem:[%s4002_s20 + $0x3a0] sm:$0xff]  ;;  %1634 = vmatpush.msrb.mxu2 %v4481_v32  ;;  %v5283_v14 = vld [vmem:[#allocation21_spill] sm:$0xff] }
 0x1ee   : > { %5279 = vst [vmem:[#allocation81_spill] sm:$0xff] %v4456_v17  ;;  %v4489_v17 = vld [vmem:[%s4002_s20 + $0x318] sm:$0xff]  ;;  %1654 = vmatpush.msrb.mxu3 %v4484_v21  ;;  %1673 = vmatpush.msra.mxu0 %v4019_v34 }
 0x1ef   : > { %5280 = vst [vmem:[#allocation82_spill] sm:$0xff] %v4484_v21  ;;  %1635 = vmatpush.msrb.mxu2 %v4489_v17  ;;  %1693 = vmatpush.msra.mxu1 %v4022_v35  ;;  %v4519_v21 = vld [vmem:[%s4002_s20 + $0x300] sm:$0xff]  ;;  %v5284_v34 = vld [vmem:[#allocation17_spill] sm:$0xff] }
 0x1f0   : > { %1655 = vmatpush.msrb.mxu3 %v4492_v33  ;;  %1674 = vmatpush.msra.mxu0 %v4027_v36  ;;  %v5285_v35 = vld [vmem:[#allocation18_spill] sm:$0xff]  ;;  %v5286_v36 = vld [vmem:[#allocation25_spill] sm:$0xff] }
 0x1f1   : > { %1636 = vmatpush.msrb.mxu2 %v4499_v53  ;;  %1694 = vmatpush.msra.mxu1 %v4030_v37  ;;  %v5287_v37 = vld [vmem:[#allocation26_spill] sm:$0xff] }
 0x1f2   : > { %1656 = vmatpush.msrb.mxu3 %v4502_v57  ;;  %1675 = vmatpush.msra.mxu0 %v4035_v38  ;;  %v5288_v38 = vld [vmem:[#allocation23_spill] sm:$0xff] }
 0x1f3   : > { %1637 = vmatpush.msrb.mxu2 %v4509_v10  ;;  %1695 = vmatpush.msra.mxu1 %v4038_v39  ;;  %v5289_v39 = vld [vmem:[#allocation24_spill] sm:$0xff] }
 0x1f4   : > { %1657 = vmatpush.msrb.mxu3 %v4512_v15  ;;  %1676 = vmatpush.msra.mxu0 %v4043_v40  ;;  %v5290_v40 = vld [vmem:[#allocation27_spill] sm:$0xff] }
 0x1f5   : > { %1638 = vmatpush.msrb.mxu2 %v4519_v21  ;;  %1696 = vmatpush.msra.mxu1 %v4046_v41  ;;  %v5291_v41 = vld [vmem:[#allocation28_spill] sm:$0xff] }
 0x1f6   : > { %1658 = vmatpush.msrb.mxu3 %v4522_v55  ;;  %1639 = vmatmul.f32.vlgmr.msrb.gmra.mxu2 %v3072_v60  ;;  %v5282_v60 = vld [vmem:[#allocation20_spill] sm:$0xff] }
 0x1f7   : > { %1659 = vmatmul.f32.vlgmr.msrb.gmra.mxu3 %v3084_v52  ;;  %1711 = vmatpush.msra.mxu2 %v4059_v46  ;;  %v5281_v52 = vld [vmem:[#allocation15_spill] sm:$0xff]  ;;  %v5294_v46 = vld [vmem:[#allocation33_spill] sm:$0xff] }
 0x1f8   : > { %1731 = vmatpush.msra.mxu3 %v4062_v47  ;;  %1677 = vmatpush.msra.mxu0 %v4053_v42  ;;  %v5292_v42 = vld [vmem:[#allocation29_spill] sm:$0xff]  ;;  %v5295_v47 = vld [vmem:[#allocation34_spill] sm:$0xff] }
 0x1f9   : > { %1697 = vmatpush.msra.mxu1 %v4056_v43  ;;  %1712 = vmatpush.msra.mxu2 %v4073_v1  ;;  %v5293_v43 = vld [vmem:[#allocation30_spill] sm:$0xff]  ;;  %v5298_v1 = vld [vmem:[#allocation37_spill] sm:$0xff] }
 0x1fa   : > { %1732 = vmatpush.msra.mxu3 %v4076_v2  ;;  %1678 = vmatpush.msra.mxu0 %v4065_v49  ;;  %v5296_v49 = vld [vmem:[#allocation31_spill] sm:$0xff]  ;;  %v5299_v2 = vld [vmem:[#allocation38_spill] sm:$0xff] }
 0x1fb   : > { %1698 = vmatpush.msra.mxu1 %v4068_v0  ;;  %1713 = vmatpush.msra.mxu2 %v4089_v5  ;;  %v5297_v0 = vld [vmem:[#allocation32_spill] sm:$0xff]  ;;  %v5302_v5 = vld [vmem:[#allocation41_spill] sm:$0xff] }
 0x1fc   : > { %1733 = vmatpush.msra.mxu3 %v4092_v6  ;;  %1679 = vmatpush.msra.mxu0 %v4081_v3  ;;  %v5300_v3 = vld [vmem:[#allocation35_spill] sm:$0xff]  ;;  %v5303_v6 = vld [vmem:[#allocation42_spill] sm:$0xff] }
 0x1fd   : > { %1699 = vmatpush.msra.mxu1 %v4084_v4  ;;  %1714 = vmatpush.msra.mxu2 %v4105_v9  ;;  %v5301_v4 = vld [vmem:[#allocation36_spill] sm:$0xff]  ;;  %v5306_v9 = vld [vmem:[#allocation45_spill] sm:$0xff] }
 0x1fe   : > { %1734 = vmatpush.msra.mxu3 %v4108_v11  ;;  %1680 = vmatpush.msra.mxu0 %v4097_v7  ;;  %v5304_v7 = vld [vmem:[#allocation39_spill] sm:$0xff]  ;;  %v5307_v11 = vld [vmem:[#allocation46_spill] sm:$0xff] }
 0x1ff   : > { %1700 = vmatpush.msra.mxu1 %v4100_v8  ;;  %1715 = vmatpush.msra.mxu2 %v4121_v48  ;;  %v5305_v8 = vld [vmem:[#allocation40_spill] sm:$0xff]  ;;  %v5310_v48 = vld [vmem:[#allocation49_spill] sm:$0xff] }
 0x200   : > { %1735 = vmatpush.msra.mxu3 %v4124_v51  ;;  %1681 = vmatpush.msra.mxu0 %v4113_v12  ;;  %v5308_v12 = vld [vmem:[#allocation43_spill] sm:$0xff]  ;;  %v5311_v51 = vld [vmem:[#allocation50_spill] sm:$0xff] }
 0x201   : > { %1701 = vmatpush.msra.mxu1 %v4116_v63  ;;  %1716 = vmatpush.msra.mxu2 %v4137_v58  ;;  %v5309_v63 = vld [vmem:[#allocation44_spill] sm:$0xff]  ;;  %v5314_v58 = vld [vmem:[#allocation53_spill] sm:$0xff] }
 0x202   : > { %1736 = vmatpush.msra.mxu3 %v4140_v59  ;;  %1682 = vmatpush.msra.mxu0 %v4129_v50  ;;  %v5312_v50 = vld [vmem:[#allocation47_spill] sm:$0xff]  ;;  %v5315_v59 = vld [vmem:[#allocation54_spill] sm:$0xff] }
 0x203   : > { %1702 = vmatpush.msra.mxu1 %v4132_v54  ;;  %1717 = vmatpush.msra.mxu2 %v4155_v22  ;;  %v5313_v54 = vld [vmem:[#allocation48_spill] sm:$0xff]  ;;  %v5318_v22 = vld [vmem:[#allocation57_spill] sm:$0xff] }
 0x204   : > { %1737 = vmatpush.msra.mxu3 %v4158_v23  ;;  %1683 = vmatpush.msra.mxu0 %v4147_v61  ;;  %v5316_v61 = vld [vmem:[#allocation51_spill] sm:$0xff]  ;;  %v5319_v23 = vld [vmem:[#allocation58_spill] sm:$0xff] }
 0x205   : > { %1703 = vmatpush.msra.mxu1 %v4150_v62  ;;  %1718 = vmatpush.msra.mxu2 %v4169_v26  ;;  %v5317_v62 = vld [vmem:[#allocation52_spill] sm:$0xff]  ;;  %v5322_v26 = vld [vmem:[#allocation61_spill] sm:$0xff] }
 0x206   : > { %1738 = vmatpush.msra.mxu3 %v4172_v27  ;;  %1684 = vmatpush.msra.mxu0 %v4161_v24  ;;  %v5320_v24 = vld [vmem:[#allocation55_spill] sm:$0xff]  ;;  %v5323_v27 = vld [vmem:[#allocation62_spill] sm:$0xff] }
 0x207   : > { %1704 = vmatpush.msra.mxu1 %v4164_v25  ;;  %1719 = vmatpush.msra.mxu2 %v4185_v30  ;;  %v5321_v25 = vld [vmem:[#allocation56_spill] sm:$0xff] }
 0x208   : > { %1739 = vmatpush.msra.mxu3 %v4188_v31  ;;  %1685 = vmatpush.msra.mxu0 %v4177_v28  ;;  %v5324_v28 = vld [vmem:[#allocation59_spill] sm:$0xff]  ;;  %v5325_v30 = vld [vmem:[#allocation60_spill] sm:$0xff]  ;;  %v5326_v31 = vld [vmem:[#allocation65_spill] sm:$0xff] }
 0x209   : > { %1705 = vmatpush.msra.mxu1 %v4180_v29  ;;  %1720 = vmatpush.msra.mxu2 %v4201_v13 }
 0x20a   : > { %1740 = vmatpush.msra.mxu3 %v4204_v18  ;;  %1686 = vmatpush.msra.mxu0 %v5281_v52  ;;  %v5327_v18 = vld [vmem:[#allocation66_spill] sm:$0xff]  ;;  %v5328_v52 = vld [vmem:[#allocation63_spill] sm:$0xff] }
 0x20b   : > { %1706 = vmatpush.msra.mxu1 %v5282_v60  ;;  %1721 = vmatpush.msra.mxu2 %v5285_v35  ;;  %v5329_v60 = vld [vmem:[#allocation64_spill] sm:$0xff]  ;;  %v5332_v35 = vld [vmem:[#allocation67_spill] sm:$0xff] }
 0x20c   : > { %1751 = vmatpush.msrb.mxu0 %v5283_v14  ;;  %1741 = vmatpush.msra.mxu3 %v5286_v36  ;;  %v5330_v14 = vld [vmem:[#allocation69_spill] sm:$0xff]  ;;  %v5333_v36 = vld [vmem:[#allocation68_spill] sm:$0xff] }
 0x20d   : > { %1771 = vmatpush.msrb.mxu1 %v5284_v34  ;;  %1722 = vmatpush.msra.mxu2 %v5289_v39  ;;  %v5331_v34 = vld [vmem:[#allocation70_spill] sm:$0xff]  ;;  %v5336_v39 = vld [vmem:[#allocation71_spill] sm:$0xff] }
 0x20e   : > { %1752 = vmatpush.msrb.mxu0 %v5287_v37  ;;  %1742 = vmatpush.msra.mxu3 %v5290_v40  ;;  %v5334_v37 = vld [vmem:[#allocation73_spill] sm:$0xff]  ;;  %v5337_v40 = vld [vmem:[#allocation72_spill] sm:$0xff] }
 0x20f   : > { %1772 = vmatpush.msrb.mxu1 %v5288_v38  ;;  %1723 = vmatpush.msra.mxu2 %v5293_v43  ;;  %v1224_v29 = vpop.f32.mrf.mxu0  ;;  %v5335_v38 = vld [vmem:[#allocation74_spill] sm:$0xff]  ;;  %v5340_v43 = vld [vmem:[#allocation75_spill] sm:$0xff] }
 0x210   : > { %1753 = vmatpush.msrb.mxu0 %v5291_v41  ;;  %1743 = vmatpush.msra.mxu3 %v5294_v46  ;;  %1367 = vst [vmem:[#allocation2 + $0x10] sm:$0xf] %v1224_v29  ;;  %v1244_v13 = vpop.f32.mrf.mxu1  ;;  %v5338_v41 = vld [vmem:[#allocation77_spill] sm:$0xff]  ;;  %v5341_v46 = vld [vmem:[#allocation76_spill] sm:$0xff]  ;;  %v1971_v29 = vld [vmem:[#allocation2 + $0x88] sm:$0xff] }
 0x211   : > { %1773 = vmatpush.msrb.mxu1 %v5292_v42  ;;  %1724 = vmatpush.msra.mxu2 %v5297_v0  ;;  %1368 = vst [vmem:[#allocation2 + $0x30] sm:$0xf] %v1244_v13  ;;  %v5339_v42 = vld [vmem:[#allocation78_spill] sm:$0xff] }
 0x212   : > { %1754 = vmatpush.msrb.mxu0 %v5295_v47  ;;  %1744 = vmatpush.msra.mxu3 %v5298_v1  ;;  %v5342_v47 = vld [vmem:[#allocation81_spill] sm:$0xff]  ;;  %v2000_v13 = vld [vmem:[#allocation2 + $0xa0] sm:$0xff] }
 0x213   : > { %1774 = vmatpush.msrb.mxu1 %v5296_v49  ;;  %1725 = vmatpush.msra.mxu2 %v5301_v4 }
 0x214   : > { %1755 = vmatpush.msrb.mxu0 %v5299_v2  ;;  %1745 = vmatpush.msra.mxu3 %v5302_v5  ;;  %v1842_v5 = vld [vmem:[#allocation2 + $0x8] sm:$0xff] }
 0x215   : > { %1775 = vmatpush.msrb.mxu1 %v5300_v3  ;;  %1726 = vmatpush.msra.mxu2 %v5305_v8  ;;  %v1880_v8 = vld [vmem:[#allocation2 + $0x20] sm:$0xff] }
 0x216   : > { %1756 = vmatpush.msrb.mxu0 %v5303_v6  ;;  %1746 = vmatpush.msra.mxu3 %v5306_v9  ;;  %v1881_v6 = vld [vmem:[#allocation2 + $0x28] sm:$0xff] }
 0x217   : > { %1776 = vmatpush.msrb.mxu1 %v5304_v7  ;;  %1791 = vmatpush.msrb.mxu2 %v5309_v63  ;;  %v1841_v7 = vld [vmem:[#allocation2] sm:$0xff] }
 0x218   : > { %1757 = vmatpush.msrb.mxu0 %v5307_v11  ;;  %1811 = vmatpush.msrb.mxu3 %v5310_v48 }
 0x219   : > { %1777 = vmatpush.msrb.mxu1 %v5308_v12  ;;  %1792 = vmatpush.msrb.mxu2 %v5313_v54  ;;  %v4657_v12 = vld [vmem:[%s4710_s4] sm:$0xff] }
 0x21a   : > { %1758 = vmatpush.msrb.mxu0 %v5311_v51  ;;  %1812 = vmatpush.msrb.mxu3 %v5314_v58 }
 0x21b   : > { %1778 = vmatpush.msrb.mxu1 %v5312_v50  ;;  %1793 = vmatpush.msrb.mxu2 %v5317_v62  ;;  %v1910_v62 = vld [vmem:[#allocation2 + $0x40] sm:$0xff] }
 0x21c   : > { %1759 = vmatpush.msrb.mxu0 %v5315_v59  ;;  %1813 = vmatpush.msrb.mxu3 %v5318_v22  ;;  %v1911_v59 = vld [vmem:[#allocation2 + $0x48] sm:$0xff]  ;;  %v1940_v22 = vld [vmem:[#allocation2 + $0x60] sm:$0xff] }
 0x21d   : > { %1779 = vmatpush.msrb.mxu1 %v5316_v61  ;;  %1794 = vmatpush.msrb.mxu2 %v5321_v25  ;;  %v1941_v61 = vld [vmem:[#allocation2 + $0x68] sm:$0xff]  ;;  %v1840_v25 = vld [vmem:[%s4711_s5] sm:$0xff] }
 0x21e   : > { %1760 = vmatpush.msrb.mxu0 %v5319_v23  ;;  %1814 = vmatpush.msrb.mxu3 %v5322_v26 }
 0x21f   : > { %1780 = vmatpush.msrb.mxu1 %v5320_v24  ;;  %1795 = vmatpush.msrb.mxu2 %v5325_v30  ;;  %v2001_v30 = vld [vmem:[#allocation2 + $0xa8] sm:$0xff] }
 0x220   : > { %1761 = vmatpush.msrb.mxu0 %v5323_v27  ;;  %1815 = vmatpush.msrb.mxu3 %v5326_v31  ;;  %v2522_v27 = vmov 0   ;;  %v1970_v31 = vld [vmem:[#allocation2 + $0x80] sm:$0xff] }
 0x221   : > { %1781 = vmatpush.msrb.mxu1 %v5324_v28  ;;  %1796 = vmatpush.msrb.mxu2 %v5329_v60 }
 0x222   : > { %1762 = vmatpush.msrb.mxu0 %v5327_v18  ;;  %1816 = vmatpush.msrb.mxu3 %v5330_v14 }
 0x223   : > { %1782 = vmatpush.msrb.mxu1 %v5328_v52  ;;  %1797 = vmatpush.msrb.mxu2 %v5333_v36  ;;  %v2031_v36 = vld [vmem:[#allocation2 + $0xc8] sm:$0xff] }
 0x224   : > { %1763 = vmatpush.msrb.mxu0 %v5331_v34  ;;  %1817 = vmatpush.msrb.mxu3 %v5334_v37  ;;  %v2061_v37 = vld [vmem:[#allocation2 + $0xe8] sm:$0xff] }
 0x225   : > { %1783 = vmatpush.msrb.mxu1 %v5332_v35  ;;  %1798 = vmatpush.msrb.mxu2 %v4429_v44  ;;  %v5343_v44 = vld [vmem:[#allocation82_spill] sm:$0xff] }
 0x226   : > { %1764 = vmatpush.msrb.mxu0 %v5335_v38  ;;  %1818 = vmatpush.msrb.mxu3 %v5337_v40  ;;  %v2030_v38 = vld [vmem:[#allocation2 + $0xc0] sm:$0xff] }
 0x227   : > { %1784 = vmatpush.msrb.mxu1 %v5336_v39  ;;  %1799 = vmatpush.msrb.mxu2 %v5339_v42  ;;  %v2060_v39 = vld [vmem:[#allocation2 + $0xe0] sm:$0xff] }
 0x228   : > { %1765 = vmatpush.msrb.mxu0 %v5338_v41  ;;  %1819 = vmatpush.msrb.mxu3 %v5340_v43 }
 0x229   : > { %1785 = vmatpush.msrb.mxu1 %v4440_v45  ;;  %1800 = vmatpush.msrb.mxu2 %v4461_v20  ;;  %v1264_v45 = vpop.f32.mrf.mxu2  ;;  %v1284_v20 = vpop.f32.mrf.mxu3 }
 0x22a   : > { %1766 = vmatpush.msrb.mxu0 %v5341_v46  ;;  %1820 = vmatpush.msrb.mxu3 %v4464_v19  ;;  %1369 = vst [vmem:[#allocation2 + $0x50] sm:$0xf] %v1264_v45 }
 0x22b   : > { %1786 = vmatpush.msrb.mxu1 %v5342_v47  ;;  %1801 = vmatpush.msrb.mxu2 %v4471_v16  ;;  %1370 = vst [vmem:[#allocation2 + $0x70] sm:$0xf] %v1284_v20 }
 0x22c   : > { %1821 = vmatpush.msrb.mxu3 %v4474_v56  ;;  %2373 = vset.pattern.permute.xlu0 %v2522_v27 }
 0x22d   : > { %1802 = vmatpush.msrb.mxu2 %v4481_v32  ;;  %1847 = vperm.xlu0 %2373, %v1840_v25  }
 0x22e   : > { %1822 = vmatpush.msrb.mxu3 %v5343_v44 }
 0x22f   : > { %1803 = vmatpush.msrb.mxu2 %v4489_v17 }
 0x230   : > { %1823 = vmatpush.msrb.mxu3 %v4492_v33  ;;  %v1304_v16 = vpop.f32.mrf.mxu0 }
 0x231   : > { %1804 = vmatpush.msrb.mxu2 %v4499_v53  ;;  %v1324_v32 = vpop.f32.mrf.mxu1  ;;  %1371 = vst [vmem:[#allocation2 + $0x90] sm:$0xf] %v1304_v16 }
 0x232   : > { %1824 = vmatpush.msrb.mxu3 %v4502_v57  ;;  %1372 = vst [vmem:[#allocation2 + $0xb0] sm:$0xf] %v1324_v32 }
 0x233   : > { %1805 = vmatpush.msrb.mxu2 %v4509_v10 }
 0x234   : > { %1825 = vmatpush.msrb.mxu3 %v4512_v15 }
 0x235   : > { %1806 = vmatpush.msrb.mxu2 %v4519_v21 }
 0x236   : > { %1826 = vmatpush.msrb.mxu3 %v4522_v55 }
 0x238   : > { %v1520_v56 = vpop.f32.mrf.mxu0 }
 0x239   : > { %v1540_v17 = vpop.f32.mrf.mxu1  ;;  %1663 = vst [vmem:[#allocation2 + $0x14] sm:$0xf] %v1520_v56  ;;  %1687 = vmatmul.f32.vlgmr.msra.gmra.mxu0 %v1520_v56 }
 0x23a   : > { %1707 = vmatmul.f32.vlgmr.msra.gmra.mxu1 %v1540_v17  ;;  %1664 = vst [vmem:[#allocation2 + $0x34] sm:$0xf] %v1540_v17 }
 0x240   : > { %v1843_v3 = vld [vmem:[#allocation2 + $0x10] sm:$0xff] }
 0x241   : > { %v1882_v4 = vld [vmem:[#allocation2 + $0x30] sm:$0xff] }
 0x245   : > { %v1344_v33 = vpop.f32.mrf.mxu2  ;;  %v1364_v19 = vpop.f32.mrf.mxu3 }
 0x246   : > { %1373 = vst [vmem:[#allocation2 + $0xd0] sm:$0xf] %v1344_v33 }
 0x247   : > { %1374 = vst [vmem:[#allocation2 + $0xf0] sm:$0xf] %v1364_v19 }
 0x24d   : > { %v1560_v53 = vpop.f32.mrf.mxu2  ;;  %v1580_v57 = vpop.f32.mrf.mxu3 }
 0x24e   : > { %1665 = vst [vmem:[#allocation2 + $0x54] sm:$0xf] %v1560_v53  ;;  %1727 = vmatmul.f32.vlgmr.msra.gmra.mxu2 %v1560_v53  ;;  %1747 = vmatmul.f32.vlgmr.msra.gmra.mxu3 %v1580_v57 }
 0x24f   : > { %1666 = vst [vmem:[#allocation2 + $0x74] sm:$0xf] %v1580_v57 }
 0x255   : > { %v1912_v54 = vld [vmem:[#allocation2 + $0x50] sm:$0xff] }
 0x256   : > { %v1942_v58 = vld [vmem:[#allocation2 + $0x70] sm:$0xff] }
 0x264   : > { %v1600_v21 = vpop.f32.mrf.mxu0 }
 0x265   : > { %v1620_v10 = vpop.f32.mrf.mxu1  ;;  %1667 = vst [vmem:[#allocation2 + $0x94] sm:$0xf] %v1600_v21  ;;  %1767 = vmatmul.f32.vlgmr.msrb.gmra.mxu0 %v1600_v21 }
 0x266   : > { %1787 = vmatmul.f32.vlgmr.msrb.gmra.mxu1 %v1620_v10  ;;  %1668 = vst [vmem:[#allocation2 + $0xb4] sm:$0xf] %v1620_v10 }
 0x26c   : > { %v1972_v26 = vld [vmem:[#allocation2 + $0x90] sm:$0xff] }
 0x26d   : > { %v2002_v28 = vld [vmem:[#allocation2 + $0xb0] sm:$0xff] }
 0x279   : > { %v1640_v15 = vpop.f32.mrf.mxu2 }
 0x27a   : > { %v1660_v55 = vpop.f32.mrf.mxu3  ;;  %1669 = vst [vmem:[#allocation2 + $0xd4] sm:$0xf] %v1640_v15  ;;  %1807 = vmatmul.f32.vlgmr.msrb.gmra.mxu2 %v1640_v15 }
 0x27b   : > { %1827 = vmatmul.f32.vlgmr.msrb.gmra.mxu3 %v1660_v55  ;;  %1670 = vst [vmem:[#allocation2 + $0xf4] sm:$0xf] %v1660_v55 }
 0x281   : > { %v2032_v34 = vld [vmem:[#allocation2 + $0xd0] sm:$0xff] }
 0x282   : > { %v2062_v35 = vld [vmem:[#allocation2 + $0xf0] sm:$0xff] }
 0x29f   : > { %v1848_v42 = vpop.permute.xlu0 %1847 }
 0x2b6   : > { %v1688_v49 = vpop.f32.mrf.mxu0 }
 0x2b7   : > { %v1708_v0 = vpop.f32.mrf.mxu1  ;;  %1831 = vst [vmem:[#allocation2 + $0x18] sm:$0xf] %v1688_v49 }
 0x2b8   : > { %1832 = vst [vmem:[#allocation2 + $0x38] sm:$0xf] %v1708_v0 }
 0x2be   : > { %v1844_v1 = vld [vmem:[#allocation2 + $0x18] sm:$0xf] }
 0x2bf   : > { %2275 = vmatpush.msk.msra.mxu0 %vm1854_vm0, %v1844_v1  ;;  %v1883_v2 = vld [vmem:[#allocation2 + $0x38] sm:$0xf] }
 0x2c0   : > { %2277 = vmatpush.msk.msra.mxu1 %vm1854_vm0, %v1883_v2 }
 0x2c1   : > { %1871 = vmatpush.msra.mxu0 %v1843_v3 }
 0x2c2   : > { %1900 = vmatpush.msra.mxu1 %v1882_v4 }
 0x2c3   : > { %1872 = vmatpush.msra.mxu0 %v1842_v5 }
 0x2c4   : > { %1901 = vmatpush.msra.mxu1 %v1881_v6 }
 0x2c5   : > { %1873 = vmatpush.msra.mxu0 %v1841_v7 }
 0x2c6   : > { %1902 = vmatpush.msra.mxu1 %v1880_v8  ;;  %2276 = vmatmul.msk.f32.vlgmr.msra.gmra.mxu0 %vm1850_vm1, %v4657_v12 }
 0x2c7   : > { %2278 = vmatmul.msk.f32.vlgmr.msra.gmra.mxu1 %vm1850_vm1, %v4657_v12 }
 0x2d1   : > { %v1728_v9 = vpop.f32.mrf.mxu2  ;;  %v1748_v11 = vpop.f32.mrf.mxu3 }
 0x2d2   : > { %1833 = vst [vmem:[#allocation2 + $0x58] sm:$0xf] %v1728_v9 }
 0x2d3   : > { %1834 = vst [vmem:[#allocation2 + $0x78] sm:$0xf] %v1748_v11 }
 0x2d9   : > { %v1913_v63 = vld [vmem:[#allocation2 + $0x58] sm:$0xf] }
 0x2da   : > { %2280 = vmatpush.msk.msra.mxu2 %vm1854_vm0, %v1913_v63  ;;  %v1943_v50 = vld [vmem:[#allocation2 + $0x78] sm:$0xf] }
 0x2db   : > { %2283 = vmatpush.msk.msra.mxu3 %vm1854_vm0, %v1943_v50 }
 0x2dc   : > { %1930 = vmatpush.msra.mxu2 %v1912_v54 }
 0x2dd   : > { %1960 = vmatpush.msra.mxu3 %v1942_v58 }
 0x2de   : > { %1931 = vmatpush.msra.mxu2 %v1911_v59 }
 0x2df   : > { %1961 = vmatpush.msra.mxu3 %v1941_v61 }
 0x2e0   : > { %1932 = vmatpush.msra.mxu2 %v1910_v62 }
 0x2e1   : > { %1962 = vmatpush.msra.mxu3 %v1940_v22  ;;  %2281 = vmatmul.msk.f32.vlgmr.msra.gmra.mxu2 %vm1850_vm1, %v4657_v12 }
 0x2e2   : > { %v1768_v48 = vpop.f32.mrf.mxu0  ;;  %2284 = vmatmul.msk.f32.vlgmr.msra.gmra.mxu3 %vm1850_vm1, %v4657_v12 }
 0x2e3   : > { %v1788_v51 = vpop.f32.mrf.mxu1  ;;  %1835 = vst [vmem:[#allocation2 + $0x98] sm:$0xf] %v1768_v48 }
 0x2e4   : > { %1836 = vst [vmem:[#allocation2 + $0xb8] sm:$0xf] %v1788_v51 }
 0x2ea   : > { %v1973_v23 = vld [vmem:[#allocation2 + $0x98] sm:$0xf] }
 0x2eb   : > { %2286 = vmatpush.msk.msrb.mxu0 %vm1854_vm0, %v1973_v23  ;;  %v2003_v24 = vld [vmem:[#allocation2 + $0xb8] sm:$0xf] }
 0x2ec   : > { %2289 = vmatpush.msk.msrb.mxu1 %vm1854_vm0, %v2003_v24 }
 0x2ed   : > { %1990 = vmatpush.msrb.mxu0 %v1972_v26 }
 0x2ee   : > { %2020 = vmatpush.msrb.mxu1 %v2002_v28 }
 0x2ef   : > { %1991 = vmatpush.msrb.mxu0 %v1971_v29 }
 0x2f0   : > { %2021 = vmatpush.msrb.mxu1 %v2001_v30 }
 0x2f1   : > { %1992 = vmatpush.msrb.mxu0 %v1970_v31 }
 0x2f2   : > { %2022 = vmatpush.msrb.mxu1 %v2000_v13  ;;  %2287 = vmatmul.msk.f32.vlgmr.msrb.gmra.mxu0 %vm1850_vm1, %v4657_v12 }
 0x2f3   : > { %2290 = vmatmul.msk.f32.vlgmr.msrb.gmra.mxu1 %vm1850_vm1, %v4657_v12 }
 0x2fd   : > { %v1808_v18 = vpop.f32.mrf.mxu2 }
 0x2fe   : > { %v1828_v52 = vpop.f32.mrf.mxu3  ;;  %1837 = vst [vmem:[#allocation2 + $0xd8] sm:$0xf] %v1808_v18 }
 0x2ff   : > { %1838 = vst [vmem:[#allocation2 + $0xf8] sm:$0xf] %v1828_v52 }
 0x305   : > { %v2033_v60 = vld [vmem:[#allocation2 + $0xd8] sm:$0xf] }
 0x306   : > { %2292 = vmatpush.msk.msrb.mxu2 %vm1854_vm0, %v2033_v60  ;;  %v2063_v14 = vld [vmem:[#allocation2 + $0xf8] sm:$0xf] }
 0x307   : > { %2295 = vmatpush.msk.msrb.mxu3 %vm1854_vm0, %v2063_v14 }
 0x308   : > { %2050 = vmatpush.msrb.mxu2 %v2032_v34 }
 0x309   : > { %2080 = vmatpush.msrb.mxu3 %v2062_v35 }
 0x30a   : > { %2051 = vmatpush.msrb.mxu2 %v2031_v36 }
 0x30b   : > { %2081 = vmatpush.msrb.mxu3 %v2061_v37 }
 0x30c   : > { %2052 = vmatpush.msrb.mxu2 %v2030_v38 }
 0x30d   : > { %2082 = vmatpush.msrb.mxu3 %v2060_v39  ;;  %2293 = vmatmul.msk.f32.vlgmr.msrb.gmra.mxu2 %vm1850_vm1, %v4657_v12 }
 0x30e   : > { %2296 = vmatmul.msk.f32.vlgmr.msrb.gmra.mxu3 %vm1850_vm1, %v4657_v12 }
 0x343   : > { %v1875_v40 = vpop.f32.mrf.mxu0 }
 0x344   : > { %v1904_v41 = vpop.f32.mrf.mxu1  ;;  %v1876_v43 = vadd.f32 %v1875_v40, %v1848_v42 }
 0x345   : > { %v1905_v46 = vadd.f32 %v1904_v41, %v1848_v42 }
 0x346   : > { %1878 = vst [vmem:[%s430_s18] sm:$0xff] %v1876_v43 }
 0x347   : > { %2279 = vst [vmem:[%s430_s18 + $0x8] sm:$0xff] %v1905_v46 }
 0x364   : > { %v1934_v47 = vpop.f32.mrf.mxu2 }
 0x365   : > { %v1935_v44 = vadd.f32 %v1934_v47, %v1848_v42  ;;  %v1964_v45 = vpop.f32.mrf.mxu3 }
 0x366   : > { %v1965_v20 = vadd.f32 %v1964_v45, %v1848_v42 }
 0x367   : > { %2282 = vst [vmem:[%s430_s18 + $0x10] sm:$0xff] %v1935_v44 }
 0x368   : > { %2285 = vst [vmem:[%s430_s18 + $0x18] sm:$0xff] %v1965_v20 }
 0x36f   : > { %v1994_v16 = vpop.f32.mrf.mxu0 }
 0x370   : > { %v1995_v32 = vadd.f32 %v1994_v16, %v1848_v42  ;;  %v2024_v56 = vpop.f32.mrf.mxu1 }
 0x371   : > { %v2025_v17 = vadd.f32 %v2024_v56, %v1848_v42 }
 0x372   : > { %2288 = vst [vmem:[%s430_s18 + $0x20] sm:$0xff] %v1995_v32 }
 0x373   : > { %2291 = vst [vmem:[%s430_s18 + $0x28] sm:$0xff] %v2025_v17 }
 0x390   : > { %v2054_v33 = vpop.f32.mrf.mxu2 }
 0x391   : > { %v2055_v19 = vadd.f32 %v2054_v33, %v1848_v42  ;;  %v2084_v53 = vpop.f32.mrf.mxu3 }
 0x392   : > { %v2085_v57 = vadd.f32 %v2084_v53, %v1848_v42 }
 0x393   : > { %2294 = vst [vmem:[%s430_s18 + $0x30] sm:$0xff] %v2055_v19 }
 0x394   : > { %2297 = vst [vmem:[%s430_s18 + $0x38] sm:$0xff] %v2085_v57 }
 0x395 PF: > { %s22_s26 = sadd.s32 1, %s2518_s26   ;;  %s5344_s24 = sld [smem:[#allocation10_spill]] }
 0x396   : > { %p19_p0 = scmp.ge.s32.totalorder %s22_s26, 4   ;;  %s5345_s23 = sld [smem:[#allocation13_spill]] }
 0x397   : > { %s5346_s19 = sld [smem:[#allocation11_spill]]  ;;  %s5348_s21 = smov %s2502_s22 }
 0x398   : > { %s5347_s25 = sld [smem:[#allocation12_spill]] }
 0x399   :  { %21 = sbr.rel (!%p19_p0) target bundleno = 8 (0x8), region = 125 }
 0x39b   : > { %s5349_s22 = smov %s5344_s24 }
 0x39d   : > { %s5350_s24 = smov %s5346_s19 }
 0x39e   :  { %2118 = vsyncpa [#allocation4], 1 }
 0x39f   :  { %2120 = vsyncpa [#allocation4 + $0x1], 1 }
 0x3a0   :  { %2121 = vsyncpa [#allocation6], 1 }
 0x3a1   :  { %2123 = vsyncpa [#allocation6 + $0x1], 1 }

</bundles_post_ra>
